<compile_context>
chip_gen: v7x
topology: tpu7x:2x2x1
jax: 0.10.0
libtpu: 0.0.40
codegen_flags: <defaults>
</compile_context>

<pallas_src>
import jax
import jax.numpy as jnp
from jax.experimental import pallas as pl
from jax.experimental.pallas import tpu as pltpu

B, T, F = 16, 16, 16          # batch, time frames, freq bins
C = 8                         # conv output channels
L = 8                         # number of keyword labels
KH = KW = 3                   # conv kernel size (valid padding)
Ho, Wo = T - KH + 1, F - KW + 1   # 14, 14
EPS = 0.001                   # NormalizerBernoulli._epsilon
MM_PREC = jax.lax.Precision.HIGHEST   # keep MXU f32 matmuls full precision


def sc_model_kernel(x_ref, mean_ref, inv_scale_ref, w_band_ref, conv_bias_ref,
                    fc_fold_ref, pool_ref, out_bias_ref, out_ref):
    # x_ref: (B*T, F); row r corresponds to spectrograms[r // T, r % T, :].
    # ---- spectrogram_norm.normalize: (x - mean) * (1/scale), per-frequency ----
    xn = (x_ref[...] - mean_ref[...]) * inv_scale_ref[...]              # (B*T, F)

    # ---- im2col along time: row r gets [xn[r], xn[r+1], xn[r+2]] ----
    # Wrapped rows (t >= Ho within a batch) hold finite junk and are zeroed
    # later by the 0/1 pooling matrix.
    sh1 = jnp.concatenate([xn[1:, :], xn[:1, :]], axis=0)
    sh2 = jnp.concatenate([xn[2:, :], xn[:2, :]], axis=0)
    lhs = jnp.concatenate([xn, sh1, sh2], axis=1)                       # (B*T, KH*F)

    # ---- Conv2d(1, C, 3, valid) as one MXU matmul vs. banded weight ----
    # h[(b,t), c*Wo + j] = conv[b, c, i=t, j]; then bias + ReLU.
    h = jnp.dot(lhs, w_band_ref[...], preferred_element_type=jnp.float32,
                precision=MM_PREC) + conv_bias_ref[...]
    h = jnp.maximum(h, 0.0)                                             # (B*T, C*Wo)

    # ---- global mean pool + Linear(C, L), folded ----
    # fc_fold contains fc_w / (Ho*Wo); pool_ref sums the Ho valid rows per batch
    # (and masks the 2 invalid im2col rows).  Both stay on the MXU.
    part = jnp.dot(h, fc_fold_ref[...], preferred_element_type=jnp.float32,
                   precision=MM_PREC)                                   # (B*T, L)
    logits = jnp.dot(pool_ref[...], part, preferred_element_type=jnp.float32,
                     precision=MM_PREC) + out_bias_ref[...]             # (B, L)

    # ---- softmax over labels (exact divide keeps the comparison tight) ----
    mx = jnp.max(logits, axis=-1, keepdims=True)
    e = jnp.exp(logits - mx)
    prob = e / jnp.sum(e, axis=-1, keepdims=True)

    # Single merged output slab: [prob | logits]  (one store, one DMA).
    out_ref[...] = jnp.concatenate([prob, logits], axis=-1)             # (B, 2L)


@jax.jit
def sc_model_forward(spectrograms, params):
    # Contiguous collapse (B,T,F) -> (B*T, F): pure layout plumbing (free in XLA).
    x2 = spectrograms.reshape(B * T, F)
    vmem = pl.BlockSpec(memory_space=pltpu.MemorySpace.VMEM)
    out = pl.pallas_call(
        sc_model_kernel,
        out_shape=jax.ShapeDtypeStruct((B, 2 * L), jnp.float32),
        in_specs=[vmem] * 8,
        out_specs=vmem,
    )(x2,
      params["spec_mean_row"], params["inv_spec_scale_row"],
      params["w_band"], params["conv_bias_row"],
      params["fc_fold"], params["pool_left"], params["out_bias"])
    return out[:, :L], out[:, L:]                                       # (prob, logits)


def reference_forward(spectrograms, p):
    """Pure-JAX reference mirroring the PyTorch forward (exact f32, no MXU ops)."""
    xn = (spectrograms - p["spec_mean"]) / p["spec_scale"]              # (B,T,F)
    acc = jnp.zeros((B, C, Ho, Wo), jnp.float32)
    for ki in range(KH):
        for kj in range(KW):
            acc = acc + (xn[:, None, ki:ki + Ho, kj:kj + Wo]
                         * p["conv_w"][None, :, ki, kj, None, None])
    acc = acc + p["conv_b"][None, :, None, None]
    pooled = jnp.mean(jax.nn.relu(acc), axis=(2, 3))                    # (B,C)
    # Linear(C, L) as an explicit broadcast-sum to keep the reference f32-exact.
    logits_norm = jnp.sum(pooled[:, :, None] * p["fc_w"].T[None, :, :], axis=1) + p["fc_b"]
    logits = logits_norm + jnp.log(p["label_mean"] / (1.0 - p["label_mean"]))
    prob = jax.nn.softmax(logits, axis=-1)
    return prob, logits


def make_params(key):
    k1, k2, k3, k4, k5, k6, k7 = jax.random.split(key, 7)
    spec_mean = jax.random.normal(k1, (1, 1, F), jnp.float32)
    spec_scale = jnp.abs(jax.random.normal(k2, (1, 1, F), jnp.float32)) + 0.5
    conv_w = 0.1 * jax.random.normal(k3, (C, KH, KW), jnp.float32)      # C_in = 1
    conv_b = 0.1 * jax.random.normal(k4, (C,), jnp.float32)
    fc_w = 0.1 * jax.random.normal(k5, (L, C), jnp.float32)             # PyTorch (out, in)
    fc_b = 0.1 * jax.random.normal(k6, (L,), jnp.float32)
    label_mean = jnp.clip(jax.random.uniform(k7, (L,), jnp.float32), EPS, 1.0 - EPS)

    # ---- host-folded kernel constants ----
    # banded conv weight: w_band[ki*F + f, c*Wo + j] = conv_w[c, ki, f - j] (valid taps)
    ki = jnp.arange(KH)[:, None, None, None]
    f = jnp.arange(F)[None, :, None, None]
    c = jnp.arange(C)[None, None, :, None]
    j = jnp.arange(Wo)[None, None, None, :]
    kj = f - j
    w_gather = conv_w[c, ki, jnp.clip(kj, 0, KW - 1)]                   # (KH,F,C,Wo)
    w_band = jnp.where((kj >= 0) & (kj < KW), w_gather, 0.0).reshape(KH * F, C * Wo)

    # pool + FC folded: fc_fold[c*Wo + j, l] = fc_w[l, c] / (Ho*Wo)
    fc_fold = jnp.repeat(fc_w.T, Wo, axis=0) / float(Ho * Wo)           # (C*Wo, L)

    # per-batch row pooling; also masks the 2 wrapped im2col rows per batch
    r = jnp.arange(B * T)[None, :]
    b = jnp.arange(B)[:, None]
    pool_left = (((r // T) == b) & ((r % T) < Ho)).astype(jnp.float32)  # (B, B*T)

    return {
        # raw parameters (used by the pure-JAX reference)
        "spec_mean": spec_mean, "spec_scale": spec_scale,
        "conv_w": conv_w, "conv_b": conv_b,
        "fc_w": fc_w, "fc_b": fc_b, "label_mean": label_mean.reshape(1, L),
        # folded kernel constants
        "spec_mean_row": spec_mean.reshape(1, F),
        "inv_spec_scale_row": (1.0 / spec_scale).reshape(1, F),
        "w_band": w_band,
        "conv_bias_row": jnp.repeat(conv_b, Wo).reshape(1, C * Wo),
        "fc_fold": fc_fold,
        "pool_left": pool_left,
        "out_bias": (fc_b + jnp.log(label_mean / (1.0 - label_mean))).reshape(1, L),
    }


if __name__ == "__main__":
    key = jax.random.PRNGKey(0)
    kx, kp = jax.random.split(key)
    spectrograms = jax.random.normal(kx, (B, T, F), jnp.float32)
    params = make_params(kp)

    prob, logits = sc_model_forward(spectrograms, params)
    jax.block_until_ready((prob, logits))

    prob_ref, logits_ref = reference_forward(spectrograms, params)
    assert prob.shape == (B, L) and logits.shape == (B, L)
    assert jnp.allclose(logits, logits_ref, atol=1e-4, rtol=1e-4), \
        float(jnp.max(jnp.abs(logits - logits_ref)))
    assert jnp.allclose(prob, prob_ref, atol=1e-4, rtol=1e-4), \
        float(jnp.max(jnp.abs(prob - prob_ref)))
    assert jnp.allclose(jnp.sum(prob, axis=-1), 1.0, atol=1e-4)

    print("KERNEL_OK")
</pallas_src>

<mosaic_0001>
module attributes {stable_mosaic.version = 11 : i64} {
  func.func @sc_model_kernel(%arg0: memref<256x16xf32, #tpu.memory_space<vmem>>, %arg1: memref<1x16xf32, #tpu.memory_space<vmem>>, %arg2: memref<1x16xf32, #tpu.memory_space<vmem>>, %arg3: memref<48x112xf32, #tpu.memory_space<vmem>>, %arg4: memref<1x112xf32, #tpu.memory_space<vmem>>, %arg5: memref<112x8xf32, #tpu.memory_space<vmem>>, %arg6: memref<16x256xf32, #tpu.memory_space<vmem>>, %arg7: memref<1x8xf32, #tpu.memory_space<vmem>>, %arg8: memref<16x16xf32, #tpu.memory_space<vmem>>) attributes {dimension_semantics = [], scalar_prefetch = 0 : i64, scratch_operands = 0 : i64, tpu.core_type = #tpu.core_type<tc>} {
    %c0 = arith.constant 0 : index
    %c0_0 = arith.constant 0 : index
    %0 = vector.load %arg0[%c0, %c0_0] : memref<256x16xf32, #tpu.memory_space<vmem>>, vector<256x16xf32>
    %c0_1 = arith.constant 0 : index
    %c0_2 = arith.constant 0 : index
    %1 = vector.load %arg1[%c0_1, %c0_2] : memref<1x16xf32, #tpu.memory_space<vmem>>, vector<1x16xf32>
    %2 = vector.broadcast %1 : vector<1x16xf32> to vector<256x16xf32>
    %3 = arith.subf %0, %2 : vector<256x16xf32>
    %c0_3 = arith.constant 0 : index
    %c0_4 = arith.constant 0 : index
    %4 = vector.load %arg2[%c0_3, %c0_4] : memref<1x16xf32, #tpu.memory_space<vmem>>, vector<1x16xf32>
    %5 = vector.broadcast %4 : vector<1x16xf32> to vector<256x16xf32>
    %6 = arith.mulf %3, %5 : vector<256x16xf32>
    %7 = vector.extract_strided_slice %6 {offsets = [1, 0], sizes = [255, 16], strides = [1, 1]} : vector<256x16xf32> to vector<255x16xf32>
    %8 = vector.extract_strided_slice %6 {offsets = [0, 0], sizes = [1, 16], strides = [1, 1]} : vector<256x16xf32> to vector<1x16xf32>
    %9 = tpu.concatenate %7, %8 in 0 : vector<255x16xf32>, vector<1x16xf32> -> vector<256x16xf32>
    %10 = vector.extract_strided_slice %6 {offsets = [2, 0], sizes = [254, 16], strides = [1, 1]} : vector<256x16xf32> to vector<254x16xf32>
    %11 = vector.extract_strided_slice %6 {offsets = [0, 0], sizes = [2, 16], strides = [1, 1]} : vector<256x16xf32> to vector<2x16xf32>
    %12 = tpu.concatenate %10, %11 in 0 : vector<254x16xf32>, vector<2x16xf32> -> vector<256x16xf32>
    %13 = tpu.concatenate %6, %9, %12 in 1 : vector<256x16xf32>, vector<256x16xf32>, vector<256x16xf32> -> vector<256x48xf32>
    %c0_5 = arith.constant 0 : index
    %c0_6 = arith.constant 0 : index
    %14 = vector.load %arg3[%c0_5, %c0_6] : memref<48x112xf32, #tpu.memory_space<vmem>>, vector<48x112xf32>
    %cst = arith.constant dense<0.000000e+00> : vector<256x112xf32>
    %15 = tpu.matmul %13, %14, %cst {dimension_numbers = #tpu.dot_dimension_numbers<[1], [0], [0], [1], [0, 0, 1, 1], [], []>, precision = #tpu.contract_precision<fp32>} : vector<256x48xf32>, vector<48x112xf32>, vector<256x112xf32> -> vector<256x112xf32>
    %c0_7 = arith.constant 0 : index
    %c0_8 = arith.constant 0 : index
    %16 = vector.load %arg4[%c0_7, %c0_8] : memref<1x112xf32, #tpu.memory_space<vmem>>, vector<1x112xf32>
    %17 = vector.broadcast %16 : vector<1x112xf32> to vector<256x112xf32>
    %18 = arith.addf %15, %17 : vector<256x112xf32>
    %cst_9 = arith.constant 0.000000e+00 : f32
    %19 = vector.broadcast %cst_9 : f32 to vector<256x112xf32>
    %20 = arith.maximumf %18, %19 : vector<256x112xf32>
    %c0_10 = arith.constant 0 : index
    %c0_11 = arith.constant 0 : index
    %21 = vector.load %arg5[%c0_10, %c0_11] : memref<112x8xf32, #tpu.memory_space<vmem>>, vector<112x8xf32>
    %cst_12 = arith.constant dense<0.000000e+00> : vector<256x8xf32>
    %22 = tpu.matmul %20, %21, %cst_12 {dimension_numbers = #tpu.dot_dimension_numbers<[1], [0], [0], [1], [0, 0, 1, 1], [], []>, precision = #tpu.contract_precision<fp32>} : vector<256x112xf32>, vector<112x8xf32>, vector<256x8xf32> -> vector<256x8xf32>
    %c0_13 = arith.constant 0 : index
    %c0_14 = arith.constant 0 : index
    %23 = vector.load %arg6[%c0_13, %c0_14] : memref<16x256xf32, #tpu.memory_space<vmem>>, vector<16x256xf32>
    %cst_15 = arith.constant dense<0.000000e+00> : vector<16x8xf32>
    %24 = tpu.matmul %23, %22, %cst_15 {dimension_numbers = #tpu.dot_dimension_numbers<[1], [0], [0], [1], [0, 0, 1, 1], [], []>, precision = #tpu.contract_precision<fp32>} : vector<16x256xf32>, vector<256x8xf32>, vector<16x8xf32> -> vector<16x8xf32>
    %c0_16 = arith.constant 0 : index
    %c0_17 = arith.constant 0 : index
    %25 = vector.load %arg7[%c0_16, %c0_17] : memref<1x8xf32, #tpu.memory_space<vmem>>, vector<1x8xf32>
    %26 = vector.broadcast %25 : vector<1x8xf32> to vector<16x8xf32>
    %27 = arith.addf %24, %26 : vector<16x8xf32>
    %cst_18 = arith.constant dense<0xFF800000> : vector<16xf32>
    %28 = vector.multi_reduction <maximumf>, %27, %cst_18 [1] : vector<16x8xf32> to vector<16xf32>
    %29 = vector.shape_cast %28 : vector<16xf32> to vector<16x1xf32>
    %30 = vector.broadcast %29 : vector<16x1xf32> to vector<16x8xf32>
    %31 = arith.subf %27, %30 : vector<16x8xf32>
    %32 = math.exp %31 : vector<16x8xf32>
    %cst_19 = arith.constant dense<0.000000e+00> : vector<16xf32>
    %33 = vector.multi_reduction <add>, %32, %cst_19 [1] : vector<16x8xf32> to vector<16xf32>
    %34 = vector.shape_cast %33 : vector<16xf32> to vector<16x1xf32>
    %35 = vector.broadcast %34 : vector<16x1xf32> to vector<16x8xf32>
    %36 = arith.divf %32, %35 : vector<16x8xf32>
    %37 = tpu.concatenate %36, %27 in 1 : vector<16x8xf32>, vector<16x8xf32> -> vector<16x16xf32>
    %c0_20 = arith.constant 0 : index
    %c0_21 = arith.constant 0 : index
    %38 = vector.load %arg8[%c0_20, %c0_21] : memref<16x16xf32, #tpu.memory_space<vmem>>, vector<16x16xf32>
    tpu.vector_store %arg8[%c0_20, %c0_21], %37 {strides = array<i32>} : memref<16x16xf32, #tpu.memory_space<vmem>>, vector<16x16xf32>,
    return
  }
}

</mosaic_0001>

<bundles_post_ra>
// kernel: sc_model_forward.1
= control target key start
LH: loop header
LB: loop body
LE: loop exit
PB: predicated region body
PF: predicated region fallthrough
CT: control target
= control target key end

     0   :  { %13 = vsyncpa [#allocation3], 0  ;;  %s7966_s27 = smov [#allocation2]   ;;  %s10441_s0 = inlined_call_operand.hbm [shape: f32[256,16], index: 0, kind: input, shape index: {}]   ;;  %s10442_s1 = inlined_call_operand.vmem [shape: f32[1,16], index: 1, kind: input, shape index: {}]   ;;  %s10443_s2 = inlined_call_operand.vmem [shape: f32[1,16], index: 2, kind: input, shape index: {}]   ;;  %s10444_s3 = inlined_call_operand.vmem [shape: f32[48,112], index: 3, kind: input, shape index: {}]   ;;  %s10445_s4 = inlined_call_operand.vmem [shape: f32[1,112], index: 4, kind: input, shape index: {}]   ;;  %s10446_s5 = inlined_call_operand.vmem [shape: f32[112,8], index: 5, kind: input, shape index: {}]   ;;  %s10447_s6 = inlined_call_operand.vmem [shape: f32[16,256], index: 6, kind: input, shape index: {}]   ;;  %s10448_s7 = inlined_call_operand.vmem [shape: f32[1,8], index: 7, kind: input, shape index: {}]   ;;  %s10449_s8 = inlined_call_operand.vmem [shape: f32[16,16], index: 8, kind: output, shape index: {}]  }
   0x1   :  { %s19_s28 = sshll.u32 %s7966_s27, 4  ;;  %s7942_s9 = scalar_lea.hbm %s10441_s0, 4096  ;;  %s20_s28 = int_to_ptr.vmem [resolvable:$true] %s19_s28 }
   0x2   :  { %p7943_p0 = scmp.ne.s32.totalorder %s10441_s0, %s7942_s9  ;;  %p7946_p1 = scmp.lt.u32.totalorder %s7942_s9, %s10441_s0 }
   0x4   :  { %p7948_p2 = pnand %p7946_p1, %p7943_p0 }
   0x6   :  { %7951 = shalt.err (!%p7948_p2)
}
   0x7   :  { %s7952_s14 = scalar_lea.vmem %s20_s28, 4096  ;;  %p7957_p4 = scmp.lt.s32.totalorder %s20_s28, %s20_s28 }
   0x8   :  { %p7953_p3 = scmp.ne.s32.totalorder %s20_s28, %s7952_s14  ;;  %p7958_p5 = scmp.lt.s32.totalorder %s7952_s14, %s7952_s14 }
   0xa   :  { %p7959_p6 = por %p7958_p5, %p7957_p4 }
   0xc   :  { %p7960_p7 = pnand %p7959_p6, %p7953_p3 }
   0xe   :  { %7963 = shalt.err (!%p7960_p7)
}
   0xf   :  { %s7967_s15 = smov 128   ;;  %s7968_s16 = smov 8  }
  0x10   :  { %25 = dma.hbm_to_vmem [thread:$0]  %s10441_s0, 4096, %s20_s28, [#allocation3], %s7967_s15, %s7967_s15, %s7968_s16  }
  0x11   :  { %7964 = dma.done.wait [#allocation3], 4096  }
  0x12   :  { %7965 = vsyncadd [#allocation3], 4294963200  ;;  %v43_v0 = vld [vmem:[#allocation2] sm:$0xff]  ;;  %v44_v1 = vld [vmem:[#allocation2 + $0x8] sm:$0xff]  ;;  %vm252_vm0 = vcmask 1045504   ;;  %vm185_vm1 = vcmask 1046528  }
  0x13   :  { %v8032_v2 = vld [vmem:[%s10442_s1] ss:$0 sm:$0xff]  ;;  %v45_v6 = vld [vmem:[#allocation2 + $0x10] sm:$0xff]  ;;  %v46_v7 = vld [vmem:[#allocation2 + $0x18] sm:$0xff]  ;;  %s7969_s0 = smov 32   ;;  %s7970_s1 = smov 16  }
  0x14   :  { %v82_v3 = vsub.f32 %v43_v0, %v8032_v2  ;;  %v83_v4 = vsub.f32 %v44_v1, %v8032_v2  ;;  %v8039_v5 = vld [vmem:[%s10443_s2] ss:$0 sm:$0xff]  ;;  %v84_v8 = vsub.f32 %v45_v6, %v8032_v2  ;;  %v85_v10 = vsub.f32 %v46_v7, %v8032_v2  ;;  %v48_v20 = vld [vmem:[#allocation2 + $0x28] sm:$0xff]  ;;  %v49_v21 = vld [vmem:[#allocation2 + $0x30] sm:$0xff] }
  0x15   :  { %v47_v9 = vld [vmem:[#allocation2 + $0x20] sm:$0xff]  ;;  %v87_v27 = vsub.f32 %v48_v20, %v8032_v2  ;;  %v88_v28 = vsub.f32 %v49_v21, %v8032_v2  ;;  %v50_v39 = vld [vmem:[#allocation2 + $0x38] sm:$0xff]  ;;  %v52_v53 = vld [vmem:[#allocation2 + $0x48] sm:$0xff]  ;;  %vm513_vm2 = vcmask 130048   ;;  %vm546_vm3 = vcmask 261120  }
  0x16   :  { %v8044_v11 = vmul.f32 %v8039_v5, %v82_v3  ;;  %v8047_v12 = vmul.f32 %v8039_v5, %v83_v4  ;;  %v86_v13 = vsub.f32 %v47_v9, %v8032_v2  ;;  %v8051_v14 = vmul.f32 %v8039_v5, %v84_v8  ;;  %v51_v40 = vld [vmem:[#allocation2 + $0x40] sm:$0xff]  ;;  %v53_v54 = vld [vmem:[#allocation2 + $0x50] sm:$0xff]  ;;  %v60_v55 = vld [vmem:[#allocation2 + $0x88] sm:$0xff] }
  0x17   :  { %v8054_v15 = vmul.f32 %v8039_v5, %v85_v10  ;;  %v8083_v34 = vmul.f32 %v8039_v5, %v87_v27  ;;  %v8089_v38 = vmul.f32 %v8039_v5, %v88_v28  ;;  %v89_v42 = vsub.f32 %v50_v39, %v8032_v2  ;;  %v61_v56 = vld [vmem:[#allocation2 + $0x90] sm:$0xff]  ;;  %v62_v57 = vld [vmem:[#allocation2 + $0x98] sm:$0xff]  ;;  %v63_v63 = vld [vmem:[#allocation2 + $0xa0] sm:$0xff] }
  0x18   :  { %v253_v16 = vrot.slane %v8044_v11, 2  ;;  %v254_v17 = vrot.slane %v8047_v12, 2  ;;  %v186_v18 = vrot.slane %v8044_v11, 1  ;;  %v187_v19 = vrot.slane %v8047_v12, 1  ;;  %v64_v7 = vld [vmem:[#allocation2 + $0xa8] sm:$0xff]  ;;  %v54_v21 = vld [vmem:[#allocation2 + $0x58] sm:$0xff] }
  0x19   :  { %v256_v22 = vrot.slane %v8051_v14, 2  ;;  %v189_v23 = vrot.slane %v8051_v14, 1  ;;  %v8063_v24 = vmul.f32 %v8039_v5, %v86_v13  ;;  %v191_v31 = vrot.slane %v8054_v15, 1  ;;  %v65_v28 = vld [vmem:[#allocation2 + $0xb0] sm:$0xff] }
  0x1a   :  { %v255_v25 = vsel %vm252_vm0, %v253_v16, %v254_v17  ;;  %v188_v26 = vsel %vm185_vm1, %v186_v18, %v187_v19  ;;  %v258_v33 = vrot.slane %v8054_v15, 2  ;;  %v195_v44 = vrot.slane %v8083_v34, 1 }
  0x1b   :  { %417 = vrot.lane.b32.xlu1 %v255_v25, %s7969_s0  ;;  %320 = vrot.lane.b32.xlu0 %v188_v26, %s7970_s1  ;;  %v257_v29 = vsel %vm252_vm0, %v254_v17, %v256_v22  ;;  %v190_v30 = vsel %vm185_vm1, %v187_v19, %v189_v23  ;;  %v193_v32 = vrot.slane %v8063_v24, 1  ;;  %v192_v36 = vsel %vm185_vm1, %v189_v23, %v191_v31  ;;  %v55_v25 = vld [vmem:[#allocation2 + $0x60] sm:$0xff] }
  0x1c   :  { %v260_v37 = vrot.slane %v8063_v24, 2  ;;  %v259_v41 = vsel %vm252_vm0, %v256_v22, %v258_v33  ;;  %v197_v45 = vrot.slane %v8089_v38, 1  ;;  %v90_v46 = vsub.f32 %v51_v40, %v8032_v2 }
  0x1d   :  { %v194_v35 = vsel %vm185_vm1, %v191_v31, %v193_v32  ;;  %v262_v47 = vrot.slane %v8083_v34, 2  ;;  %v8103_v48 = vmul.f32 %v8039_v5, %v89_v42  ;;  %v196_v50 = vsel %vm185_vm1, %v193_v32, %v195_v44 }
  0x1e   :  { %v261_v43 = vsel %vm252_vm0, %v258_v33, %v260_v37  ;;  %v198_v49 = vsel %vm185_vm1, %v195_v44, %v197_v45  ;;  %v264_v51 = vrot.slane %v8089_v38, 2  ;;  %v8109_v52 = vmul.f32 %v8039_v5, %v90_v46  ;;  %v68_v33 = vld [vmem:[#allocation2 + $0xc8] sm:$0xff]  ;;  %v69_v44 = vld [vmem:[#allocation2 + $0xd0] sm:$0xff] }
  0x1f   :  { %419 = vrot.lane.b32.xlu1 %v257_v29, %s7969_s0  ;;  %322 = vrot.lane.b32.xlu0 %v190_v30, %s7970_s1  ;;  %v263_v58 = vsel %vm252_vm0, %v260_v37, %v262_v47  ;;  %v199_v59 = vrot.slane %v8103_v48, 1  ;;  %v91_v60 = vsub.f32 %v52_v53, %v8032_v2  ;;  %v92_v61 = vsub.f32 %v53_v54, %v8032_v2  ;;  %v66_v29 = vld [vmem:[#allocation2 + $0xb8] sm:$0xff]  ;;  %v67_v30 = vld [vmem:[#allocation2 + $0xc0] sm:$0xff] }
  0x20   :  { %v99_v62 = vsub.f32 %v60_v55, %v8032_v2  ;;  %v265_v0 = vsel %vm252_vm0, %v262_v47, %v264_v51  ;;  %v201_v1 = vrot.slane %v8109_v52, 1  ;;  %v100_v3 = vsub.f32 %v61_v56, %v8032_v2  ;;  %v8183_v56 = vld [vmem:[%s10444_s3] sm:$0xff] }
  0x21   :  { %v101_v4 = vsub.f32 %v62_v57, %v8032_v2  ;;  %v266_v8 = vrot.slane %v8103_v48, 2  ;;  %v102_v10 = vsub.f32 %v63_v63, %v8032_v2  ;;  %v268_v17 = vrot.slane %v8109_v52, 2  ;;  %v8188_v57 = vld [vmem:[%s10444_s3 + $0x8] sm:$0xff] }
  0x22   :  { %v8123_v6 = vmul.f32 %v8039_v5, %v99_v62  ;;  %v8127_v9 = vmul.f32 %v8039_v5, %v100_v3  ;;  %v8137_v19 = vmul.f32 %v8039_v5, %v91_v60  ;;  %v8140_v20 = vmul.f32 %v8039_v5, %v92_v61  ;;  %v57_v62 = vld [vmem:[#allocation2 + $0x70] sm:$0xff]  ;;  %v70_v3 = vld [vmem:[#allocation2 + $0xd8] sm:$0xff] }
  0x23   :  { %326 = vrot.lane.b32.xlu1 %v194_v35, %s7970_s1  ;;  %324 = vrot.lane.b32.xlu0 %v192_v36, %s7970_s1  ;;  %v8131_v13 = vmul.f32 %v8039_v5, %v101_v4  ;;  %v202_v22 = vsel %vm185_vm1, %v199_v59, %v201_v1  ;;  %v200_v23 = vsel %vm185_vm1, %v197_v45, %v199_v59  ;;  %v71_v4 = vld [vmem:[#allocation2 + $0xe0] sm:$0xff]  ;;  %vm592_vm4 = vcmask 392192  }
  0x24   :  { %v103_v26 = vsub.f32 %v64_v7, %v8032_v2  ;;  %v8146_v27 = vmul.f32 %v8039_v5, %v102_v10  ;;  %v267_v31 = vsel %vm252_vm0, %v264_v51, %v266_v8  ;;  %v93_v32 = vsub.f32 %v54_v21, %v8032_v2  ;;  %v56_v51 = vld [vmem:[#allocation2 + $0x68] sm:$0xff]  ;;  %v73_v21 = vld [vmem:[#allocation2 + $0xf0] sm:$0xff] }
  0x25   :  { %v269_v35 = vsel %vm252_vm0, %v266_v8, %v268_v17  ;;  %v203_v36 = vrot.slane %v8137_v19, 1  ;;  %v205_v37 = vrot.slane %v8140_v20, 1  ;;  %v94_v39 = vsub.f32 %v55_v25, %v8032_v2  ;;  %v72_v7 = vld [vmem:[#allocation2 + $0xe8] sm:$0xff] }
  0x26   :  { %v104_v40 = vsub.f32 %v65_v28, %v8032_v2  ;;  %v105_v42 = vsub.f32 %v66_v29, %v8032_v2  ;;  %v107_v45 = vsub.f32 %v68_v33, %v8032_v2  ;;  %v270_v46 = vrot.slane %v8137_v19, 2 }
  0x27   :  { %423 = vrot.lane.b32.xlu1 %v261_v43, %s7969_s0  ;;  %421 = vrot.lane.b32.xlu0 %v259_v41, %s7969_s0  ;;  %v8158_v41 = vmul.f32 %v8039_v5, %v103_v26  ;;  %v106_v43 = vsub.f32 %v67_v30, %v8032_v2  ;;  %v108_v54 = vsub.f32 %v69_v44, %v8032_v2  ;;  %v690_v8 = vand.u32 4294901760, %v8183_v56 }
  0x28   :  { %v8165_v47 = vmul.f32 %v8039_v5, %v104_v40  ;;  %v8178_v55 = vmul.f32 %v8039_v5, %v107_v45  ;;  %v204_v59 = vsel %vm185_vm1, %v201_v1, %v203_v36  ;;  %v8193_v60 = vmul.f32 %v8039_v5, %v93_v32  ;;  %v8252_v45 = vld [vmem:[%s10444_s3 + $0x20] sm:$0xff] }
  0x29   :  { %v8174_v53 = vmul.f32 %v8039_v5, %v106_v43  ;;  %v8196_v61 = vmul.f32 %v8039_v5, %v94_v39  ;;  %v95_v63 = vsub.f32 %v56_v51, %v8032_v2  ;;  %v693_v10 = vand.u32 4294901760, %v8188_v57  ;;  %v8235_v39 = vld [vmem:[%s10444_s3 + $0x18] sm:$0xff] }
  0x2a   :  { %v96_v1 = vsub.f32 %v57_v62, %v8032_v2  ;;  %v207_v25 = vrot.slane %v8193_v60, 1  ;;  %v109_v28 = vsub.f32 %v70_v3, %v8032_v2  ;;  %v110_v29 = vsub.f32 %v71_v4, %v8032_v2 }
  0x2b   :  { %330 = vrot.lane.b32.xlu1 %v198_v49, %s7970_s1  ;;  %328 = vrot.lane.b32.xlu0 %v196_v50, %s7970_s1  ;;  %v8168_v49 = vmul.f32 %v8039_v5, %v105_v42  ;;  %v272_v50 = vrot.slane %v8140_v20, 2  ;;  %v209_v26 = vrot.slane %v8196_v61, 1  ;;  %v111_v30 = vsub.f32 %v72_v7, %v8032_v2 }
  0x2c   :  { %v8218_v32 = vmul.f32 %v8039_v5, %v95_v63  ;;  %v112_v33 = vsub.f32 %v73_v21, %v8032_v2  ;;  %v276_v40 = vrot.slane %v8196_v61, 2  ;;  %v8241_v42 = vmul.f32 %v8039_v5, %v109_v28  ;;  %v59_v63 = vld [vmem:[#allocation2 + $0x80] sm:$0xff] }
  0x2d   :  { %v8244_v43 = vmul.f32 %v8039_v5, %v110_v29  ;;  %v8247_v44 = vmul.f32 %v8039_v5, %v111_v30  ;;  %v210_v51 = vsel %vm185_vm1, %v207_v25, %v209_v26  ;;  %v699_v7 = vand.u32 4294901760, %v8235_v39 }
  0x2e   :  { %v8265_v62 = vmul.f32 %v8039_v5, %v112_v33  ;;  %v211_v21 = vrot.slane %v8218_v32, 1  ;;  %v98_v29 = vsub.f32 %v59_v63, %v8032_v2  ;;  %vm2579_vm5 = vcmask 916480  }
  0x2f   :  { %427 = vrot.lane.b32.xlu1 %v265_v0, %s7969_s0  ;;  %425 = vrot.lane.b32.xlu0 %v263_v58, %s7969_s0  ;;  %v206_v58 = vsel %vm185_vm1, %v203_v36, %v205_v37  ;;  %v8200_v0 = vmul.f32 %v8039_v5, %v108_v54  ;;  %v8230_v36 = vld [vmem:[%s10444_s3 + $0x10] sm:$0xff]  ;;  %v208_v54 = vsel %vm185_vm1, %v205_v37, %v207_v25  ;;  %v702_v37 = vand.u32 4294901760, %v8252_v45 }
  0x30   :  { %v696_v4 = vand.u32 4294901760, %v8230_v36  ;;  %vm5553_vm6 = vcmask 64512  }
  0x32   :  { %v8291_v33 = vpack.c.bf16 %v699_v7, %v696_v4 }
  0x33   :  { %334 = vrot.lane.b32.xlu1 %v202_v22, %s7970_s1  ;;  %332 = vrot.lane.b32.xlu0 %v200_v23, %s7970_s1  ;;  %v273_v22 = vsel %vm252_vm0, %v270_v46, %v272_v50  ;;  %v271_v23 = vsel %vm252_vm0, %v268_v17, %v270_v46  ;;  %v8225_v17 = vpack.c.bf16 %v693_v10, %v690_v8  ;;  %v8257_v46 = vld [vmem:[%s10444_s3 + $0x28] sm:$0xff] }
  0x35   :  { %7146 = vmatprep.subr.bf16.mxu0 %v8225_v17 }
  0x36   :  { %7148 = vmatpush3.bf16.msra.mxu0 %v8225_v17 }
  0x37   :  { %431 = vrot.lane.b32.xlu1 %v269_v35, %s7969_s0  ;;  %429 = vrot.lane.b32.xlu0 %v267_v31, %s7969_s0  ;;  %v274_v31 = vrot.slane %v8193_v60, 2  ;;  %v74_v35 = vld [vmem:[#allocation2 + $0xf8] sm:$0xff] }
  0x38   :  { %v113_v3 = vsub.f32 %v74_v35, %v8032_v2  ;;  %7150 = vmatprep.subr.bf16.mxu0 %v8291_v33 }
  0x39   :  { %v275_v25 = vsel %vm252_vm0, %v272_v50, %v274_v31  ;;  %v278_v50 = vrot.slane %v8218_v32, 2 }
  0x3a   :  { %v8285_v30 = vmul.f32 %v8039_v5, %v113_v3  ;;  %v8311_v3 = vmul.f32 %v8039_v5, %v98_v29  ;;  %7152 = vmatpush3.bf16.msra.mxu0 %v8291_v33 }
  0x3b   :  { %338 = vrot.lane.b32.xlu1 %v206_v58, %s7970_s1  ;;  %336 = vrot.lane.b32.xlu0 %v204_v59, %s7970_s1  ;;  %v8262_v58 = vmul.f32 %v8039_v5, %v96_v1  ;;  %v58_v59 = vld [vmem:[#allocation2 + $0x78] sm:$0xff]  ;;  %v10451_v1 = vand.u32 4294901760, %v8257_v46 }
  0x3d   :  { %v213_v28 = vrot.slane %v8262_v58, 1  ;;  %v8297_v35 = vpack.c.bf16 %v10451_v1, %v702_v37 }
  0x3f   :  { %435 = vrot.lane.b32.xlu1 %v273_v22, %s7969_s0  ;;  %433 = vrot.lane.b32.xlu0 %v271_v23, %s7969_s0  ;;  %v97_v22 = vsub.f32 %v58_v59, %v8032_v2  ;;  %v277_v23 = vsel %vm252_vm0, %v274_v31, %v276_v40  ;;  %v212_v2 = vsel %vm185_vm1, %v209_v26, %v211_v21  ;;  %v247_v31 = vrot.slane %v8285_v30, 1 }
  0x40   :  { %v280_v59 = vrot.slane %v8262_v58, 2  ;;  %7154 = vmatprep.subr.bf16.mxu0 %v8297_v35 }
  0x41   :  { %v8308_v63 = vmul.f32 %v8039_v5, %v97_v22  ;;  %v8319_v26 = vsel %vm185_vm1, %v247_v31, %v186_v18  ;;  %v279_v18 = vsel %vm252_vm0, %v276_v40, %v278_v50  ;;  %7156 = vmatpush3.bf16.msra.mxu0 %v8297_v35 }
  0x42   :  { %v281_v5 = vsel %vm252_vm0, %v278_v50, %v280_v59 }
  0x43   :  { %342 = vrot.lane.b32.xlu1 %v210_v51, %s7970_s1  ;;  %340 = vrot.lane.b32.xlu0 %v208_v54, %s7970_s1  ;;  %v10450_v51 = vrot.slane %v8285_v30, 2  ;;  %v214_v54 = vsel %vm185_vm1, %v211_v21, %v213_v28  ;;  %v215_v22 = vrot.slane %v8308_v63, 1  ;;  %v282_v29 = vrot.slane %v8308_v63, 2 }
  0x45   :  { %v8326_v21 = vsel %vm252_vm0, %v10450_v51, %v253_v16  ;;  %v283_v50 = vsel %vm252_vm0, %v280_v59, %v282_v29 }
  0x47   :  { %439 = vrot.lane.b32.xlu1 %v277_v23, %s7969_s0  ;;  %437 = vrot.lane.b32.xlu0 %v275_v25, %s7969_s0  ;;  %v217_v23 = vrot.slane %v8311_v3, 1  ;;  %v216_v25 = vsel %vm185_vm1, %v213_v28, %v215_v22 }
  0x49   :  { %v218_v16 = vsel %vm185_vm1, %v215_v22, %v217_v23  ;;  %v286_v22 = vrot.slane %v8123_v6, 2 }
  0x4b   :  { %346 = vrot.lane.b32.xlu1 %v214_v54, %s7970_s1  ;;  %344 = vrot.lane.b32.xlu0 %v212_v2, %s7970_s1  ;;  %v284_v2 = vrot.slane %v8311_v3, 2  ;;  %v219_v54 = vrot.slane %v8123_v6, 1 }
  0x4d   :  { %v285_v40 = vsel %vm252_vm0, %v282_v29, %v284_v2  ;;  %v223_v29 = vrot.slane %v8131_v13, 1 }
  0x4f   :  { %443 = vrot.lane.b32.xlu1 %v281_v5, %s7969_s0  ;;  %441 = vrot.lane.b32.xlu0 %v279_v18, %s7969_s0  ;;  %v221_v5 = vrot.slane %v8127_v9, 1  ;;  %v220_v18 = vsel %vm185_vm1, %v217_v23, %v219_v54 }
  0x51   :  { %v222_v28 = vsel %vm185_vm1, %v219_v54, %v221_v5  ;;  %v290_v54 = vrot.slane %v8131_v13, 2 }
  0x53   :  { %350 = vrot.lane.b32.xlu1 %v218_v16, %s7970_s1  ;;  %348 = vrot.lane.b32.xlu0 %v216_v25, %s7970_s1  ;;  %v288_v16 = vrot.slane %v8127_v9, 2  ;;  %v287_v25 = vsel %vm252_vm0, %v284_v2, %v286_v22 }
  0x55   :  { %v289_v59 = vsel %vm252_vm0, %v286_v22, %v288_v16  ;;  %v227_v22 = vrot.slane %v8158_v41, 1 }
  0x57   :  { %447 = vrot.lane.b32.xlu1 %v285_v40, %s7969_s0  ;;  %445 = vrot.lane.b32.xlu0 %v283_v50, %s7969_s0  ;;  %v225_v40 = vrot.slane %v8146_v27, 1  ;;  %v224_v50 = vsel %vm185_vm1, %v221_v5, %v223_v29 }
  0x59   :  { %v226_v23 = vsel %vm185_vm1, %v223_v29, %v225_v40  ;;  %v294_v29 = vrot.slane %v8158_v41, 2 }
  0x5b   :  { %354 = vrot.lane.b32.xlu1 %v222_v28, %s7970_s1  ;;  %352 = vrot.lane.b32.xlu0 %v220_v18, %s7970_s1  ;;  %v292_v28 = vrot.slane %v8146_v27, 2  ;;  %v291_v18 = vsel %vm252_vm0, %v288_v16, %v290_v54 }
  0x5d   :  { %v293_v2 = vsel %vm252_vm0, %v290_v54, %v292_v28  ;;  %v231_v54 = vrot.slane %v8168_v49, 1 }
  0x5f   :  { %451 = vrot.lane.b32.xlu1 %v289_v59, %s7969_s0  ;;  %449 = vrot.lane.b32.xlu0 %v287_v25, %s7969_s0  ;;  %v229_v59 = vrot.slane %v8165_v47, 1  ;;  %v228_v25 = vsel %vm185_vm1, %v225_v40, %v227_v22 }
  0x61   :  { %v230_v5 = vsel %vm185_vm1, %v227_v22, %v229_v59  ;;  %v298_v22 = vrot.slane %v8168_v49, 2 }
  0x63   :  { %358 = vrot.lane.b32.xlu1 %v226_v23, %s7970_s1  ;;  %356 = vrot.lane.b32.xlu0 %v224_v50, %s7970_s1  ;;  %v296_v23 = vrot.slane %v8165_v47, 2  ;;  %v295_v50 = vsel %vm252_vm0, %v292_v28, %v294_v29 }
  0x65   :  { %v297_v16 = vsel %vm252_vm0, %v294_v29, %v296_v23  ;;  %v235_v29 = vrot.slane %v8178_v55, 1 }
  0x67   :  { %455 = vrot.lane.b32.xlu1 %v293_v2, %s7969_s0  ;;  %453 = vrot.lane.b32.xlu0 %v291_v18, %s7969_s0  ;;  %v233_v2 = vrot.slane %v8174_v53, 1  ;;  %v232_v18 = vsel %vm185_vm1, %v229_v59, %v231_v54 }
  0x69   :  { %v234_v40 = vsel %vm185_vm1, %v231_v54, %v233_v2  ;;  %v302_v54 = vrot.slane %v8178_v55, 2 }
  0x6b   :  { %362 = vrot.lane.b32.xlu1 %v230_v5, %s7970_s1  ;;  %360 = vrot.lane.b32.xlu0 %v228_v25, %s7970_s1  ;;  %v300_v5 = vrot.slane %v8174_v53, 2  ;;  %v299_v25 = vsel %vm252_vm0, %v296_v23, %v298_v22 }
  0x6d   :  { %v301_v28 = vsel %vm252_vm0, %v298_v22, %v300_v5  ;;  %v239_v22 = vrot.slane %v8241_v42, 1 }
  0x6f   :  { %459 = vrot.lane.b32.xlu1 %v297_v16, %s7969_s0  ;;  %457 = vrot.lane.b32.xlu0 %v295_v50, %s7969_s0  ;;  %v237_v16 = vrot.slane %v8200_v0, 1  ;;  %v236_v50 = vsel %vm185_vm1, %v233_v2, %v235_v29  ;;  %v8412_v2 = vsub.f32 %v8183_v56, %v690_v8 }
  0x71   :  { %v238_v59 = vsel %vm185_vm1, %v235_v29, %v237_v16  ;;  %v308_v29 = vrot.slane %v8244_v43, 2  ;;  %v10453_v56 = vand.u32 4294901760, %v8412_v2 }
  0x73   :  { %366 = vrot.lane.b32.xlu1 %v234_v40, %s7970_s1  ;;  %364 = vrot.lane.b32.xlu0 %v232_v18, %s7970_s1  ;;  %v304_v40 = vrot.slane %v8200_v0, 2  ;;  %v303_v18 = vsel %vm252_vm0, %v300_v5, %v302_v54  ;;  %v306_v5 = vrot.slane %v8241_v42, 2 }
  0x75   :  { %v305_v23 = vsel %vm252_vm0, %v302_v54, %v304_v40  ;;  %v243_v54 = vrot.slane %v8247_v44, 1 }
  0x77   :  { %463 = vrot.lane.b32.xlu1 %v301_v28, %s7969_s0  ;;  %461 = vrot.lane.b32.xlu0 %v299_v25, %s7969_s0  ;;  %v241_v28 = vrot.slane %v8244_v43, 1  ;;  %v8417_v25 = vsub.f32 %v8188_v57, %v693_v10  ;;  %v1084_v57 = vsub.f32 %v8412_v2, %v10453_v56  ;;  %v312_v56 = vrot.slane %v8265_v62, 2 }
  0x79   :  { %v10452_v8 = vand.u32 4294901760, %v8417_v25 }
  0x7b   :  { %370 = vrot.lane.b32.xlu1 %v238_v59, %s7970_s1  ;;  %368 = vrot.lane.b32.xlu0 %v236_v50, %s7970_s1  ;;  %v242_v59 = vsel %vm185_vm1, %v239_v22, %v241_v28  ;;  %v240_v50 = vsel %vm185_vm1, %v237_v16, %v239_v22  ;;  %v1091_v10 = vsub.f32 %v8417_v25, %v10452_v8  ;;  %v245_v16 = vrot.slane %v8265_v62, 1 }
  0x7c   :  { %v1085_v22 = vand.u32 4294901760, %v1084_v57  ;;  %v310_v8 = vrot.slane %v8247_v44, 2 }
  0x7d   :  { %v1092_v51 = vand.u32 4294901760, %v1091_v10 }
  0x7f   :  { %467 = vrot.lane.b32.xlu1 %v305_v23, %s7969_s0  ;;  %465 = vrot.lane.b32.xlu0 %v303_v18, %s7969_s0  ;;  %v309_v23 = vsel %vm252_vm0, %v306_v5, %v308_v29  ;;  %v307_v18 = vsel %vm252_vm0, %v304_v40, %v306_v5  ;;  %v8439_v1 = vpack.c.bf16 %v1092_v51, %v1085_v22 }
  0x80   :  { %v8453_v51 = vsub.f32 %v8230_v36, %v696_v4  ;;  %v313_v40 = vsel %vm252_vm0, %v310_v8, %v312_v56  ;;  %v8460_v5 = vsub.f32 %v8235_v39, %v699_v7  ;;  %v248_v36 = vsel %vm185_vm1, %v245_v16, %v247_v31 }
  0x81   :  { %7158 = vmatprep.subr.bf16.mxu0 %v8439_v1 }
  0x82   :  { %v10457_v4 = vand.u32 4294901760, %v8453_v51  ;;  %v10455_v7 = vand.u32 4294901760, %v8460_v5 }
  0x83   :  { %374 = vrot.lane.b32.xlu1 %v242_v59, %s7970_s1  ;;  %372 = vrot.lane.b32.xlu0 %v240_v50, %s7970_s1  ;;  %v246_v59 = vsel %vm185_vm1, %v243_v54, %v245_v16  ;;  %v244_v50 = vsel %vm185_vm1, %v241_v28, %v243_v54  ;;  %v311_v28 = vsel %vm252_vm0, %v308_v29, %v310_v8  ;;  %v10755_v29 = vand.u32 4294901760, %v8257_v46 }
  0x85   :  { %v8481_v8 = vsub.f32 %v8257_v46, %v10755_v29  ;;  %v1098_v46 = vsub.f32 %v8453_v51, %v10457_v4 }
  0x87   :  { %471 = vrot.lane.b32.xlu1 %v309_v23, %s7969_s0  ;;  %469 = vrot.lane.b32.xlu0 %v307_v18, %s7969_s0 }
  0x8b   :  { %378 = vrot.lane.b32.xlu1 %v246_v59, %s7970_s1  ;;  %376 = vrot.lane.b32.xlu0 %v244_v50, %s7970_s1  ;;  %v10756_v59 = vrot.slane %v8285_v30, 2 }
  0x8d   :  { %v418_v57 = vpop.permute.xlu1 %417  ;;  %v321_v10 = vpop.permute.xlu0 %320  ;;  %v315_v50 = vsel %vm252_vm0, %v312_v56, %v10756_v59 }
  0x8e   :  { %v514_v54 = vsel %vm513_vm2, %v8044_v11, %v321_v10  ;;  %v8476_v11 = vsub.f32 %v8252_v45, %v702_v37  ;;  %v1105_v37 = vsub.f32 %v8460_v5, %v10455_v7 }
  0x8f   :  { %v547_v23 = vsel %vm546_vm3, %v514_v54, %v418_v57  ;;  %475 = vrot.lane.b32.xlu1 %v313_v40, %s7969_s0  ;;  %473 = vrot.lane.b32.xlu0 %v311_v28, %s7969_s0  ;;  %v10456_v28 = vand.u32 4294901760, %v8481_v8 }
  0x90   :  { %v594_v39 = vsel %vm592_vm4, %v547_v23, 0  ;;  %v10454_v56 = vand.u32 4294901760, %v8476_v11  ;;  %v1106_v29 = vand.u32 4294901760, %v1105_v37 }
  0x91   :  { %v8483_v18 = vand.u32 4294901760, %v594_v39  ;;  %v420_v22 = vpop.permute.xlu1 %419  ;;  %v323_v31 = vpop.permute.xlu0 %322 }
  0x92   :  { %v515_v16 = vsel %vm513_vm2, %v8047_v12, %v323_v31  ;;  %v1119_v31 = vsub.f32 %v8481_v8, %v10456_v28 }
  0x93   :  { %v548_v40 = vsel %vm546_vm3, %v515_v16, %v420_v22  ;;  %382 = vrot.lane.b32.xlu1 %v8319_v26, %s7970_s1  ;;  %380 = vrot.lane.b32.xlu0 %v248_v36, %s7970_s1  ;;  %v8495_v45 = vsub.f32 %v594_v39, %v8483_v18  ;;  %v1099_v39 = vand.u32 4294901760, %v1098_v46  ;;  %v1112_v22 = vsub.f32 %v8476_v11, %v10454_v56 }
  0x94   :  { %v597_v12 = vsel %vm592_vm4, %v548_v40, 0 }
  0x95   :  { %v8506_v26 = vand.u32 4294901760, %v597_v12  ;;  %v327_v57 = vpop.permute.xlu1 %326  ;;  %v325_v10 = vpop.permute.xlu0 %324  ;;  %v10465_v54 = vand.u32 4294901760, %v8495_v45  ;;  %v7161_v4 = vpack.c.bf16 %v1106_v29, %v1099_v39 }
  0x96   :  { %v517_v16 = vsel %vm513_vm2, %v8054_v15, %v327_v57 }
  0x97   :  { %v8510_v23 = vsub.f32 %v597_v12, %v8506_v26  ;;  %479 = vrot.lane.b32.xlu1 %v8326_v21, %s7969_s0  ;;  %477 = vrot.lane.b32.xlu0 %v315_v50, %s7969_s0  ;;  %v763_v36 = vsub.f32 %v8495_v45, %v10465_v54  ;;  %v516_v21 = vsel %vm513_vm2, %v8051_v14, %v325_v10 }
  0x99   :  { %v424_v59 = vpop.permute.xlu1 %423  ;;  %v422_v50 = vpop.permute.xlu0 %421  ;;  %v764_v40 = vand.u32 4294901760, %v763_v36  ;;  %v10464_v46 = vand.u32 4294901760, %v8510_v23 }
  0x9a   :  { %v550_v12 = vsel %vm546_vm3, %v517_v16, %v424_v59  ;;  %v549_v37 = vsel %vm546_vm3, %v516_v21, %v422_v50  ;;  %v1113_v16 = vand.u32 4294901760, %v1112_v22  ;;  %v1120_v59 = vand.u32 4294901760, %v1119_v31 }
  0x9b   :  { %v603_v56 = vsel %vm592_vm4, %v550_v12, 0  ;;  %v600_v7 = vsel %vm592_vm4, %v549_v37, 0  ;;  %6341 = vmatprep.mubr.f32.mxu0 %v764_v40  ;;  %v773_v15 = vsub.f32 %v8510_v23, %v10464_v46 }
  0x9c   :  { %v8536_v57 = vand.u32 4294901760, %v603_v56  ;;  %v8538_v14 = vand.u32 4294901760, %v600_v7 }
  0x9d   :  { %v331_v10 = vpop.permute.xlu1 %330  ;;  %v329_v36 = vpop.permute.xlu0 %328  ;;  %v774_v28 = vand.u32 4294901760, %v773_v15 }
  0x9e   :  { %v8541_v21 = vsub.f32 %v603_v56, %v8536_v57  ;;  %v8544_v50 = vsub.f32 %v600_v7, %v8538_v14  ;;  %v519_v37 = vsel %vm513_vm2, %v8083_v34, %v331_v10  ;;  %v518_v39 = vsel %vm513_vm2, %v8063_v24, %v329_v36 }
  0x9f   :  { %6342 = vmatmul.mubr.f32.vlgmr.msra.gmra.mrb[0].mxu0 %v774_v28  ;;  %v7165_v56 = vpack.c.bf16 %v1120_v59, %v1113_v16 }
  0xa0   :  { %v10461_v40 = vand.u32 4294901760, %v8544_v50  ;;  %v10460_v12 = vand.u32 4294901760, %v8541_v21  ;;  %7160 = vmatpush3.bf16.msra.mxu0 %v8439_v1 }
  0xa1   :  { %v428_v29 = vpop.permute.xlu1 %427  ;;  %v426_v22 = vpop.permute.xlu0 %425  ;;  %7162 = vmatprep.subr.bf16.mxu0 %v7161_v4 }
  0xa2   :  { %v552_v7 = vsel %vm546_vm3, %v519_v37, %v428_v29  ;;  %v551_v28 = vsel %vm546_vm3, %v518_v39, %v426_v22  ;;  %v783_v31 = vsub.f32 %v8544_v50, %v10461_v40  ;;  %v793_v1 = vsub.f32 %v8541_v21, %v10460_v12 }
  0xa3   :  { %v609_v34 = vsel %vm592_vm4, %v552_v7, 0  ;;  %v606_v24 = vsel %vm592_vm4, %v551_v28, 0 }
  0xa4   :  { %v8563_v15 = vand.u32 4294901760, %v609_v34  ;;  %v8565_v10 = vand.u32 4294901760, %v606_v24  ;;  %v784_v36 = vand.u32 4294901760, %v783_v31  ;;  %v794_v16 = vand.u32 4294901760, %v793_v1  ;;  %7164 = vmatpush3.bf16.msra.mxu0 %v7161_v4 }
  0xa5   :  { %v335_v59 = vpop.permute.xlu1 %334  ;;  %v333_v37 = vpop.permute.xlu0 %332  ;;  %7166 = vmatprep.subr.bf16.mxu0 %v7165_v56 }
  0xa6   :  { %v8568_v39 = vsub.f32 %v609_v34, %v8563_v15  ;;  %v8571_v29 = vsub.f32 %v606_v24, %v8565_v10  ;;  %6344 = vmatprep.mubr.f32.mxu0 %v784_v36  ;;  %v521_v28 = vsel %vm513_vm2, %v8103_v48, %v335_v59  ;;  %v520_v4 = vsel %vm513_vm2, %v8089_v38, %v333_v37 }
  0xa7   :  { %6345 = vmatmul.mubr.f32.gmra.mrb[2].mxu0 %v794_v16 }
  0xa8   :  { %v10458_v22 = vand.u32 4294901760, %v8571_v29  ;;  %v10459_v7 = vand.u32 4294901760, %v8568_v39  ;;  %7168 = vmatpush3.bf16.msra.mxu0 %v7165_v56 }
  0xa9   :  { %v432_v31 = vpop.permute.xlu1 %431  ;;  %v430_v1 = vpop.permute.xlu0 %429 }
  0xaa   :  { %v554_v34 = vsel %vm546_vm3, %v521_v28, %v432_v31  ;;  %v553_v24 = vsel %vm546_vm3, %v520_v4, %v430_v1  ;;  %v803_v36 = vsub.f32 %v8571_v29, %v10458_v22  ;;  %v813_v56 = vsub.f32 %v8568_v39, %v10459_v7 }
  0xab   :  { %v615_v16 = vsel %vm592_vm4, %v554_v34, 0  ;;  %v612_v48 = vsel %vm592_vm4, %v553_v24, 0 }
  0xac   :  { %v8589_v59 = vand.u32 4294901760, %v615_v16  ;;  %v8591_v38 = vand.u32 4294901760, %v612_v48  ;;  %v804_v37 = vand.u32 4294901760, %v803_v36  ;;  %v814_v28 = vand.u32 4294901760, %v813_v56 }
  0xad   :  { %v339_v31 = vpop.permute.xlu1 %338  ;;  %v337_v4 = vpop.permute.xlu0 %336 }
  0xae   :  { %v8594_v1 = vsub.f32 %v615_v16, %v8589_v59  ;;  %v8597_v22 = vsub.f32 %v612_v48, %v8591_v38  ;;  %6347 = vmatprep.mubr.f32.mxu0 %v804_v37  ;;  %v523_v7 = vsel %vm513_vm2, %v8137_v19, %v339_v31  ;;  %v522_v36 = vsel %vm513_vm2, %v8109_v52, %v337_v4 }
  0xaf   :  { %6348 = vmatmul.mubr.f32.gmra.mrb[4].mxu0 %v814_v28 }
  0xb0   :  { %10757 = vst [vmem:[#allocation5_spill] sm:$0xff] %v8594_v1  ;;  %v10462_v34 = vand.u32 4294901760, %v8597_v22  ;;  %v10463_v24 = vand.u32 4294901760, %v8594_v1 }
  0xb1   :  { %v436_v56 = vpop.permute.xlu1 %435  ;;  %v434_v12 = vpop.permute.xlu0 %433 }
  0xb2   :  { %v556_v16 = vsel %vm546_vm3, %v523_v7, %v436_v56  ;;  %v555_v40 = vsel %vm546_vm3, %v522_v36, %v434_v12  ;;  %v823_v48 = vsub.f32 %v8597_v22, %v10462_v34  ;;  %v833_v37 = vsub.f32 %v8594_v1, %v10463_v24 }
  0xb3   :  { %v621_v28 = vsel %vm592_vm4, %v556_v16, 0  ;;  %v618_v19 = vsel %vm592_vm4, %v555_v40, 0  ;;  %v8629_v24 = vpack.c.bf16 %v8417_v25, %v8412_v2 }
  0xb4   :  { %v8615_v31 = vand.u32 4294901760, %v621_v28  ;;  %v8617_v52 = vand.u32 4294901760, %v618_v19  ;;  %v824_v4 = vand.u32 4294901760, %v823_v48  ;;  %v834_v7 = vand.u32 4294901760, %v833_v37 }
  0xb5   :  { %v343_v56 = vpop.permute.xlu1 %342  ;;  %v341_v12 = vpop.permute.xlu0 %340  ;;  %7170 = vmatprep.subr.bf16.mxu0 %v8629_v24 }
  0xb6   :  { %v8620_v36 = vsub.f32 %v621_v28, %v8615_v31  ;;  %v8623_v34 = vsub.f32 %v618_v19, %v8617_v52  ;;  %6350 = vmatprep.mubr.f32.mxu0 %v824_v4  ;;  %v525_v48 = vsel %vm513_vm2, %v8193_v60, %v343_v56  ;;  %v524_v37 = vsel %vm513_vm2, %v8140_v20, %v341_v12 }
  0xb7   :  { %6351 = vmatmul.mubr.f32.gmra.mrb[6].mxu0 %v834_v7 }
  0xb8   :  { %10758 = vst [vmem:[#allocation6_spill] sm:$0xff] %v8620_v36  ;;  %10759 = vst [vmem:[#allocation7_spill] sm:$0xff] %v8623_v34  ;;  %v10466_v16 = vand.u32 4294901760, %v8623_v34  ;;  %v10469_v40 = vand.u32 4294901760, %v8620_v36 }
  0xb9   :  { %v440_v28 = vpop.permute.xlu1 %439  ;;  %v438_v46 = vpop.permute.xlu0 %437 }
  0xba   :  { %v558_v19 = vsel %vm546_vm3, %v525_v48, %v440_v28  ;;  %v557_v4 = vsel %vm546_vm3, %v524_v37, %v438_v46  ;;  %v843_v7 = vsub.f32 %v8623_v34, %v10466_v16  ;;  %v853_v54 = vsub.f32 %v8620_v36, %v10469_v40 }
  0xbb   :  { %v627_v60 = vsel %vm592_vm4, %v558_v19, 0  ;;  %v624_v20 = vsel %vm592_vm4, %v557_v4, 0 }
  0xbc   :  { %v8646_v56 = vand.u32 4294901760, %v627_v60  ;;  %v8648_v12 = vand.u32 4294901760, %v624_v20  ;;  %v844_v48 = vand.u32 4294901760, %v843_v7  ;;  %v854_v46 = vand.u32 4294901760, %v853_v54 }
  0xbd   :  { %v347_v37 = vpop.permute.xlu1 %346  ;;  %v345_v28 = vpop.permute.xlu0 %344 }
  0xbe   :  { %v8651_v16 = vsub.f32 %v627_v60, %v8646_v56  ;;  %v8654_v34 = vsub.f32 %v624_v20, %v8648_v12  ;;  %6353 = vmatprep.mubr.f32.mxu0 %v844_v48  ;;  %v527_v40 = vsel %vm513_vm2, %v8218_v32, %v347_v37  ;;  %v526_v54 = vsel %vm513_vm2, %v8196_v61, %v345_v28 }
  0xbf   :  { %6354 = vmatmul.mubr.f32.gmra.mrb[8].mxu0 %v854_v46 }
  0xc0   :  { %10760 = vst [vmem:[#allocation8_spill] sm:$0xff] %v8651_v16  ;;  %10761 = vst [vmem:[#allocation9_spill] sm:$0xff] %v8654_v34  ;;  %v10474_v19 = vand.u32 4294901760, %v8654_v34  ;;  %v10475_v4 = vand.u32 4294901760, %v8651_v16 }
  0xc1   :  { %v444_v7 = vpop.permute.xlu1 %443  ;;  %v442_v36 = vpop.permute.xlu0 %441 }
  0xc2   :  { %v560_v60 = vsel %vm546_vm3, %v527_v40, %v444_v7  ;;  %v559_v1 = vsel %vm546_vm3, %v526_v54, %v442_v36  ;;  %v863_v20 = vsub.f32 %v8654_v34, %v10474_v19  ;;  %v873_v48 = vsub.f32 %v8651_v16, %v10475_v4 }
  0xc3   :  { %v633_v46 = vsel %vm592_vm4, %v560_v60, 0  ;;  %v630_v32 = vsel %vm592_vm4, %v559_v1, 0 }
  0xc4   :  { %v8672_v37 = vand.u32 4294901760, %v633_v46  ;;  %v8674_v61 = vand.u32 4294901760, %v630_v32  ;;  %v864_v28 = vand.u32 4294901760, %v863_v20  ;;  %v874_v40 = vand.u32 4294901760, %v873_v48 }
  0xc5   :  { %v351_v7 = vpop.permute.xlu1 %350  ;;  %v349_v36 = vpop.permute.xlu0 %348 }
  0xc6   :  { %v8677_v54 = vsub.f32 %v633_v46, %v8672_v37  ;;  %v8680_v19 = vsub.f32 %v630_v32, %v8674_v61  ;;  %6356 = vmatprep.mubr.f32.mxu0 %v864_v28  ;;  %v529_v4 = vsel %vm513_vm2, %v8308_v63, %v351_v7  ;;  %v528_v20 = vsel %vm513_vm2, %v8262_v58, %v349_v36 }
  0xc7   :  { %6357 = vmatmul.mubr.f32.gmra.mrb[10].mxu0 %v874_v40 }
  0xc8   :  { %10762 = vst [vmem:[#allocation10_spill] sm:$0xff] %v8677_v54  ;;  %10763 = vst [vmem:[#allocation11_spill] sm:$0xff] %v8680_v19  ;;  %v10480_v60 = vand.u32 4294901760, %v8680_v19  ;;  %v10481_v1 = vand.u32 4294901760, %v8677_v54 }
  0xc9   :  { %v448_v48 = vpop.permute.xlu1 %447  ;;  %v446_v16 = vpop.permute.xlu0 %445 }
  0xca   :  { %v562_v46 = vsel %vm546_vm3, %v529_v4, %v448_v48  ;;  %v561_v34 = vsel %vm546_vm3, %v528_v20, %v446_v16  ;;  %v883_v32 = vsub.f32 %v8680_v19, %v10480_v60  ;;  %v893_v28 = vsub.f32 %v8677_v54, %v10481_v1 }
  0xcb   :  { %v639_v40 = vsel %vm592_vm4, %v562_v46, 0  ;;  %v636_v63 = vsel %vm592_vm4, %v561_v34, 0 }
  0xcc   :  { %v8698_v7 = vand.u32 4294901760, %v639_v40  ;;  %v8700_v58 = vand.u32 4294901760, %v636_v63  ;;  %v884_v36 = vand.u32 4294901760, %v883_v32  ;;  %v894_v4 = vand.u32 4294901760, %v893_v28 }
  0xcd   :  { %v355_v48 = vpop.permute.xlu1 %354  ;;  %v353_v16 = vpop.permute.xlu0 %352 }
  0xce   :  { %10764 = vst [vmem:[#allocation12_spill] sm:$0xff] %v8698_v7  ;;  %v8703_v20 = vsub.f32 %v639_v40, %v8698_v7  ;;  %v8706_v60 = vsub.f32 %v636_v63, %v8700_v58  ;;  %6359 = vmatprep.mubr.f32.mxu0 %v884_v36  ;;  %v531_v1 = vsel %vm513_vm2, %v8123_v6, %v355_v48 }
  0xcf   :  { %6360 = vmatmul.mubr.f32.gmra.mrb[12].mxu0 %v894_v4  ;;  %v530_v32 = vsel %vm513_vm2, %v8311_v3, %v353_v16 }
  0xd0   :  { %10765 = vst [vmem:[#allocation13_spill] sm:$0xff] %v8703_v20  ;;  %10766 = vst [vmem:[#allocation14_spill] sm:$0xff] %v8706_v60  ;;  %v10486_v46 = vand.u32 4294901760, %v8706_v60  ;;  %v10487_v34 = vand.u32 4294901760, %v8703_v20 }
  0xd1   :  { %v452_v28 = vpop.permute.xlu1 %451  ;;  %v450_v54 = vpop.permute.xlu0 %449 }
  0xd2   :  { %v564_v40 = vsel %vm546_vm3, %v531_v1, %v452_v28  ;;  %v563_v19 = vsel %vm546_vm3, %v530_v32, %v450_v54  ;;  %v903_v63 = vsub.f32 %v8706_v60, %v10486_v46  ;;  %v913_v36 = vsub.f32 %v8703_v20, %v10487_v34 }
  0xd3   :  { %v645_v4 = vsel %vm592_vm4, %v564_v40, 0  ;;  %v642_v6 = vsel %vm592_vm4, %v563_v19, 0 }
  0xd4   :  { %v8724_v48 = vand.u32 4294901760, %v645_v4  ;;  %v8726_v3 = vand.u32 4294901760, %v642_v6  ;;  %v904_v16 = vand.u32 4294901760, %v903_v63  ;;  %v914_v1 = vand.u32 4294901760, %v913_v36 }
  0xd5   :  { %v359_v28 = vpop.permute.xlu1 %358  ;;  %v357_v54 = vpop.permute.xlu0 %356 }
  0xd6   :  { %10767 = vst [vmem:[#allocation15_spill] sm:$0xff] %v8724_v48  ;;  %10768 = vst [vmem:[#allocation16_spill] sm:$0xff] %v8726_v3  ;;  %v8729_v32 = vsub.f32 %v645_v4, %v8724_v48  ;;  %v8732_v46 = vsub.f32 %v642_v6, %v8726_v3  ;;  %6362 = vmatprep.mubr.f32.mxu0 %v904_v16  ;;  %v533_v34 = vsel %vm513_vm2, %v8131_v13, %v359_v28 }
  0xd7   :  { %6363 = vmatmul.mubr.f32.gmra.mrb[14].mxu0 %v914_v1  ;;  %v532_v63 = vsel %vm513_vm2, %v8127_v9, %v357_v54 }
  0xd8   :  { %10769 = vst [vmem:[#allocation17_spill] sm:$0xff] %v8729_v32  ;;  %10770 = vst [vmem:[#allocation18_spill] sm:$0xff] %v8732_v46  ;;  %v10492_v40 = vand.u32 4294901760, %v8732_v46  ;;  %v10493_v19 = vand.u32 4294901760, %v8729_v32 }
  0xd9   :  { %v456_v36 = vpop.permute.xlu1 %455  ;;  %v454_v20 = vpop.permute.xlu0 %453 }
  0xda   :  { %v566_v4 = vsel %vm546_vm3, %v533_v34, %v456_v36  ;;  %v565_v60 = vsel %vm546_vm3, %v532_v63, %v454_v20  ;;  %v923_v6 = vsub.f32 %v8732_v46, %v10492_v40  ;;  %v933_v16 = vsub.f32 %v8729_v32, %v10493_v19 }
  0xdb   :  { %v651_v1 = vsel %vm592_vm4, %v566_v4, 0  ;;  %v648_v13 = vsel %vm592_vm4, %v565_v60, 0 }
  0xdc   :  { %v8750_v28 = vand.u32 4294901760, %v651_v1  ;;  %v8752_v9 = vand.u32 4294901760, %v648_v13  ;;  %v924_v54 = vand.u32 4294901760, %v923_v6  ;;  %v934_v34 = vand.u32 4294901760, %v933_v16 }
  0xdd   :  { %v363_v36 = vpop.permute.xlu1 %362  ;;  %v361_v20 = vpop.permute.xlu0 %360 }
  0xde   :  { %10771 = vst [vmem:[#allocation19_spill] sm:$0xff] %v8750_v28  ;;  %10772 = vst [vmem:[#allocation20_spill] sm:$0xff] %v8752_v9  ;;  %v8755_v63 = vsub.f32 %v651_v1, %v8750_v28  ;;  %v8758_v40 = vsub.f32 %v648_v13, %v8752_v9  ;;  %6365 = vmatprep.mubr.f32.mxu0 %v924_v54  ;;  %v535_v19 = vsel %vm513_vm2, %v8158_v41, %v363_v36 }
  0xdf   :  { %6366 = vmatmul.mubr.f32.gmra.mrb[16].mxu0 %v934_v34  ;;  %v534_v6 = vsel %vm513_vm2, %v8146_v27, %v361_v20 }
  0xe0   :  { %10773 = vst [vmem:[#allocation21_spill] sm:$0xff] %v8755_v63  ;;  %10774 = vst [vmem:[#allocation22_spill] sm:$0xff] %v8758_v40  ;;  %v10498_v4 = vand.u32 4294901760, %v8758_v40  ;;  %v10499_v60 = vand.u32 4294901760, %v8755_v63 }
  0xe1   :  { %v460_v16 = vpop.permute.xlu1 %459  ;;  %v458_v32 = vpop.permute.xlu0 %457 }
  0xe2   :  { %v568_v1 = vsel %vm546_vm3, %v535_v19, %v460_v16  ;;  %v567_v46 = vsel %vm546_vm3, %v534_v6, %v458_v32  ;;  %v943_v13 = vsub.f32 %v8758_v40, %v10498_v4  ;;  %v953_v54 = vsub.f32 %v8755_v63, %v10499_v60 }
  0xe3   :  { %v657_v34 = vsel %vm592_vm4, %v568_v1, 0  ;;  %v654_v41 = vsel %vm592_vm4, %v567_v46, 0 }
  0xe4   :  { %v8776_v36 = vand.u32 4294901760, %v657_v34  ;;  %v8778_v27 = vand.u32 4294901760, %v654_v41  ;;  %v944_v20 = vand.u32 4294901760, %v943_v13  ;;  %v954_v19 = vand.u32 4294901760, %v953_v54 }
  0xe5   :  { %v367_v16 = vpop.permute.xlu1 %366  ;;  %v365_v32 = vpop.permute.xlu0 %364 }
  0xe6   :  { %10775 = vst [vmem:[#allocation23_spill] sm:$0xff] %v8776_v36  ;;  %10776 = vst [vmem:[#allocation24_spill] sm:$0xff] %v8778_v27  ;;  %v8781_v6 = vsub.f32 %v657_v34, %v8776_v36  ;;  %v8784_v4 = vsub.f32 %v654_v41, %v8778_v27  ;;  %6368 = vmatprep.mubr.f32.mxu0 %v944_v20  ;;  %v537_v60 = vsel %vm513_vm2, %v8168_v49, %v367_v16 }
  0xe7   :  { %6369 = vmatmul.mubr.f32.gmra.mrb[18].mxu0 %v954_v19  ;;  %v536_v13 = vsel %vm513_vm2, %v8165_v47, %v365_v32 }
  0xe8   :  { %10777 = vst [vmem:[#allocation25_spill] sm:$0xff] %v8781_v6  ;;  %10778 = vst [vmem:[#allocation26_spill] sm:$0xff] %v8784_v4  ;;  %v10504_v1 = vand.u32 4294901760, %v8784_v4  ;;  %v10505_v46 = vand.u32 4294901760, %v8781_v6 }
  0xe9   :  { %v464_v54 = vpop.permute.xlu1 %463  ;;  %v462_v63 = vpop.permute.xlu0 %461 }
  0xea   :  { %v570_v34 = vsel %vm546_vm3, %v537_v60, %v464_v54  ;;  %v569_v40 = vsel %vm546_vm3, %v536_v13, %v462_v63  ;;  %v963_v41 = vsub.f32 %v8784_v4, %v10504_v1  ;;  %v973_v20 = vsub.f32 %v8781_v6, %v10505_v46 }
  0xeb   :  { %v663_v19 = vsel %vm592_vm4, %v570_v34, 0  ;;  %v660_v49 = vsel %vm592_vm4, %v569_v40, 0 }
  0xec   :  { %v8802_v16 = vand.u32 4294901760, %v663_v19  ;;  %v8804_v47 = vand.u32 4294901760, %v660_v49  ;;  %v964_v32 = vand.u32 4294901760, %v963_v41  ;;  %v974_v60 = vand.u32 4294901760, %v973_v20 }
  0xed   :  { %v371_v54 = vpop.permute.xlu1 %370  ;;  %v369_v63 = vpop.permute.xlu0 %368 }
  0xee   :  { %10779 = vst [vmem:[#allocation27_spill] sm:$0xff] %v8802_v16  ;;  %10780 = vst [vmem:[#allocation28_spill] sm:$0xff] %v8804_v47  ;;  %v8807_v13 = vsub.f32 %v663_v19, %v8802_v16  ;;  %v8810_v1 = vsub.f32 %v660_v49, %v8804_v47  ;;  %6371 = vmatprep.mubr.f32.mxu0 %v964_v32  ;;  %v539_v46 = vsel %vm513_vm2, %v8178_v55, %v371_v54 }
  0xef   :  { %6372 = vmatmul.mubr.f32.gmra.mrb[20].mxu0 %v974_v60  ;;  %v538_v41 = vsel %vm513_vm2, %v8174_v53, %v369_v63 }
  0xf0   :  { %10781 = vst [vmem:[#allocation29_spill] sm:$0xff] %v8807_v13  ;;  %10782 = vst [vmem:[#allocation30_spill] sm:$0xff] %v8810_v1  ;;  %v10510_v34 = vand.u32 4294901760, %v8810_v1  ;;  %v10511_v40 = vand.u32 4294901760, %v8807_v13 }
  0xf1   :  { %v468_v20 = vpop.permute.xlu1 %467  ;;  %v466_v6 = vpop.permute.xlu0 %465 }
  0xf2   :  { %v572_v19 = vsel %vm546_vm3, %v539_v46, %v468_v20  ;;  %v571_v4 = vsel %vm546_vm3, %v538_v41, %v466_v6  ;;  %v983_v49 = vsub.f32 %v8810_v1, %v10510_v34  ;;  %v993_v32 = vsub.f32 %v8807_v13, %v10511_v40 }
  0xf3   :  { %v669_v60 = vsel %vm592_vm4, %v572_v19, 0  ;;  %v666_v55 = vsel %vm592_vm4, %v571_v4, 0 }
  0xf4   :  { %v8828_v54 = vand.u32 4294901760, %v669_v60  ;;  %v8830_v53 = vand.u32 4294901760, %v666_v55  ;;  %v984_v63 = vand.u32 4294901760, %v983_v49  ;;  %v994_v46 = vand.u32 4294901760, %v993_v32 }
  0xf5   :  { %v375_v20 = vpop.permute.xlu1 %374  ;;  %v373_v6 = vpop.permute.xlu0 %372 }
  0xf6   :  { %10783 = vst [vmem:[#allocation31_spill] sm:$0xff] %v8828_v54  ;;  %10784 = vst [vmem:[#allocation32_spill] sm:$0xff] %v8830_v53  ;;  %v8833_v41 = vsub.f32 %v669_v60, %v8828_v54  ;;  %v8836_v34 = vsub.f32 %v666_v55, %v8830_v53  ;;  %6374 = vmatprep.mubr.f32.mxu0 %v984_v63  ;;  %v541_v40 = vsel %vm513_vm2, %v8241_v42, %v375_v20 }
  0xf7   :  { %6375 = vmatmul.mubr.f32.gmra.mrb[22].mxu0 %v994_v46  ;;  %v540_v49 = vsel %vm513_vm2, %v8200_v0, %v373_v6 }
  0xf8   :  { %10785 = vst [vmem:[#allocation33_spill] sm:$0xff] %v8833_v41  ;;  %10786 = vst [vmem:[#allocation34_spill] sm:$0xff] %v8836_v34  ;;  %v10516_v19 = vand.u32 4294901760, %v8836_v34  ;;  %v10517_v4 = vand.u32 4294901760, %v8833_v41 }
  0xf9   :  { %v472_v32 = vpop.permute.xlu1 %471  ;;  %v470_v13 = vpop.permute.xlu0 %469 }
  0xfa   :  { %v574_v60 = vsel %vm546_vm3, %v541_v40, %v472_v32  ;;  %v573_v1 = vsel %vm546_vm3, %v540_v49, %v470_v13  ;;  %v1003_v55 = vsub.f32 %v8836_v34, %v10516_v19  ;;  %v1013_v63 = vsub.f32 %v8833_v41, %v10517_v4 }
  0xfb   :  { %v675_v46 = vsel %vm592_vm4, %v574_v60, 0  ;;  %v672_v42 = vsel %vm592_vm4, %v573_v1, 0 }
  0xfc   :  { %v8854_v20 = vand.u32 4294901760, %v675_v46  ;;  %v8856_v0 = vand.u32 4294901760, %v672_v42  ;;  %v1004_v6 = vand.u32 4294901760, %v1003_v55  ;;  %v1014_v40 = vand.u32 4294901760, %v1013_v63 }
  0xfd   :  { %v379_v32 = vpop.permute.xlu1 %378  ;;  %v377_v13 = vpop.permute.xlu0 %376 }
  0xfe   :  { %10787 = vst [vmem:[#allocation35_spill] sm:$0xff] %v8854_v20  ;;  %10788 = vst [vmem:[#allocation36_spill] sm:$0xff] %v8856_v0  ;;  %v8859_v49 = vsub.f32 %v675_v46, %v8854_v20  ;;  %v8862_v19 = vsub.f32 %v672_v42, %v8856_v0  ;;  %6377 = vmatprep.mubr.f32.mxu0 %v1004_v6  ;;  %v543_v4 = vsel %vm513_vm2, %v8247_v44, %v379_v32 }
  0xff   :  { %6378 = vmatmul.mubr.f32.gmra.mrb[24].mxu0 %v1014_v40  ;;  %v542_v55 = vsel %vm513_vm2, %v8244_v43, %v377_v13 }
 0x100   :  { %10789 = vst [vmem:[#allocation37_spill] sm:$0xff] %v8859_v49  ;;  %10790 = vst [vmem:[#allocation38_spill] sm:$0xff] %v8862_v19  ;;  %v10522_v60 = vand.u32 4294901760, %v8862_v19  ;;  %v10523_v1 = vand.u32 4294901760, %v8859_v49 }
 0x101   :  { %v476_v63 = vpop.permute.xlu1 %475  ;;  %v474_v41 = vpop.permute.xlu0 %473 }
 0x102   :  { %v576_v46 = vsel %vm546_vm3, %v543_v4, %v476_v63  ;;  %v575_v34 = vsel %vm546_vm3, %v542_v55, %v474_v41  ;;  %v1023_v42 = vsub.f32 %v8862_v19, %v10522_v60  ;;  %v1033_v6 = vsub.f32 %v8859_v49, %v10523_v1 }
 0x103   :  { %v681_v40 = vsel %vm592_vm4, %v576_v46, 0  ;;  %v678_v44 = vsel %vm592_vm4, %v575_v34, 0 }
 0x104   :  { %v8880_v32 = vand.u32 4294901760, %v681_v40  ;;  %v8882_v43 = vand.u32 4294901760, %v678_v44  ;;  %v1024_v13 = vand.u32 4294901760, %v1023_v42  ;;  %v1034_v4 = vand.u32 4294901760, %v1033_v6 }
 0x105   :  { %v383_v63 = vpop.permute.xlu1 %382  ;;  %v381_v41 = vpop.permute.xlu0 %380 }
 0x106   :  { %10791 = vst [vmem:[#allocation39_spill] sm:$0xff] %v8880_v32  ;;  %10792 = vst [vmem:[#allocation40_spill] sm:$0xff] %v8882_v43  ;;  %v8885_v55 = vsub.f32 %v681_v40, %v8880_v32  ;;  %v8888_v60 = vsub.f32 %v678_v44, %v8882_v43  ;;  %6380 = vmatprep.mubr.f32.mxu0 %v1024_v13  ;;  %v545_v1 = vsel %vm513_vm2, %v8285_v30, %v383_v63 }
 0x107   :  { %6381 = vmatmul.mubr.f32.gmra.mrb[26].mxu0 %v1034_v4  ;;  %v544_v42 = vsel %vm513_vm2, %v8265_v62, %v381_v41 }
 0x108   :  { %v10531_v46 = vand.u32 4294901760, %v8888_v60  ;;  %v10530_v34 = vand.u32 4294901760, %v8885_v55 }
 0x109   :  { %v480_v6 = vpop.permute.xlu1 %479  ;;  %v478_v49 = vpop.permute.xlu0 %477 }
 0x10a   :  { %v578_v40 = vsel %vm546_vm3, %v545_v1, %v480_v6  ;;  %v577_v19 = vsel %vm546_vm3, %v544_v42, %v478_v49  ;;  %v1043_v44 = vsub.f32 %v8888_v60, %v10531_v46  ;;  %v1053_v13 = vsub.f32 %v8885_v55, %v10530_v34  ;;  %v10808_v34 = vld [vmem:[#allocation22_spill] sm:$0xff]  ;;  %v10809_v46 = vld [vmem:[#allocation21_spill] sm:$0xff] }
 0x10b   :  { %v687_v4 = vsel %vm592_vm4, %v578_v40, 0  ;;  %v684_v30 = vsel %vm592_vm4, %v577_v19, 0 }
 0x10c   :  { %v8906_v63 = vand.u32 4294901760, %v687_v4  ;;  %v8908_v62 = vand.u32 4294901760, %v684_v30  ;;  %v1044_v41 = vand.u32 4294901760, %v1043_v44  ;;  %v1054_v1 = vand.u32 4294901760, %v1053_v13 }
 0x10e   :  { %10793 = vst [vmem:[#allocation41_spill] sm:$0xff] %v8906_v63  ;;  %10794 = vst [vmem:[#allocation42_spill] sm:$0xff] %v8908_v62  ;;  %v8911_v49 = vsub.f32 %v687_v4, %v8906_v63  ;;  %v8914_v42 = vsub.f32 %v684_v30, %v8908_v62  ;;  %6383 = vmatprep.mubr.f32.mxu0 %v1044_v41  ;;  %v7173_v30 = vpack.c.bf16 %v8460_v5, %v8453_v51 }
 0x10f   :  { %6384 = vmatmul.mubr.f32.gmra.mrb[28].mxu0 %v1054_v1  ;;  %v7177_v41 = vpack.c.bf16 %v8481_v8, %v8476_v11  ;;  %v10796_v1 = vand.u32 4294901760, %v8417_v25  ;;  %v10803_v25 = vld [vmem:[#allocation10_spill] sm:$0xff] }
 0x110   :  { %v10529_v6 = vand.u32 4294901760, %v8914_v42  ;;  %v10528_v40 = vand.u32 4294901760, %v8911_v49 }
 0x112   :  { %v1063_v19 = vsub.f32 %v8914_v42, %v10529_v6  ;;  %v1073_v44 = vsub.f32 %v8911_v49, %v10528_v40  ;;  %v10806_v40 = vld [vmem:[#allocation18_spill] sm:$0xff]  ;;  %v10807_v6 = vld [vmem:[#allocation17_spill] sm:$0xff] }
 0x114   :  { %v1064_v13 = vand.u32 4294901760, %v1063_v19  ;;  %v1074_v4 = vand.u32 4294901760, %v1073_v44  ;;  %v10797_v44 = vld [vmem:[#allocation5_spill] sm:$0xff] }
 0x116   :  { %6386 = vmatprep.mubr.f32.mxu0 %v1064_v13  ;;  %v10798_v13 = vld [vmem:[#allocation7_spill] sm:$0xff] }
 0x117   :  { %6387 = vmatmul.mubr.f32.gmra.mrb[30].mxu0 %v1074_v4  ;;  %v10799_v4 = vld [vmem:[#allocation6_spill] sm:$0xff] }
 0x118   :  { %6401 = vmatprep.mubr.f32.mxu0 %v8483_v18 }
 0x11b   :  { %6402 = vmatmul.mubr.f32.vlgmr.msra.gmra.mrb[0].mxu0 %v8506_v26 }
 0x11c   :  { %6404 = vmatprep.mubr.f32.mxu0 %v8538_v14  ;;  %7172 = vmatpush3.bf16.msra.mxu0 %v8629_v24  ;;  %v10795_v24 = vand.u32 4294901760, %v8412_v2  ;;  %v10802_v2 = vld [vmem:[#allocation11_spill] sm:$0xff] }
 0x11d   :  { %7174 = vmatprep.subr.bf16.mxu0 %v7173_v30 }
 0x11e   :  { %v7193_v19 = vpack.c.bf16 %v10796_v1, %v10795_v24  ;;  %v10804_v24 = vld [vmem:[#allocation14_spill] sm:$0xff]  ;;  %v10805_v1 = vld [vmem:[#allocation13_spill] sm:$0xff] }
 0x11f   :  { %6405 = vmatmul.mubr.f32.gmra.mrb[2].mxu0 %v8536_v57 }
 0x120   :  { %6407 = vmatprep.mubr.f32.mxu0 %v8565_v10  ;;  %7176 = vmatpush3.bf16.msra.mxu0 %v7173_v30  ;;  %v10800_v30 = vld [vmem:[#allocation9_spill] sm:$0xff] }
 0x121   :  { %7178 = vmatprep.subr.bf16.mxu0 %v7177_v41 }
 0x123   :  { %6408 = vmatmul.mubr.f32.gmra.mrb[4].mxu0 %v8563_v15 }
 0x124   :  { %6410 = vmatprep.mubr.f32.mxu0 %v8591_v38  ;;  %7180 = vmatpush3.bf16.msra.mxu0 %v7177_v41  ;;  %v10801_v41 = vld [vmem:[#allocation8_spill] sm:$0xff] }
 0x125   :  { %7182 = vmatprep.subr.bf16.mxu0 %v8225_v17 }
 0x127   :  { %6411 = vmatmul.mubr.f32.gmra.mrb[6].mxu0 %v8589_v59 }
 0x128   :  { %6413 = vmatprep.mubr.f32.mxu0 %v8617_v52 }
 0x12b   :  { %6414 = vmatmul.mubr.f32.gmra.mrb[8].mxu0 %v8615_v31 }
 0x12c   :  { %6416 = vmatprep.mubr.f32.mxu0 %v8648_v12 }
 0x12f   :  { %6417 = vmatmul.mubr.f32.gmra.mrb[10].mxu0 %v8646_v56 }
 0x130   :  { %6419 = vmatprep.mubr.f32.mxu0 %v8674_v61 }
 0x133   :  { %6420 = vmatmul.mubr.f32.gmra.mrb[12].mxu0 %v8672_v37 }
 0x134   :  { %6422 = vmatprep.mubr.f32.mxu0 %v8700_v58 }
 0x137   :  { %6423 = vmatmul.mubr.f32.gmra.mrb[14].mxu0 %v8698_v7 }
 0x138   :  { %6425 = vmatprep.mubr.f32.mxu0 %v8726_v3  ;;  %v10824_v3 = vand.u32 4294901760, %v8481_v8  ;;  %v10830_v8 = vand.u32 4294901760, %v10798_v13 }
 0x13b   :  { %6426 = vmatmul.mubr.f32.gmra.mrb[16].mxu0 %v8724_v48  ;;  %v10823_v48 = vand.u32 4294901760, %v8476_v11  ;;  %v10829_v11 = vand.u32 4294901760, %v10797_v44 }
 0x13c   :  { %6428 = vmatprep.mubr.f32.mxu0 %v8752_v9  ;;  %v10822_v9 = vand.u32 4294901760, %v8544_v50 }
 0x13d   :  { %v7201_v7 = vpack.c.bf16 %v10824_v3, %v10823_v48  ;;  %v10837_v48 = vand.u32 4294901760, %v10805_v1  ;;  %v10838_v3 = vand.u32 4294901760, %v10806_v40 }
 0x13f   :  { %6429 = vmatmul.mubr.f32.gmra.mrb[18].mxu0 %v8750_v28  ;;  %v10821_v28 = vand.u32 4294901760, %v8510_v23 }
 0x140   :  { %6431 = vmatprep.mubr.f32.mxu0 %v8778_v27 }
 0x143   :  { %6432 = vmatmul.mubr.f32.gmra.mrb[20].mxu0 %v8776_v36  ;;  %v10820_v36 = vand.u32 4294901760, %v8460_v5  ;;  %v10827_v5 = vand.u32 4294901760, %v8568_v39 }
 0x144   :  { %6434 = vmatprep.mubr.f32.mxu0 %v8804_v47  ;;  %v10819_v47 = vand.u32 4294901760, %v8453_v51  ;;  %v10826_v51 = vand.u32 4294901760, %v8571_v29 }
 0x146   :  { %v7197_v27 = vpack.c.bf16 %v10820_v36, %v10819_v47  ;;  %v10841_v36 = vand.u32 4294901760, %v10809_v46 }
 0x147   :  { %6435 = vmatmul.mubr.f32.gmra.mrb[22].mxu0 %v8802_v16  ;;  %v10818_v16 = vand.u32 4294901760, %v8495_v45 }
 0x148   :  { %6437 = vmatprep.mubr.f32.mxu0 %v8830_v53  ;;  %v10817_v53 = vld [vmem:[#allocation37_spill] sm:$0xff] }
 0x14b   :  { %6438 = vmatmul.mubr.f32.gmra.mrb[24].mxu0 %v8828_v54  ;;  %v10816_v54 = vld [vmem:[#allocation38_spill] sm:$0xff] }
 0x14c   :  { %6440 = vmatprep.mubr.f32.mxu0 %v8856_v0  ;;  %v10815_v0 = vld [vmem:[#allocation33_spill] sm:$0xff] }
 0x14f   :  { %6441 = vmatmul.mubr.f32.gmra.mrb[26].mxu0 %v8854_v20  ;;  %v10814_v20 = vld [vmem:[#allocation34_spill] sm:$0xff] }
 0x150   :  { %6443 = vmatprep.mubr.f32.mxu0 %v8882_v43  ;;  %v10813_v43 = vld [vmem:[#allocation29_spill] sm:$0xff] }
 0x153   :  { %6444 = vmatmul.mubr.f32.gmra.mrb[28].mxu0 %v8880_v32  ;;  %v10812_v32 = vld [vmem:[#allocation30_spill] sm:$0xff] }
 0x154   :  { %6446 = vmatprep.mubr.f32.mxu0 %v8908_v62  ;;  %v10811_v62 = vld [vmem:[#allocation25_spill] sm:$0xff]  ;;  %v10844_v47 = vand.u32 4294901760, %v10812_v32 }
 0x157   :  { %6447 = vmatmul.mubr.f32.gmra.mrb[30].mxu0 %v8906_v63  ;;  %v10810_v63 = vld [vmem:[#allocation26_spill] sm:$0xff] }
 0x158   :  { %6461 = vmatprep.mubr.f32.mxu0 %v8495_v45  ;;  %v10825_v45 = vand.u32 4294901760, %v8541_v21 }
 0x15b   :  { %6462 = vmatmul.mubr.f32.vlgmr.msra.gmra.mrb[0].mxu0 %v8510_v23  ;;  %v10828_v23 = vand.u32 4294901760, %v8597_v22 }
 0x15c   :  { %6464 = vmatprep.mubr.f32.mxu0 %v8544_v50  ;;  %7184 = vmatpush3.bf16.msra.mxu0 %v8225_v17  ;;  %v10832_v50 = vand.u32 4294901760, %v10800_v30 }
 0x15d   :  { %7186 = vmatprep.subr.bf16.mxu0 %v8291_v33 }
 0x15f   :  { %6465 = vmatmul.mubr.f32.gmra.mrb[2].mxu0 %v8541_v21  ;;  %v10831_v21 = vand.u32 4294901760, %v10799_v4 }
 0x160   :  { %6467 = vmatprep.mubr.f32.mxu0 %v8571_v29  ;;  %7188 = vmatpush3.bf16.msra.mxu0 %v8291_v33  ;;  %v10834_v29 = vand.u32 4294901760, %v10802_v2 }
 0x161   :  { %7190 = vmatprep.subr.bf16.mxu0 %v8297_v35 }
 0x163   :  { %6468 = vmatmul.mubr.f32.gmra.mrb[4].mxu0 %v8568_v39  ;;  %v10833_v39 = vand.u32 4294901760, %v10801_v41 }
 0x164   :  { %6470 = vmatprep.mubr.f32.mxu0 %v8597_v22  ;;  %7192 = vmatpush3.bf16.msra.mxu0 %v8297_v35  ;;  %v10835_v22 = vand.u32 4294901760, %v10803_v25 }
 0x165   :  { %7194 = vmatprep.subr.bf16.mxu0 %v7193_v19 }
 0x167   :  { %6471 = vmatmul.mubr.f32.gmra.mrb[6].mxu0 %v10797_v44  ;;  %v9108_v44 = vld [vmem:[%s10446_s5 + $0x28] sm:$0xff] }
 0x168   :  { %6473 = vmatprep.mubr.f32.mxu0 %v10798_v13 }
 0x16b   :  { %6474 = vmatmul.mubr.f32.gmra.mrb[8].mxu0 %v10799_v4 }
 0x16c   :  { %6476 = vmatprep.mubr.f32.mxu0 %v10800_v30 }
 0x16f   :  { %6477 = vmatmul.mubr.f32.gmra.mrb[10].mxu0 %v10801_v41 }
 0x170   :  { %6479 = vmatprep.mubr.f32.mxu0 %v10802_v2  ;;  %v2692_v2 = vand.u32 4294901760, %v9108_v44 }
 0x173   :  { %6480 = vmatmul.mubr.f32.gmra.mrb[12].mxu0 %v10803_v25 }
 0x174   :  { %6482 = vmatprep.mubr.f32.mxu0 %v10804_v24 }
 0x177   :  { %6483 = vmatmul.mubr.f32.gmra.mrb[14].mxu0 %v10805_v1  ;;  %v10860_v1 = vld [vmem:[#allocation19_spill] sm:$0xff] }
 0x178   :  { %6485 = vmatprep.mubr.f32.mxu0 %v10806_v40  ;;  %v10845_v40 = vand.u32 4294901760, %v10813_v43 }
 0x17b   :  { %6486 = vmatmul.mubr.f32.gmra.mrb[16].mxu0 %v10807_v6 }
 0x17c   :  { %6488 = vmatprep.mubr.f32.mxu0 %v10808_v34 }
 0x17f   :  { %6489 = vmatmul.mubr.f32.gmra.mrb[18].mxu0 %v10809_v46  ;;  %v10848_v46 = vand.u32 4294901760, %v10816_v54 }
 0x180   :  { %6491 = vmatprep.mubr.f32.mxu0 %v10810_v63 }
 0x183   :  { %6492 = vmatmul.mubr.f32.gmra.mrb[20].mxu0 %v10811_v62 }
 0x184   :  { %6494 = vmatprep.mubr.f32.mxu0 %v10812_v32  ;;  %v10851_v32 = vand.u32 4294901760, %v8885_v55 }
 0x187   :  { %6495 = vmatmul.mubr.f32.gmra.mrb[22].mxu0 %v10813_v43  ;;  %v10852_v43 = vand.u32 4294901760, %v8914_v42 }
 0x188   :  { %6497 = vmatprep.mubr.f32.mxu0 %v10814_v20 }
 0x18b   :  { %6498 = vmatmul.mubr.f32.gmra.mrb[24].mxu0 %v10815_v0 }
 0x18c   :  { %6500 = vmatprep.mubr.f32.mxu0 %v10816_v54  ;;  %v9079_v54 = vld [vmem:[%s10446_s5] sm:$0xff] }
 0x18f   :  { %6501 = vmatmul.mubr.f32.gmra.mrb[26].mxu0 %v10817_v53 }
 0x190   :  { %6503 = vmatprep.mubr.f32.mxu0 %v8888_v60 }
 0x193   :  { %6504 = vmatmul.mubr.f32.gmra.mrb[28].mxu0 %v8885_v55 }
 0x194   :  { %6506 = vmatprep.mubr.f32.mxu0 %v8914_v42 }
 0x197   :  { %6507 = vmatmul.mubr.f32.gmra.mrb[30].mxu0 %v8911_v49 }
 0x198   :  { %6521 = vmatprep.mubr.f32.mxu0 %v10818_v16  ;;  %v10843_v16 = vand.u32 4294901760, %v10811_v62  ;;  %v10850_v62 = vand.u32 4294901760, %v8888_v60  ;;  %v2677_v60 = vand.u32 4294901760, %v9079_v54 }
 0x19b   :  { %6522 = vmatmul.mubr.f32.vlgmr.msra.gmra.mrb[0].mxu0 %v10821_v28  ;;  %v10839_v28 = vand.u32 4294901760, %v10807_v6  ;;  %v10846_v6 = vand.u32 4294901760, %v10814_v20  ;;  %v10853_v20 = vand.u32 4294901760, %v8911_v49  ;;  %v9097_v49 = vld [vmem:[%s10446_s5 + $0x18] sm:$0xff] }
 0x19c   :  { %6524 = vmatprep.mubr.f32.mxu0 %v10822_v9  ;;  %7196 = vmatpush3.bf16.msra.mxu0 %v7193_v19  ;;  %v10840_v9 = vand.u32 4294901760, %v10808_v34  ;;  %v10847_v34 = vand.u32 4294901760, %v10815_v0  ;;  %v9089_v0 = vld [vmem:[%s10446_s5 + $0x10] sm:$0xff]  ;;  %v9103_v19 = vld [vmem:[%s10446_s5 + $0x20] sm:$0xff]  ;;  %v2686_v13 = vand.u32 4294901760, %v9097_v49 }
 0x19d   :  { %7198 = vmatprep.subr.bf16.mxu0 %v7197_v27  ;;  %v2683_v42 = vand.u32 4294901760, %v9089_v0  ;;  %v2689_v41 = vand.u32 4294901760, %v9103_v19 }
 0x19f   :  { %6525 = vmatmul.mubr.f32.gmra.mrb[2].mxu0 %v10825_v45  ;;  %v9122_v30 = vpack.c.bf16 %v2686_v13, %v2683_v42  ;;  %v9137_v25 = vpack.c.bf16 %v2692_v2, %v2689_v41  ;;  %v10861_v45 = vld [vmem:[#allocation24_spill] sm:$0xff] }
 0x1a0   :  { %6527 = vmatprep.mubr.f32.mxu0 %v10826_v51  ;;  %7200 = vmatpush3.bf16.msra.mxu0 %v7197_v27  ;;  %v10842_v27 = vand.u32 4294901760, %v10810_v63  ;;  %v10849_v63 = vand.u32 4294901760, %v10817_v53  ;;  %v9084_v53 = vld [vmem:[%s10446_s5 + $0x8] sm:$0xff]  ;;  %v10862_v51 = vld [vmem:[#allocation23_spill] sm:$0xff] }
 0x1a1   :  { %7202 = vmatprep.subr.bf16.mxu0 %v7201_v7  ;;  %v2680_v55 = vand.u32 4294901760, %v9084_v53  ;;  %10854 = vst [vmem:[#allocation5_spill] sm:$0xff] %v9122_v30  ;;  %10855 = vst [vmem:[#allocation7_spill] sm:$0xff] %v9137_v25 }
 0x1a3   :  { %6528 = vmatmul.mubr.f32.gmra.mrb[4].mxu0 %v10827_v5  ;;  %v9115_v4 = vpack.c.bf16 %v2680_v55, %v2677_v60  ;;  %v10863_v5 = vld [vmem:[#allocation28_spill] sm:$0xff] }
 0x1a4   :  { %6530 = vmatprep.mubr.f32.mxu0 %v10828_v23  ;;  %7204 = vmatpush3.bf16.msra.mxu0 %v7201_v7  ;;  %v10836_v7 = vand.u32 4294901760, %v10804_v24  ;;  %v10859_v24 = vld [vmem:[#allocation20_spill] sm:$0xff]  ;;  %v10864_v23 = vld [vmem:[#allocation27_spill] sm:$0xff] }
 0x1a5   :  { %7206 = vmatprep.subr.bf16.mxu0 %v8225_v17  ;;  %7218 = vmatprep.subr.bf16.mxu1 %v9115_v4 }
 0x1a6   :  { %7220 = vmatpush3.bf16.msra.mxu1 %v9115_v4 }
 0x1a7   :  { %6531 = vmatmul.mubr.f32.gmra.mrb[6].mxu0 %v10829_v11  ;;  %7222 = vmatprep.subr.bf16.mxu1 %v9122_v30  ;;  %v10865_v11 = vld [vmem:[#allocation32_spill] sm:$0xff] }
 0x1a8   :  { %6533 = vmatprep.mubr.f32.mxu0 %v10830_v8  ;;  %v10866_v8 = vld [vmem:[#allocation31_spill] sm:$0xff] }
 0x1aa   :  { %7224 = vmatpush3.bf16.msra.mxu1 %v9122_v30 }
 0x1ab   :  { %6534 = vmatmul.mubr.f32.gmra.mrb[8].mxu0 %v10831_v21  ;;  %7226 = vmatprep.subr.bf16.mxu1 %v9137_v25  ;;  %v10867_v21 = vld [vmem:[#allocation36_spill] sm:$0xff] }
 0x1ac   :  { %6536 = vmatprep.mubr.f32.mxu0 %v10832_v50  ;;  %v10868_v50 = vld [vmem:[#allocation35_spill] sm:$0xff] }
 0x1ae   :  { %7228 = vmatpush3.bf16.msra.mxu1 %v9137_v25 }
 0x1af   :  { %6537 = vmatmul.mubr.f32.gmra.mrb[10].mxu0 %v10833_v39  ;;  %v10869_v39 = vld [vmem:[#allocation40_spill] sm:$0xff] }
 0x1b0   :  { %6539 = vmatprep.mubr.f32.mxu0 %v10834_v29  ;;  %v10870_v29 = vld [vmem:[#allocation39_spill] sm:$0xff] }
 0x1b3   :  { %6540 = vmatmul.mubr.f32.gmra.mrb[12].mxu0 %v10835_v22  ;;  %v10871_v22 = vld [vmem:[#allocation42_spill] sm:$0xff] }
 0x1b4   :  { %6542 = vmatprep.mubr.f32.mxu0 %v10836_v7  ;;  %v10872_v7 = vld [vmem:[#allocation41_spill] sm:$0xff] }
 0x1b7   :  { %6543 = vmatmul.mubr.f32.gmra.mrb[14].mxu0 %v10837_v48  ;;  %v2577_v48 = vld [vmem:[%s10446_s5 + $0x60] sm:$0xff] }
 0x1b8   :  { %6545 = vmatprep.mubr.f32.mxu0 %v10838_v3  ;;  %v2578_v3 = vld [vmem:[%s10446_s5 + $0x68] sm:$0xff] }
 0x1bb   :  { %6546 = vmatmul.mubr.f32.gmra.mrb[16].mxu0 %v10839_v28  ;;  %v2713_v28 = vand.u32 4294901760, %v2577_v48 }
 0x1bc   :  { %6548 = vmatprep.mubr.f32.mxu0 %v10840_v9  ;;  %v2716_v9 = vand.u32 4294901760, %v2578_v3 }
 0x1bf   :  { %6549 = vmatmul.mubr.f32.gmra.mrb[18].mxu0 %v10841_v36  ;;  %v9241_v36 = vpack.c.bf16 %v2716_v9, %v2713_v28 }
 0x1c0   :  { %6551 = vmatprep.mubr.f32.mxu0 %v10842_v27  ;;  %v9248_v27 = vsub.f32 %v9079_v54, %v2677_v60 }
 0x1c1   :  { %10876 = vst [vmem:[#allocation11_spill] sm:$0xff] %v9241_v36 }
 0x1c2   :  { %10877 = vst [vmem:[#allocation10_spill] sm:$0xff] %v9248_v27 }
 0x1c3   :  { %6552 = vmatmul.mubr.f32.gmra.mrb[20].mxu0 %v10843_v16  ;;  %v9253_v16 = vsub.f32 %v9084_v53, %v2680_v55  ;;  %v9278_v55 = vsub.f32 %v2577_v48, %v2713_v28 }
 0x1c4   :  { %6554 = vmatprep.mubr.f32.mxu0 %v10844_v47  ;;  %v10585_v47 = vand.u32 4294901760, %v9248_v27 }
 0x1c5   :  { %10878 = vst [vmem:[#allocation14_spill] sm:$0xff] %v9253_v16 }
 0x1c7   :  { %6555 = vmatmul.mubr.f32.gmra.mrb[22].mxu0 %v10845_v40  ;;  %v10583_v40 = vand.u32 4294901760, %v9253_v16 }
 0x1c8   :  { %6557 = vmatprep.mubr.f32.mxu0 %v10846_v6  ;;  %v3079_v6 = vsub.f32 %v9248_v27, %v10585_v47 }
 0x1cb   :  { %6558 = vmatmul.mubr.f32.gmra.mrb[24].mxu0 %v10847_v34  ;;  %v3086_v34 = vsub.f32 %v9253_v16, %v10583_v40 }
 0x1cc   :  { %6560 = vmatprep.mubr.f32.mxu0 %v10848_v46  ;;  %v3080_v46 = vand.u32 4294901760, %v3079_v6 }
 0x1cf   :  { %6561 = vmatmul.mubr.f32.gmra.mrb[26].mxu0 %v10849_v63  ;;  %v3087_v63 = vand.u32 4294901760, %v3086_v34 }
 0x1d0   :  { %6563 = vmatprep.mubr.f32.mxu0 %v10850_v62 }
 0x1d1   :  { %v9263_v62 = vpack.c.bf16 %v3087_v63, %v3080_v46 }
 0x1d3   :  { %6564 = vmatmul.mubr.f32.gmra.mrb[28].mxu0 %v10851_v32 }
 0x1d4   :  { %6566 = vmatprep.mubr.f32.mxu0 %v10852_v43 }
 0x1d7   :  { %6567 = vmatmul.mubr.f32.gmra.mrb[30].mxu0 %v10853_v20 }
 0x1d8   :  { %6581 = vmatprep.mubr.f32.mxu0 %v8483_v18 }
 0x1db   :  { %6582 = vmatmul.mubr.f32.vlgmr.msra.gmra.mrb[0].mxu0 %v8506_v26 }
 0x1dc   :  { %6584 = vmatprep.mubr.f32.mxu0 %v8538_v14  ;;  %7208 = vmatpush3.bf16.msra.mxu0 %v8225_v17  ;;  %v10856_v17 = vld [vmem:[#allocation12_spill] sm:$0xff] }
 0x1dd   :  { %7210 = vmatprep.subr.bf16.mxu0 %v8291_v33 }
 0x1df   :  { %6585 = vmatmul.mubr.f32.gmra.mrb[2].mxu0 %v8536_v57 }
 0x1e0   :  { %6587 = vmatprep.mubr.f32.mxu0 %v8565_v10  ;;  %7212 = vmatpush3.bf16.msra.mxu0 %v8291_v33  ;;  %v10857_v33 = vld [vmem:[#allocation16_spill] sm:$0xff] }
 0x1e1   :  { %7214 = vmatprep.subr.bf16.mxu0 %v8297_v35 }
 0x1e3   :  { %6588 = vmatmul.mubr.f32.gmra.mrb[4].mxu0 %v8563_v15 }
 0x1e4   :  { %6590 = vmatprep.mubr.f32.mxu0 %v8591_v38  ;;  %7216 = vmatpush3.bf16.msra.mxu0 %v8297_v35  ;;  %v10858_v35 = vld [vmem:[#allocation15_spill] sm:$0xff] }
 0x1e7   :  { %6591 = vmatmul.mubr.f32.gmra.mrb[6].mxu0 %v8589_v59 }
 0x1e8   :  { %6593 = vmatprep.mubr.f32.mxu0 %v8617_v52 }
 0x1eb   :  { %6594 = vmatmul.mubr.f32.gmra.mrb[8].mxu0 %v8615_v31 }
 0x1ec   :  { %6596 = vmatprep.mubr.f32.mxu0 %v8648_v12 }
 0x1ef   :  { %6597 = vmatmul.mubr.f32.gmra.mrb[10].mxu0 %v8646_v56 }
 0x1f0   :  { %6599 = vmatprep.mubr.f32.mxu0 %v8674_v61 }
 0x1f3   :  { %6600 = vmatmul.mubr.f32.gmra.mrb[12].mxu0 %v8672_v37 }
 0x1f4   :  { %6602 = vmatprep.mubr.f32.mxu0 %v8700_v58 }
 0x1f7   :  { %6603 = vmatmul.mubr.f32.gmra.mrb[14].mxu0 %v10856_v17 }
 0x1f8   :  { %6605 = vmatprep.mubr.f32.mxu0 %v10857_v33 }
 0x1fb   :  { %6606 = vmatmul.mubr.f32.gmra.mrb[16].mxu0 %v10858_v35 }
 0x1fc   :  { %6608 = vmatprep.mubr.f32.mxu0 %v10859_v24 }
 0x1ff   :  { %6609 = vmatmul.mubr.f32.gmra.mrb[18].mxu0 %v10860_v1 }
 0x200   :  { %6611 = vmatprep.mubr.f32.mxu0 %v10861_v45 }
 0x203   :  { %6612 = vmatmul.mubr.f32.gmra.mrb[20].mxu0 %v10862_v51 }
 0x204   :  { %6614 = vmatprep.mubr.f32.mxu0 %v10863_v5 }
 0x207   :  { %6615 = vmatmul.mubr.f32.gmra.mrb[22].mxu0 %v10864_v23 }
 0x208   :  { %6617 = vmatprep.mubr.f32.mxu0 %v10865_v11 }
 0x20b   :  { %6618 = vmatmul.mubr.f32.gmra.mrb[24].mxu0 %v10866_v8 }
 0x20c   :  { %6620 = vmatprep.mubr.f32.mxu0 %v10867_v21 }
 0x20f   :  { %6621 = vmatmul.mubr.f32.gmra.mrb[26].mxu0 %v10868_v50 }
 0x210   :  { %6623 = vmatprep.mubr.f32.mxu0 %v10869_v39 }
 0x213   :  { %6624 = vmatmul.mubr.f32.gmra.mrb[28].mxu0 %v10870_v29 }
 0x214   :  { %6626 = vmatprep.mubr.f32.mxu0 %v10871_v22 }
 0x217   :  { %6627 = vmatmul.mubr.f32.gmra.mrb[30].mxu0 %v10872_v7 }
 0x218   :  { %6641 = vmatprep.mubr.f32.mxu0 %v8483_v18  ;;  %v2571_v18 = vld [vmem:[%s10446_s5 + $0x30] sm:$0xff] }
 0x21b   :  { %6642 = vmatmul.mubr.f32.vlgmr.msra.gmra.mrb[0].mxu0 %v8506_v26  ;;  %v2572_v26 = vld [vmem:[%s10446_s5 + $0x38] sm:$0xff] }
 0x21c   :  { %6644 = vmatprep.mubr.f32.mxu0 %v8538_v14  ;;  %v2698_v14 = vand.u32 4294901760, %v2572_v26 }
 0x21e   :  { %v9268_v43 = vsub.f32 %v2572_v26, %v2698_v14 }
 0x21f   :  { %6645 = vmatmul.mubr.f32.gmra.mrb[2].mxu0 %v8536_v57  ;;  %v2695_v57 = vand.u32 4294901760, %v2571_v18 }
 0x220   :  { %6647 = vmatprep.mubr.f32.mxu0 %v8565_v10  ;;  %v2573_v10 = vld [vmem:[%s10446_s5 + $0x40] sm:$0xff] }
 0x221   :  { %v9266_v32 = vsub.f32 %v2571_v18, %v2695_v57 }
 0x223   :  { %6648 = vmatmul.mubr.f32.gmra.mrb[4].mxu0 %v8563_v15  ;;  %v9211_v15 = vpack.c.bf16 %v2698_v14, %v2695_v57  ;;  %v10567_v14 = vand.u32 4294901760, %v9278_v55 }
 0x224   :  { %6650 = vmatprep.mubr.f32.mxu0 %v8591_v38  ;;  %v2701_v38 = vand.u32 4294901760, %v2573_v10 }
 0x225   :  { %10873 = vst [vmem:[#allocation6_spill] sm:$0xff] %v9211_v15  ;;  %7230 = vmatprep.subr.bf16.mxu1 %v9211_v15  ;;  %v3163_v63 = vsub.f32 %v9278_v55, %v10567_v14 }
 0x226   :  { %7232 = vmatpush3.bf16.msra.mxu1 %v9211_v15  ;;  %v9270_v20 = vsub.f32 %v2573_v10, %v2701_v38 }
 0x227   :  { %6651 = vmatmul.mubr.f32.gmra.mrb[6].mxu0 %v8589_v59  ;;  %v2574_v59 = vld [vmem:[%s10446_s5 + $0x48] sm:$0xff] }
 0x228   :  { %6653 = vmatprep.mubr.f32.mxu0 %v8617_v52 }
 0x22b   :  { %6654 = vmatmul.mubr.f32.gmra.mrb[8].mxu0 %v8615_v31  ;;  %v2704_v31 = vand.u32 4294901760, %v2574_v59 }
 0x22c   :  { %6656 = vmatprep.mubr.f32.mxu0 %v8648_v12  ;;  %v2576_v12 = vld [vmem:[%s10446_s5 + $0x58] sm:$0xff] }
 0x22d   :  { %v9221_v52 = vpack.c.bf16 %v2704_v31, %v2701_v38  ;;  %v9272_v54 = vsub.f32 %v2574_v59, %v2704_v31 }
 0x22f   :  { %6657 = vmatmul.mubr.f32.gmra.mrb[10].mxu0 %v8646_v56  ;;  %10874 = vst [vmem:[#allocation9_spill] sm:$0xff] %v9221_v52  ;;  %v2575_v56 = vld [vmem:[%s10446_s5 + $0x50] sm:$0xff]  ;;  %7234 = vmatprep.subr.bf16.mxu1 %v9221_v52 }
 0x230   :  { %6659 = vmatprep.mubr.f32.mxu0 %v8674_v61  ;;  %v2710_v61 = vand.u32 4294901760, %v2576_v12  ;;  %7236 = vmatpush3.bf16.msra.mxu1 %v9221_v52 }
 0x232   :  { %v9276_v60 = vsub.f32 %v2576_v12, %v2710_v61 }
 0x233   :  { %6660 = vmatmul.mubr.f32.gmra.mrb[12].mxu0 %v8672_v37  ;;  %v2707_v37 = vand.u32 4294901760, %v2575_v56 }
 0x234   :  { %6662 = vmatprep.mubr.f32.mxu0 %v8700_v58  ;;  %v10568_v57 = vand.u32 4294901760, %v9276_v60 }
 0x235   :  { %v9231_v58 = vpack.c.bf16 %v2710_v61, %v2707_v37  ;;  %v9274_v53 = vsub.f32 %v2575_v56, %v2707_v37 }
 0x236   :  { %v3156_v46 = vsub.f32 %v9276_v60, %v10568_v57 }
 0x237   :  { %6663 = vmatmul.mubr.f32.gmra.mrb[14].mxu0 %v10856_v17  ;;  %10875 = vst [vmem:[#allocation8_spill] sm:$0xff] %v9231_v58  ;;  %7238 = vmatprep.subr.bf16.mxu1 %v9231_v58  ;;  %v9280_v17 = vsub.f32 %v2578_v3, %v2716_v9 }
 0x238   :  { %6665 = vmatprep.mubr.f32.mxu0 %v10857_v33  ;;  %7240 = vmatpush3.bf16.msra.mxu1 %v9231_v58  ;;  %v9284_v33 = vpack.c.bf16 %v9253_v16, %v9248_v27 }
 0x239   :  { %7242 = vmatprep.subr.bf16.mxu1 %v9241_v36  ;;  %v10566_v56 = vand.u32 4294901760, %v9280_v17 }
 0x23b   :  { %6666 = vmatmul.mubr.f32.gmra.mrb[16].mxu0 %v10858_v35  ;;  %v9289_v35 = vsub.f32 %v9089_v0, %v2683_v42 }
 0x23c   :  { %6668 = vmatprep.mubr.f32.mxu0 %v10859_v24  ;;  %7244 = vmatpush3.bf16.msra.mxu1 %v9241_v36  ;;  %v9294_v24 = vsub.f32 %v9097_v49, %v2686_v13  ;;  %v10573_v49 = vand.u32 4294901760, %v9266_v32  ;;  %v10572_v13 = vand.u32 4294901760, %v9268_v43 }
 0x23d   :  { %7246 = vmatprep.subr.bf16.mxu1 %v9263_v62 }
 0x23e   :  { %v10578_v0 = vand.u32 4294901760, %v9294_v24 }
 0x23f   :  { %6669 = vmatmul.mubr.f32.gmra.mrb[18].mxu0 %v10860_v1  ;;  %v9299_v1 = vsub.f32 %v9103_v19, %v2689_v41 }
 0x240   :  { %6671 = vmatprep.mubr.f32.mxu0 %v10861_v45  ;;  %v9304_v45 = vsub.f32 %v9108_v44, %v2692_v2  ;;  %v3100_v44 = vsub.f32 %v9294_v24, %v10578_v0 }
 0x241   :  { %v10575_v42 = vand.u32 4294901760, %v9299_v1 }
 0x243   :  { %6672 = vmatmul.mubr.f32.gmra.mrb[20].mxu0 %v10862_v51  ;;  %v10580_v51 = vand.u32 4294901760, %v9289_v35  ;;  %v3107_v41 = vsub.f32 %v9299_v1, %v10575_v42 }
 0x244   :  { %6674 = vmatprep.mubr.f32.mxu0 %v10863_v5  ;;  %v10574_v5 = vand.u32 4294901760, %v9304_v45 }
 0x245   :  { %v3093_v19 = vsub.f32 %v9289_v35, %v10580_v51  ;;  %v3108_v18 = vand.u32 4294901760, %v3107_v41 }
 0x246   :  { %v3114_v2 = vsub.f32 %v9304_v45, %v10574_v5 }
 0x247   :  { %6675 = vmatmul.mubr.f32.gmra.mrb[22].mxu0 %v10864_v23  ;;  %v3121_v23 = vsub.f32 %v9266_v32, %v10573_v49 }
 0x248   :  { %6677 = vmatprep.mubr.f32.mxu0 %v10865_v11  ;;  %v3128_v11 = vsub.f32 %v9268_v43, %v10572_v13  ;;  %v3115_v26 = vand.u32 4294901760, %v3114_v2 }
 0x249   :  { %v3122_v38 = vand.u32 4294901760, %v3121_v23  ;;  %v3170_v23 = vsub.f32 %v9280_v17, %v10566_v56 }
 0x24a   :  { %v3129_v31 = vand.u32 4294901760, %v3128_v11  ;;  %v9354_v34 = vpack.c.bf16 %v3115_v26, %v3108_v18 }
 0x24b   :  { %6678 = vmatmul.mubr.f32.gmra.mrb[24].mxu0 %v10866_v8  ;;  %v9333_v8 = vld [vmem:[%s10445_s4] ss:$0 sm:$0xff]  ;;  %v3171_v14 = vand.u32 4294901760, %v3170_v23 }
 0x24c   :  { %6680 = vmatprep.mubr.f32.mxu0 %v10867_v21  ;;  %v10571_v21 = vand.u32 4294901760, %v9270_v20  ;;  %v9364_v2 = vpack.c.bf16 %v3129_v31, %v3122_v38 }
 0x24e   :  { %v3135_v37 = vsub.f32 %v9270_v20, %v10571_v21 }
 0x24f   :  { %6681 = vmatmul.mubr.f32.gmra.mrb[26].mxu0 %v10868_v50  ;;  %v3094_v50 = vand.u32 4294901760, %v3093_v19 }
 0x250   :  { %6683 = vmatprep.mubr.f32.mxu0 %v10869_v39  ;;  %v3101_v39 = vand.u32 4294901760, %v3100_v44 }
 0x252   :  { %v9346_v48 = vpack.c.bf16 %v3101_v39, %v3094_v50 }
 0x253   :  { %6684 = vmatmul.mubr.f32.gmra.mrb[28].mxu0 %v10870_v29  ;;  %v10570_v29 = vand.u32 4294901760, %v9272_v54 }
 0x254   :  { %6686 = vmatprep.mubr.f32.mxu0 %v10871_v22  ;;  %v10569_v22 = vand.u32 4294901760, %v9274_v53 }
 0x255   :  { %v3142_v3 = vsub.f32 %v9272_v54, %v10570_v29 }
 0x256   :  { %v3149_v28 = vsub.f32 %v9274_v53, %v10569_v22 }
 0x257   :  { %6687 = vmatmul.mubr.f32.gmra.mrb[30].mxu0 %v10872_v7 }
 0x2ee   :  { %v6643_v7 = vpop.f32.mrb[0].mxu0 }
 0x2ef   :  { %v7577_v10 = vadd.f32 %v6643_v7, %v9333_v8  ;;  %v2343_v59 = vpop.f32.mrb[1].mxu0  ;;  %v3136_v7 = vand.u32 4294901760, %v3135_v37 }
 0x2f0   :  { %v7578_v12 = vadd.f32 %v9333_v8, %v2343_v59  ;;  %v3150_v59 = vand.u32 4294901760, %v3149_v28 }
 0x2f1   :  { %v2534_v61 = vmax.f32 %v7577_v10, 0.0  ;;  %v3143_v10 = vand.u32 4294901760, %v3142_v3 }
 0x2f2   :  { %v2533_v9 = vmax.f32 %v7578_v12, 0.0  ;;  %v6646_v6 = vpop.f32.mrb[2].mxu0 }
 0x2f3   :  { %v2584_v19 = vsel %vm2579_vm5, %v2534_v61, 0  ;;  %v7579_v44 = vadd.f32 %v6646_v6, %v9333_v8  ;;  %v2355_v41 = vpop.f32.mrb[3].mxu0  ;;  %v3157_v61 = vand.u32 4294901760, %v3156_v46  ;;  %v3164_v6 = vand.u32 4294901760, %v3163_v63 }
 0x2f4   :  { %v9369_v11 = vand.u32 4294901760, %v2584_v19  ;;  %v2581_v50 = vsel %vm2579_vm5, %v2533_v9, 0  ;;  %v7580_v39 = vadd.f32 %v9333_v8, %v2355_v41 }
 0x2f5   :  { %v9373_v18 = vand.u32 4294901760, %v2581_v50  ;;  %v2536_v26 = vmax.f32 %v7579_v44, 0.0 }
 0x2f6   :  { %v9376_v12 = vsub.f32 %v2584_v19, %v9369_v11  ;;  %v2535_v38 = vmax.f32 %v7580_v39, 0.0  ;;  %v6649_v31 = vpop.f32.mrb[4].mxu0 }
 0x2f7   :  { %v9379_v56 = vsub.f32 %v2581_v50, %v9373_v18  ;;  %v2590_v9 = vsel %vm2579_vm5, %v2536_v26, 0  ;;  %v7581_v41 = vadd.f32 %v6649_v31, %v9333_v8  ;;  %v2367_v37 = vpop.f32.mrb[5].mxu0  ;;  %v9391_v50 = vpack.c.bf16 %v3143_v10, %v3136_v7 }
 0x2f8   :  { %10879 = vst [vmem:[#allocation13_spill] sm:$0xff] %v9376_v12  ;;  %v9383_v57 = vand.u32 4294901760, %v2590_v9  ;;  %v2587_v3 = vsel %vm2579_vm5, %v2535_v38, 0  ;;  %v7582_v28 = vadd.f32 %v9333_v8, %v2367_v37  ;;  %v10577_v19 = vand.u32 4294901760, %v9376_v12 }
 0x2f9   :  { %10880 = vst [vmem:[#allocation18_spill] sm:$0xff] %v9379_v56  ;;  %v9388_v44 = vand.u32 4294901760, %v2587_v3  ;;  %v2538_v46 = vmax.f32 %v7581_v41, 0.0  ;;  %v10582_v63 = vand.u32 4294901760, %v9379_v56  ;;  %v9399_v31 = vpack.c.bf16 %v3157_v61, %v3150_v59 }
 0x2fa   :  { %v9394_v39 = vsub.f32 %v2590_v9, %v9383_v57  ;;  %v2537_v26 = vmax.f32 %v7582_v28, 0.0  ;;  %v6652_v23 = vpop.f32.mrb[6].mxu0  ;;  %v2768_v38 = vsub.f32 %v9376_v12, %v10577_v19  ;;  %v9413_v59 = vpack.c.bf16 %v3171_v14, %v3164_v6 }
 0x2fb   :  { %v9402_v37 = vsub.f32 %v2587_v3, %v9388_v44  ;;  %v2596_v41 = vsel %vm2579_vm5, %v2538_v46, 0  ;;  %v7583_v22 = vadd.f32 %v6652_v23, %v9333_v8  ;;  %v2379_v7 = vpop.f32.mrb[7].mxu0  ;;  %v2758_v10 = vsub.f32 %v9379_v56, %v10582_v63 }
 0x2fc   :  { %10881 = vst [vmem:[#allocation17_spill] sm:$0xff] %v9394_v39  ;;  %v9409_v9 = vand.u32 4294901760, %v2596_v41  ;;  %v2593_v28 = vsel %vm2579_vm5, %v2537_v26, 0  ;;  %v7584_v29 = vadd.f32 %v9333_v8, %v2379_v7  ;;  %v2769_v5 = vand.u32 4294901760, %v2768_v38 }
 0x2fd   :  { %10882 = vst [vmem:[#allocation22_spill] sm:$0xff] %v9402_v37  ;;  %v9415_v61 = vand.u32 4294901760, %v2593_v28  ;;  %v2540_v3 = vmax.f32 %v7583_v22, 0.0  ;;  %v2759_v21 = vand.u32 4294901760, %v2758_v10  ;;  %v10576_v46 = vand.u32 4294901760, %v9402_v37 }
 0x2fe   :  { %v9419_v23 = vsub.f32 %v2596_v41, %v9409_v9  ;;  %v2539_v13 = vmax.f32 %v7584_v29, 0.0  ;;  %v6655_v49 = vpop.f32.mrb[8].mxu0  ;;  %v10579_v42 = vand.u32 4294901760, %v9394_v39 }
 0x2ff   :  { %v9423_v26 = vsub.f32 %v2593_v28, %v9415_v61  ;;  %v2602_v14 = vsel %vm2579_vm5, %v2540_v3, 0  ;;  %v7585_v6 = vadd.f32 %v6655_v49, %v9333_v8  ;;  %v2391_v7 = vpop.f32.mrb[9].mxu0  ;;  %6717 = vmatprep.mubr.f32.mxu1 %v2759_v21  ;;  %v2778_v22 = vsub.f32 %v9402_v37, %v10576_v46 }
 0x300   :  { %10883 = vst [vmem:[#allocation21_spill] sm:$0xff] %v9419_v23  ;;  %v9430_v41 = vand.u32 4294901760, %v2602_v14  ;;  %v2599_v29 = vsel %vm2579_vm5, %v2539_v13, 0  ;;  %v7586_v38 = vadd.f32 %v9333_v8, %v2391_v7  ;;  %6718 = vmatmul.mubr.f32.vlgmr.msra.gmra.mrb[0].mxu1 %v2769_v5  ;;  %v2788_v10 = vsub.f32 %v9394_v39, %v10579_v42 }
 0x301   :  { %10884 = vst [vmem:[#allocation26_spill] sm:$0xff] %v9423_v26  ;;  %v9437_v28 = vand.u32 4294901760, %v2599_v29  ;;  %v2542_v49 = vmax.f32 %v7585_v6, 0.0  ;;  %v2779_v3 = vand.u32 4294901760, %v2778_v22  ;;  %v10581_v21 = vand.u32 4294901760, %v9423_v26  ;;  %7248 = vmatpush3.bf16.msra.mxu1 %v9263_v62 }
 0x302   :  { %10885 = vst [vmem:[#allocation25_spill] sm:$0xff] %v9430_v41  ;;  %v9442_v46 = vsub.f32 %v2602_v14, %v9430_v41  ;;  %v2541_v19 = vmax.f32 %v7586_v38, 0.0  ;;  %v6658_v13 = vpop.f32.mrb[10].mxu0  ;;  %v2789_v0 = vand.u32 4294901760, %v2788_v10  ;;  %v10584_v5 = vand.u32 4294901760, %v9419_v23  ;;  %7250 = vmatprep.subr.bf16.mxu1 %v9346_v48 }
 0x303   :  { %v9447_v7 = vsub.f32 %v2599_v29, %v9437_v28  ;;  %v2608_v6 = vsel %vm2579_vm5, %v2542_v49, 0  ;;  %v7587_v22 = vadd.f32 %v6658_v13, %v9333_v8  ;;  %v2403_v42 = vpop.f32.mrb[11].mxu0  ;;  %6720 = vmatprep.mubr.f32.mxu1 %v2779_v3  ;;  %v2798_v62 = vsub.f32 %v9423_v26, %v10581_v21 }
 0x304   :  { %10886 = vst [vmem:[#allocation30_spill] sm:$0xff] %v9442_v46  ;;  %v9454_v14 = vand.u32 4294901760, %v2608_v6  ;;  %v2605_v38 = vsel %vm2579_vm5, %v2541_v19, 0  ;;  %v7588_v10 = vadd.f32 %v9333_v8, %v2403_v42  ;;  %6721 = vmatmul.mubr.f32.gmra.mrb[2].mxu1 %v2789_v0  ;;  %v2808_v29 = vsub.f32 %v9419_v23, %v10584_v5 }
 0x305   :  { %10887 = vst [vmem:[#allocation29_spill] sm:$0xff] %v9447_v7  ;;  %v9461_v49 = vand.u32 4294901760, %v2605_v38  ;;  %v2544_v13 = vmax.f32 %v7587_v22, 0.0  ;;  %v2799_v51 = vand.u32 4294901760, %v2798_v62  ;;  %v10586_v3 = vand.u32 4294901760, %v9447_v7  ;;  %7252 = vmatpush3.bf16.msra.mxu1 %v9346_v48 }
 0x306   :  { %10888 = vst [vmem:[#allocation34_spill] sm:$0xff] %v9454_v14  ;;  %v9466_v21 = vsub.f32 %v2608_v6, %v9454_v14  ;;  %v2543_v63 = vmax.f32 %v7588_v10, 0.0  ;;  %v6661_v19 = vpop.f32.mrb[12].mxu0  ;;  %v2809_v40 = vand.u32 4294901760, %v2808_v29  ;;  %v10589_v0 = vand.u32 4294901760, %v9442_v46  ;;  %7254 = vmatprep.subr.bf16.mxu1 %v9354_v34 }
 0x307   :  { %10889 = vst [vmem:[#allocation33_spill] sm:$0xff] %v9461_v49  ;;  %v9471_v42 = vsub.f32 %v2605_v38, %v9461_v49  ;;  %v2614_v22 = vsel %vm2579_vm5, %v2544_v13, 0  ;;  %v7589_v62 = vadd.f32 %v6661_v19, %v9333_v8  ;;  %v2415_v5 = vpop.f32.mrb[13].mxu0  ;;  %6723 = vmatprep.mubr.f32.mxu1 %v2799_v51  ;;  %v2818_v48 = vsub.f32 %v9447_v7, %v10586_v3 }
 0x308   :  { %10890 = vst [vmem:[#allocation38_spill] sm:$0xff] %v9466_v21  ;;  %v9478_v6 = vand.u32 4294901760, %v2614_v22  ;;  %v2611_v10 = vsel %vm2579_vm5, %v2543_v63, 0  ;;  %v7590_v29 = vadd.f32 %v9333_v8, %v2415_v5  ;;  %6724 = vmatmul.mubr.f32.gmra.mrb[4].mxu1 %v2809_v40  ;;  %v2828_v38 = vsub.f32 %v9442_v46, %v10589_v0 }
 0x309   :  { %10891 = vst [vmem:[#allocation37_spill] sm:$0xff] %v9471_v42  ;;  %v9485_v13 = vand.u32 4294901760, %v2611_v10  ;;  %v2546_v19 = vmax.f32 %v7589_v62, 0.0  ;;  %v2819_v47 = vand.u32 4294901760, %v2818_v48  ;;  %v10592_v51 = vand.u32 4294901760, %v9471_v42  ;;  %7256 = vmatpush3.bf16.msra.mxu1 %v9354_v34 }
 0x30a   :  { %10892 = vst [vmem:[#allocation12_spill] sm:$0xff] %v9478_v6  ;;  %v9490_v3 = vsub.f32 %v2614_v22, %v9478_v6  ;;  %v2545_v16 = vmax.f32 %v7590_v29, 0.0  ;;  %v6664_v63 = vpop.f32.mrb[14].mxu0  ;;  %v2829_v27 = vand.u32 4294901760, %v2828_v38  ;;  %v10597_v40 = vand.u32 4294901760, %v9466_v21  ;;  %7258 = vmatprep.subr.bf16.mxu1 %v9364_v2 }
 0x30b   :  { %10893 = vst [vmem:[#allocation16_spill] sm:$0xff] %v9485_v13  ;;  %v9495_v5 = vsub.f32 %v2611_v10, %v9485_v13  ;;  %v2620_v62 = vsel %vm2579_vm5, %v2546_v19, 0  ;;  %v7591_v48 = vadd.f32 %v6664_v63, %v9333_v8  ;;  %v2427_v0 = vpop.f32.mrb[15].mxu0  ;;  %6726 = vmatprep.mubr.f32.mxu1 %v2819_v47  ;;  %v2838_v34 = vsub.f32 %v9471_v42, %v10592_v51 }
 0x30c   :  { %10894 = vst [vmem:[#allocation15_spill] sm:$0xff] %v9490_v3  ;;  %v9502_v22 = vand.u32 4294901760, %v2620_v62  ;;  %v2617_v29 = vsel %vm2579_vm5, %v2545_v16, 0  ;;  %v7592_v38 = vadd.f32 %v9333_v8, %v2427_v0  ;;  %6727 = vmatmul.mubr.f32.gmra.mrb[6].mxu1 %v2829_v27  ;;  %v2848_v10 = vsub.f32 %v9466_v21, %v10597_v40 }
 0x30d   :  { %10895 = vst [vmem:[#allocation20_spill] sm:$0xff] %v9495_v5  ;;  %v9509_v19 = vand.u32 4294901760, %v2617_v29  ;;  %v2548_v63 = vmax.f32 %v7591_v48, 0.0  ;;  %v2839_v36 = vand.u32 4294901760, %v2838_v34  ;;  %v10600_v47 = vand.u32 4294901760, %v9495_v5  ;;  %7260 = vmatpush3.bf16.msra.mxu1 %v9364_v2 }
 0x30e   :  { %10896 = vst [vmem:[#allocation19_spill] sm:$0xff] %v9502_v22  ;;  %v9514_v51 = vsub.f32 %v2620_v62, %v9502_v22  ;;  %v2547_v58 = vmax.f32 %v7592_v38, 0.0  ;;  %v6667_v16 = vpop.f32.mrb[16].mxu0  ;;  %v2849_v52 = vand.u32 4294901760, %v2848_v10  ;;  %v10605_v27 = vand.u32 4294901760, %v9490_v3  ;;  %7262 = vmatprep.subr.bf16.mxu1 %v9391_v50 }
 0x30f   :  { %10897 = vst [vmem:[#allocation24_spill] sm:$0xff] %v9509_v19  ;;  %v9519_v0 = vsub.f32 %v2617_v29, %v9509_v19  ;;  %v2626_v48 = vsel %vm2579_vm5, %v2548_v63, 0  ;;  %v7593_v34 = vadd.f32 %v6667_v16, %v9333_v8  ;;  %v2439_v40 = vpop.f32.mrb[17].mxu0  ;;  %6729 = vmatprep.mubr.f32.mxu1 %v2839_v36  ;;  %v2858_v2 = vsub.f32 %v9495_v5, %v10600_v47 }
 0x310   :  { %10898 = vst [vmem:[#allocation23_spill] sm:$0xff] %v9514_v51  ;;  %v9526_v62 = vand.u32 4294901760, %v2626_v48  ;;  %v2623_v38 = vsel %vm2579_vm5, %v2547_v58, 0  ;;  %v7594_v10 = vadd.f32 %v9333_v8, %v2439_v40  ;;  %6730 = vmatmul.mubr.f32.gmra.mrb[8].mxu1 %v2849_v52  ;;  %v2868_v29 = vsub.f32 %v9490_v3, %v10605_v27 }
 0x311   :  { %10899 = vst [vmem:[#allocation28_spill] sm:$0xff] %v9519_v0  ;;  %v9533_v63 = vand.u32 4294901760, %v2623_v38  ;;  %v2550_v16 = vmax.f32 %v7593_v34, 0.0  ;;  %v2859_v21 = vand.u32 4294901760, %v2858_v2  ;;  %v10608_v36 = vand.u32 4294901760, %v9519_v0  ;;  %7264 = vmatpush3.bf16.msra.mxu1 %v9391_v50 }
 0x312   :  { %10900 = vst [vmem:[#allocation27_spill] sm:$0xff] %v9526_v62  ;;  %v9538_v47 = vsub.f32 %v2626_v48, %v9526_v62  ;;  %v2549_v5 = vmax.f32 %v7594_v10, 0.0  ;;  %v6670_v58 = vpop.f32.mrb[18].mxu0  ;;  %v2869_v42 = vand.u32 4294901760, %v2868_v29  ;;  %v10613_v52 = vand.u32 4294901760, %v9514_v51  ;;  %7266 = vmatprep.subr.bf16.mxu1 %v9399_v31 }
 0x313   :  { %10901 = vst [vmem:[#allocation32_spill] sm:$0xff] %v9533_v63  ;;  %v9543_v40 = vsub.f32 %v2623_v38, %v9533_v63  ;;  %v2632_v34 = vsel %vm2579_vm5, %v2550_v16, 0  ;;  %v7595_v2 = vadd.f32 %v6670_v58, %v9333_v8  ;;  %v2451_v27 = vpop.f32.mrb[19].mxu0  ;;  %6732 = vmatprep.mubr.f32.mxu1 %v2859_v21  ;;  %v2878_v50 = vsub.f32 %v9519_v0, %v10608_v36 }
 0x314   :  { %10902 = vst [vmem:[#allocation31_spill] sm:$0xff] %v9538_v47  ;;  %v9550_v48 = vand.u32 4294901760, %v2632_v34  ;;  %v2629_v10 = vsel %vm2579_vm5, %v2549_v5, 0  ;;  %v7596_v29 = vadd.f32 %v9333_v8, %v2451_v27  ;;  %6733 = vmatmul.mubr.f32.gmra.mrb[10].mxu1 %v2869_v42  ;;  %v2888_v38 = vsub.f32 %v9514_v51, %v10613_v52 }
 0x315   :  { %10903 = vst [vmem:[#allocation36_spill] sm:$0xff] %v9543_v40  ;;  %v9557_v16 = vand.u32 4294901760, %v2629_v10  ;;  %v2552_v58 = vmax.f32 %v7595_v2, 0.0  ;;  %v2879_v3 = vand.u32 4294901760, %v2878_v50  ;;  %v10616_v21 = vand.u32 4294901760, %v9543_v40  ;;  %7268 = vmatpush3.bf16.msra.mxu1 %v9399_v31 }
 0x316   :  { %10904 = vst [vmem:[#allocation35_spill] sm:$0xff] %v9550_v48  ;;  %v9562_v36 = vsub.f32 %v2632_v34, %v9550_v48  ;;  %v2551_v0 = vmax.f32 %v7596_v29, 0.0  ;;  %v6673_v5 = vpop.f32.mrb[20].mxu0  ;;  %v2889_v46 = vand.u32 4294901760, %v2888_v38  ;;  %v10621_v42 = vand.u32 4294901760, %v9538_v47  ;;  %7270 = vmatprep.subr.bf16.mxu1 %v9413_v59 }
 0x317   :  { %10905 = vst [vmem:[#allocation40_spill] sm:$0xff] %v9557_v16  ;;  %v9567_v27 = vsub.f32 %v2629_v10, %v9557_v16  ;;  %v2638_v2 = vsel %vm2579_vm5, %v2552_v58, 0  ;;  %v7597_v50 = vadd.f32 %v6673_v5, %v9333_v8  ;;  %v2463_v52 = vpop.f32.mrb[21].mxu0  ;;  %6735 = vmatprep.mubr.f32.mxu1 %v2879_v3  ;;  %v2898_v31 = vsub.f32 %v9543_v40, %v10616_v21 }
 0x318   :  { %10906 = vst [vmem:[#allocation39_spill] sm:$0xff] %v9562_v36  ;;  %v9574_v34 = vand.u32 4294901760, %v2638_v2  ;;  %v2635_v29 = vsel %vm2579_vm5, %v2551_v0, 0  ;;  %v7598_v38 = vadd.f32 %v9333_v8, %v2463_v52  ;;  %6736 = vmatmul.mubr.f32.gmra.mrb[12].mxu1 %v2889_v46  ;;  %v2908_v10 = vsub.f32 %v9538_v47, %v10621_v42 }
 0x319   :  { %10907 = vst [vmem:[#allocation42_spill] sm:$0xff] %v9567_v27  ;;  %v9581_v58 = vand.u32 4294901760, %v2635_v29  ;;  %v2554_v5 = vmax.f32 %v7597_v50, 0.0  ;;  %v2899_v51 = vand.u32 4294901760, %v2898_v31  ;;  %v10626_v3 = vand.u32 4294901760, %v9567_v27  ;;  %7272 = vmatpush3.bf16.msra.mxu1 %v9413_v59 }
 0x31a   :  { %10908 = vst [vmem:[#allocation41_spill] sm:$0xff] %v9574_v34  ;;  %v9586_v21 = vsub.f32 %v2638_v2, %v9574_v34  ;;  %v2553_v40 = vmax.f32 %v7598_v38, 0.0  ;;  %v6676_v0 = vpop.f32.mrb[22].mxu0  ;;  %v2909_v15 = vand.u32 4294901760, %v2908_v10  ;;  %v10631_v46 = vand.u32 4294901760, %v9562_v36  ;;  %7274 = vmatprep.subr.bf16.mxu1 %v9284_v33 }
 0x31b   :  { %10909 = vst [vmem:[#allocation43_spill] sm:$0xff] %v9581_v58  ;;  %v9591_v52 = vsub.f32 %v2635_v29, %v9581_v58  ;;  %v2644_v50 = vsel %vm2579_vm5, %v2554_v5, 0  ;;  %v7599_v31 = vadd.f32 %v6676_v0, %v9333_v8  ;;  %v2475_v42 = vpop.f32.mrb[23].mxu0  ;;  %6738 = vmatprep.mubr.f32.mxu1 %v2899_v51  ;;  %v2918_v59 = vsub.f32 %v9567_v27, %v10626_v3 }
 0x31c   :  { %10910 = vst [vmem:[#allocation44_spill] sm:$0xff] %v9586_v21  ;;  %v9598_v2 = vand.u32 4294901760, %v2644_v50  ;;  %v2641_v38 = vsel %vm2579_vm5, %v2553_v40, 0  ;;  %v7600_v10 = vadd.f32 %v9333_v8, %v2475_v42  ;;  %6739 = vmatmul.mubr.f32.gmra.mrb[14].mxu1 %v2909_v15  ;;  %v2928_v29 = vsub.f32 %v9562_v36, %v10631_v46 }
 0x31d   :  { %10911 = vst [vmem:[#allocation45_spill] sm:$0xff] %v9591_v52  ;;  %v9605_v5 = vand.u32 4294901760, %v2641_v38  ;;  %v2556_v0 = vmax.f32 %v7599_v31, 0.0  ;;  %v2919_v47 = vand.u32 4294901760, %v2918_v59  ;;  %v10636_v51 = vand.u32 4294901760, %v9591_v52 }
 0x31e   :  { %10912 = vst [vmem:[#allocation46_spill] sm:$0xff] %v9598_v2  ;;  %v9609_v7 = vsub.f32 %v2644_v50, %v9598_v2  ;;  %v2555_v3 = vmax.f32 %v7600_v10, 0.0  ;;  %v6679_v27 = vpop.f32.mrb[24].mxu0  ;;  %v2929_v23 = vand.u32 4294901760, %v2928_v29  ;;  %v10641_v40 = vand.u32 4294901760, %v9586_v21 }
 0x31f   :  { %10913 = vst [vmem:[#allocation47_spill] sm:$0xff] %v9605_v5  ;;  %v9613_v15 = vsub.f32 %v2641_v38, %v9605_v5  ;;  %v2650_v42 = vsel %vm2579_vm5, %v2556_v0, 0  ;;  %v7601_v46 = vadd.f32 %v6679_v27, %v9333_v8  ;;  %v2487_v36 = vpop.f32.mrb[25].mxu0  ;;  %6741 = vmatprep.mubr.f32.mxu1 %v2919_v47  ;;  %v2938_v31 = vsub.f32 %v9591_v52, %v10636_v51 }
 0x320   :  { %10914 = vst [vmem:[#allocation48_spill] sm:$0xff] %v9609_v7  ;;  %v9620_v50 = vand.u32 4294901760, %v2650_v42  ;;  %v2647_v59 = vsel %vm2579_vm5, %v2555_v3, 0  ;;  %v7602_v10 = vadd.f32 %v9333_v8, %v2487_v36  ;;  %6742 = vmatmul.mubr.f32.gmra.mrb[16].mxu1 %v2929_v23  ;;  %v2948_v38 = vsub.f32 %v9586_v21, %v10641_v40 }
 0x321   :  { %10915 = vst [vmem:[#allocation49_spill] sm:$0xff] %v9613_v15  ;;  %v9627_v29 = vand.u32 4294901760, %v2647_v59  ;;  %v2558_v27 = vmax.f32 %v7601_v46, 0.0  ;;  %v2939_v0 = vand.u32 4294901760, %v2938_v31  ;;  %v10646_v47 = vand.u32 4294901760, %v9613_v15 }
 0x322   :  { %10916 = vst [vmem:[#allocation50_spill] sm:$0xff] %v9620_v50  ;;  %v9631_v25 = vsub.f32 %v2650_v42, %v9620_v50  ;;  %v2557_v51 = vmax.f32 %v7602_v10, 0.0  ;;  %v6682_v52 = vpop.f32.mrb[26].mxu0  ;;  %v2949_v26 = vand.u32 4294901760, %v2948_v38  ;;  %v10651_v3 = vand.u32 4294901760, %v9609_v7 }
 0x323   :  { %10917 = vst [vmem:[#allocation51_spill] sm:$0xff] %v9627_v29  ;;  %v9635_v23 = vsub.f32 %v2647_v59, %v9627_v29  ;;  %v2656_v36 = vsel %vm2579_vm5, %v2558_v27, 0  ;;  %v7603_v40 = vadd.f32 %v6682_v52, %v9333_v8  ;;  %v2499_v21 = vpop.f32.mrb[27].mxu0  ;;  %6744 = vmatprep.mubr.f32.mxu1 %v2939_v0  ;;  %v2958_v46 = vsub.f32 %v9613_v15, %v10646_v47 }
 0x324   :  { %10918 = vst [vmem:[#allocation52_spill] sm:$0xff] %v9631_v25  ;;  %v9642_v42 = vand.u32 4294901760, %v2656_v36  ;;  %v2653_v31 = vsel %vm2579_vm5, %v2557_v51, 0  ;;  %v7604_v10 = vadd.f32 %v9333_v8, %v2499_v21  ;;  %6745 = vmatmul.mubr.f32.gmra.mrb[18].mxu1 %v2949_v26  ;;  %v2968_v59 = vsub.f32 %v9609_v7, %v10651_v3 }
 0x325   :  { %10919 = vst [vmem:[#allocation53_spill] sm:$0xff] %v9635_v23  ;;  %v9649_v38 = vand.u32 4294901760, %v2653_v31  ;;  %v2560_v52 = vmax.f32 %v7603_v40, 0.0  ;;  %v2959_v27 = vand.u32 4294901760, %v2958_v46  ;;  %v10656_v0 = vand.u32 4294901760, %v9635_v23 }
 0x326   :  { %10920 = vst [vmem:[#allocation54_spill] sm:$0xff] %v9642_v42  ;;  %v9653_v39 = vsub.f32 %v2656_v36, %v9642_v42  ;;  %v2559_v47 = vmax.f32 %v7604_v10, 0.0  ;;  %v6685_v15 = vpop.f32.mrb[28].mxu0  ;;  %v2969_v30 = vand.u32 4294901760, %v2968_v59  ;;  %v10661_v51 = vand.u32 4294901760, %v9631_v25 }
 0x327   :  { %10921 = vst [vmem:[#allocation55_spill] sm:$0xff] %v9649_v38  ;;  %v9657_v26 = vsub.f32 %v2653_v31, %v9649_v38  ;;  %v2662_v21 = vsel %vm2579_vm5, %v2560_v52, 0  ;;  %v7605_v3 = vadd.f32 %v6685_v15, %v9333_v8  ;;  %v2511_v7 = vpop.f32.mrb[29].mxu0  ;;  %6747 = vmatprep.mubr.f32.mxu1 %v2959_v27  ;;  %v2978_v40 = vsub.f32 %v9635_v23, %v10656_v0 }
 0x328   :  { %v9664_v36 = vand.u32 4294901760, %v2662_v21  ;;  %v2659_v46 = vsel %vm2579_vm5, %v2559_v47, 0  ;;  %v7606_v10 = vadd.f32 %v9333_v8, %v2511_v7  ;;  %6748 = vmatmul.mubr.f32.gmra.mrb[20].mxu1 %v2969_v30  ;;  %v2988_v31 = vsub.f32 %v9631_v25, %v10661_v51 }
 0x329   :  { %10922 = vst [vmem:[#allocation56_spill] sm:$0xff] %v9657_v26  ;;  %v9671_v59 = vand.u32 4294901760, %v2659_v46  ;;  %v2562_v15 = vmax.f32 %v7605_v3, 0.0  ;;  %v2979_v52 = vand.u32 4294901760, %v2978_v40  ;;  %v10666_v27 = vand.u32 4294901760, %v9657_v26 }
 0x32a   :  { %10923 = vst [vmem:[#allocation57_spill] sm:$0xff] %v9664_v36  ;;  %v9675_v37 = vsub.f32 %v2662_v21, %v9664_v36  ;;  %v2561_v0 = vmax.f32 %v7606_v10, 0.0  ;;  %v6688_v23 = vpop.f32.mrb[30].mxu0  ;;  %v2989_v12 = vand.u32 4294901760, %v2988_v31  ;;  %v10671_v47 = vand.u32 4294901760, %v9653_v39 }
 0x32b   :  { %10924 = vst [vmem:[#allocation58_spill] sm:$0xff] %v9671_v59  ;;  %v9679_v30 = vsub.f32 %v2659_v46, %v9671_v59  ;;  %v2668_v7 = vsel %vm2579_vm5, %v2562_v15, 0  ;;  %v7607_v51 = vadd.f32 %v6688_v23, %v9333_v8  ;;  %v2523_v25 = vpop.f32.mrb[31].mxu0  ;;  %6750 = vmatprep.mubr.f32.mxu1 %v2979_v52  ;;  %v2998_v3 = vsub.f32 %v9657_v26, %v10666_v27 }
 0x32c   :  { %10925 = vst [vmem:[#allocation59_spill] sm:$0xff] %v9675_v37  ;;  %v9686_v21 = vand.u32 4294901760, %v2668_v7  ;;  %v2665_v40 = vsel %vm2579_vm5, %v2561_v0, 0  ;;  %v7608_v10 = vadd.f32 %v9333_v8, %v2523_v25  ;;  %6751 = vmatmul.mubr.f32.gmra.mrb[22].mxu1 %v2989_v12  ;;  %v3008_v46 = vsub.f32 %v9653_v39, %v10671_v47 }
 0x32d   :  { %v9693_v31 = vand.u32 4294901760, %v2665_v40  ;;  %v2564_v23 = vmax.f32 %v7607_v51, 0.0  ;;  %v2999_v15 = vand.u32 4294901760, %v2998_v3  ;;  %v10669_v52 = vand.u32 4294901760, %v9679_v30 }
 0x32e   :  { %10926 = vst [vmem:[#allocation60_spill] sm:$0xff] %v9686_v21  ;;  %v9697_v56 = vsub.f32 %v2668_v7, %v9686_v21  ;;  %v2563_v27 = vmax.f32 %v7608_v10, 0.0  ;;  %v3009_v26 = vand.u32 4294901760, %v3008_v46  ;;  %v10670_v0 = vand.u32 4294901760, %v9675_v37 }
 0x32f   :  { %10927 = vst [vmem:[#allocation61_spill] sm:$0xff] %v9693_v31  ;;  %v9701_v25 = vsub.f32 %v2665_v40, %v9693_v31  ;;  %v2674_v8 = vsel %vm2579_vm5, %v2564_v23, 0  ;;  %6753 = vmatprep.mubr.f32.mxu1 %v2999_v15  ;;  %v3018_v12 = vsub.f32 %v9679_v30, %v10669_v52 }
 0x330   :  { %v9707_v51 = vand.u32 4294901760, %v2674_v8  ;;  %v2671_v3 = vsel %vm2579_vm5, %v2563_v27, 0  ;;  %6754 = vmatmul.mubr.f32.gmra.mrb[24].mxu1 %v3009_v26  ;;  %v3028_v7 = vsub.f32 %v9675_v37, %v10670_v0  ;;  %v10674_v10 = vand.u32 4294901760, %v9697_v56 }
 0x331   :  { %v9714_v40 = vand.u32 4294901760, %v2671_v3  ;;  %v3019_v46 = vand.u32 4294901760, %v3018_v12  ;;  %v10677_v23 = vand.u32 4294901760, %v9701_v25 }
 0x332   :  { %10928 = vst [vmem:[#allocation62_spill] sm:$0xff] %v9707_v51  ;;  %v9718_v15 = vsub.f32 %v2674_v8, %v9707_v51  ;;  %v3029_v52 = vand.u32 4294901760, %v3028_v7  ;;  %v3048_v27 = vsub.f32 %v9697_v56, %v10674_v10 }
 0x333   :  { %10929 = vst [vmem:[#allocation63_spill] sm:$0xff] %v9714_v40  ;;  %v9724_v26 = vsub.f32 %v2671_v3, %v9714_v40  ;;  %6756 = vmatprep.mubr.f32.mxu1 %v3019_v46  ;;  %v3038_v0 = vsub.f32 %v9701_v25, %v10677_v23  ;;  %v10942_v23 = vld [vmem:[#allocation9_spill] sm:$0xff] }
 0x334   :  { %6757 = vmatmul.mubr.f32.gmra.mrb[26].mxu1 %v3029_v52  ;;  %v10675_v12 = vand.u32 4294901760, %v9718_v15  ;;  %v3049_v37 = vand.u32 4294901760, %v3048_v27  ;;  %v7277_v52 = vpack.c.bf16 %v9294_v24, %v9289_v35  ;;  %v10930_v27 = vld [vmem:[#allocation18_spill] sm:$0xff] }
 0x335   :  { %v3039_v47 = vand.u32 4294901760, %v3038_v0  ;;  %v10676_v8 = vand.u32 4294901760, %v9724_v26  ;;  %v7293_v0 = vpack.c.bf16 %v9276_v60, %v9274_v53 }
 0x336   :  { %v3068_v7 = vsub.f32 %v9718_v15, %v10675_v12  ;;  %v10940_v12 = vld [vmem:[#allocation30_spill] sm:$0xff] }
 0x337   :  { %6759 = vmatprep.mubr.f32.mxu1 %v3039_v47  ;;  %v3058_v3 = vsub.f32 %v9724_v26, %v10676_v8  ;;  %v7281_v47 = vpack.c.bf16 %v9304_v45, %v9299_v1  ;;  %v10941_v8 = vld [vmem:[#allocation37_spill] sm:$0xff] }
 0x338   :  { %6760 = vmatmul.mubr.f32.gmra.mrb[28].mxu1 %v3049_v37  ;;  %v3069_v10 = vand.u32 4294901760, %v3068_v7  ;;  %v7285_v37 = vpack.c.bf16 %v9268_v43, %v9266_v32  ;;  %v10931_v7 = vld [vmem:[#allocation13_spill] sm:$0xff] }
 0x339   :  { %v3059_v46 = vand.u32 4294901760, %v3058_v3  ;;  %v10932_v3 = vld [vmem:[#allocation22_spill] sm:$0xff] }
 0x33b   :  { %6762 = vmatprep.mubr.f32.mxu1 %v3059_v46  ;;  %v10933_v46 = vld [vmem:[#allocation5_spill] sm:$0xff] }
 0x33c   :  { %6763 = vmatmul.mubr.f32.gmra.mrb[30].mxu1 %v3069_v10  ;;  %v7297_v10 = vpack.c.bf16 %v9280_v17, %v9278_v55 }
 0x33d   :  { %6793 = vmatprep.mubr.f32.mxu1 %v9373_v18 }
 0x340   :  { %6794 = vmatmul.mubr.f32.vlgmr.msra.gmra.mrb[0].mxu1 %v9369_v11 }
 0x341   :  { %6796 = vmatprep.mubr.f32.mxu1 %v9388_v44  ;;  %7276 = vmatpush3.bf16.msra.mxu1 %v9284_v33  ;;  %v7289_v33 = vpack.c.bf16 %v9272_v54, %v9270_v20 }
 0x342   :  { %7278 = vmatprep.subr.bf16.mxu1 %v7277_v52 }
 0x344   :  { %6797 = vmatmul.mubr.f32.gmra.mrb[2].mxu1 %v9383_v57 }
 0x345   :  { %6799 = vmatprep.mubr.f32.mxu1 %v9415_v61  ;;  %7280 = vmatpush3.bf16.msra.mxu1 %v7277_v52  ;;  %v10934_v52 = vld [vmem:[#allocation17_spill] sm:$0xff] }
 0x346   :  { %7282 = vmatprep.subr.bf16.mxu1 %v7281_v47 }
 0x348   :  { %6800 = vmatmul.mubr.f32.gmra.mrb[4].mxu1 %v9409_v9 }
 0x349   :  { %6802 = vmatprep.mubr.f32.mxu1 %v9437_v28  ;;  %7284 = vmatpush3.bf16.msra.mxu1 %v7281_v47  ;;  %v10935_v47 = vld [vmem:[#allocation26_spill] sm:$0xff] }
 0x34a   :  { %7286 = vmatprep.subr.bf16.mxu1 %v7285_v37 }
 0x34c   :  { %6803 = vmatmul.mubr.f32.gmra.mrb[6].mxu1 %v9430_v41  ;;  %v10972_v41 = vand.u32 4294901760, %v9304_v45  ;;  %v10979_v45 = vand.u32 4294901760, %v9270_v20 }
 0x34d   :  { %6805 = vmatprep.mubr.f32.mxu1 %v9461_v49  ;;  %7288 = vmatpush3.bf16.msra.mxu1 %v7285_v37  ;;  %v10936_v37 = vld [vmem:[#allocation7_spill] sm:$0xff]  ;;  %v10971_v49 = vand.u32 4294901760, %v9299_v1 }
 0x34e   :  { %7290 = vmatprep.subr.bf16.mxu1 %v7289_v33 }
 0x350   :  { %6806 = vmatmul.mubr.f32.gmra.mrb[8].mxu1 %v9454_v14  ;;  %v10969_v14 = vand.u32 4294901760, %v10931_v7 }
 0x351   :  { %6808 = vmatprep.mubr.f32.mxu1 %v9485_v13  ;;  %7292 = vmatpush3.bf16.msra.mxu1 %v7289_v33  ;;  %v10937_v33 = vld [vmem:[#allocation21_spill] sm:$0xff] }
 0x352   :  { %7294 = vmatprep.subr.bf16.mxu1 %v7293_v0 }
 0x354   :  { %6809 = vmatmul.mubr.f32.gmra.mrb[10].mxu1 %v9478_v6  ;;  %v10967_v6 = vand.u32 4294901760, %v9289_v35  ;;  %v10974_v35 = vand.u32 4294901760, %v10935_v47 }
 0x355   :  { %6811 = vmatprep.mubr.f32.mxu1 %v9509_v19  ;;  %7296 = vmatpush3.bf16.msra.mxu1 %v7293_v0  ;;  %v10938_v0 = vld [vmem:[#allocation29_spill] sm:$0xff]  ;;  %v10966_v19 = vand.u32 4294901760, %v10930_v27 }
 0x356   :  { %7298 = vmatprep.subr.bf16.mxu1 %v7297_v10  ;;  %v10978_v1 = vand.u32 4294901760, %v10938_v0 }
 0x358   :  { %6812 = vmatmul.mubr.f32.gmra.mrb[12].mxu1 %v9502_v22  ;;  %v10964_v22 = vld [vmem:[#allocation56_spill] sm:$0xff] }
 0x359   :  { %6814 = vmatprep.mubr.f32.mxu1 %v9533_v63  ;;  %7300 = vmatpush3.bf16.msra.mxu1 %v7297_v10  ;;  %v10939_v10 = vld [vmem:[#allocation6_spill] sm:$0xff]  ;;  %v10959_v63 = vld [vmem:[#allocation44_spill] sm:$0xff] }
 0x35a   :  { %7302 = vmatprep.subr.bf16.mxu1 %v9115_v4 }
 0x35c   :  { %6815 = vmatmul.mubr.f32.gmra.mrb[14].mxu1 %v9526_v62  ;;  %v10958_v62 = vld [vmem:[#allocation45_spill] sm:$0xff] }
 0x35d   :  { %6817 = vmatprep.mubr.f32.mxu1 %v9557_v16  ;;  %v10957_v16 = vld [vmem:[#allocation39_spill] sm:$0xff] }
 0x360   :  { %6818 = vmatmul.mubr.f32.gmra.mrb[16].mxu1 %v9550_v48  ;;  %v10956_v48 = vld [vmem:[#allocation42_spill] sm:$0xff] }
 0x361   :  { %6820 = vmatprep.mubr.f32.mxu1 %v9581_v58  ;;  %v10955_v58 = vld [vmem:[#allocation31_spill] sm:$0xff] }
 0x364   :  { %6821 = vmatmul.mubr.f32.gmra.mrb[18].mxu1 %v9574_v34  ;;  %v10954_v34 = vld [vmem:[#allocation36_spill] sm:$0xff] }
 0x365   :  { %6823 = vmatprep.mubr.f32.mxu1 %v9605_v5  ;;  %v10953_v5 = vld [vmem:[#allocation23_spill] sm:$0xff] }
 0x368   :  { %6824 = vmatmul.mubr.f32.gmra.mrb[20].mxu1 %v9598_v2 }
 0x369   :  { %6826 = vmatprep.mubr.f32.mxu1 %v9627_v29 }
 0x36c   :  { %6827 = vmatmul.mubr.f32.gmra.mrb[22].mxu1 %v9620_v50  ;;  %v10951_v50 = vld [vmem:[#allocation14_spill] sm:$0xff] }
 0x36d   :  { %6829 = vmatprep.mubr.f32.mxu1 %v9649_v38  ;;  %v10952_v29 = vand.u32 4294901760, %v10951_v50  ;;  %v10961_v50 = vld [vmem:[#allocation48_spill] sm:$0xff] }
 0x370   :  { %6830 = vmatmul.mubr.f32.gmra.mrb[24].mxu1 %v9642_v42  ;;  %v10949_v42 = vld [vmem:[#allocation10_spill] sm:$0xff] }
 0x371   :  { %6832 = vmatprep.mubr.f32.mxu1 %v9671_v59  ;;  %v10948_v59 = vld [vmem:[#allocation11_spill] sm:$0xff]  ;;  %v10950_v38 = vand.u32 4294901760, %v10949_v42  ;;  %v10960_v42 = vld [vmem:[#allocation49_spill] sm:$0xff] }
 0x373   :  { %v7329_v2 = vpack.c.bf16 %v10952_v29, %v10950_v38  ;;  %v10962_v29 = vld [vmem:[#allocation53_spill] sm:$0xff]  ;;  %v10963_v38 = vld [vmem:[#allocation52_spill] sm:$0xff] }
 0x374   :  { %6833 = vmatmul.mubr.f32.gmra.mrb[26].mxu1 %v9664_v36  ;;  %v10947_v36 = vld [vmem:[#allocation28_spill] sm:$0xff] }
 0x375   :  { %6835 = vmatprep.mubr.f32.mxu1 %v9693_v31  ;;  %v10946_v31 = vld [vmem:[#allocation15_spill] sm:$0xff] }
 0x378   :  { %6836 = vmatmul.mubr.f32.gmra.mrb[28].mxu1 %v9686_v21  ;;  %v10945_v21 = vld [vmem:[#allocation8_spill] sm:$0xff] }
 0x379   :  { %6838 = vmatprep.mubr.f32.mxu1 %v9714_v40  ;;  %v10944_v40 = vld [vmem:[#allocation20_spill] sm:$0xff] }
 0x37a   :  { %v10986_v20 = vand.u32 4294901760, %v10944_v40 }
 0x37c   :  { %6839 = vmatmul.mubr.f32.gmra.mrb[30].mxu1 %v9707_v51  ;;  %v10943_v51 = vld [vmem:[#allocation38_spill] sm:$0xff] }
 0x37d   :  { %6869 = vmatprep.mubr.f32.mxu1 %v10930_v27  ;;  %v10985_v27 = vand.u32 4294901760, %v10943_v51 }
 0x380   :  { %6870 = vmatmul.mubr.f32.vlgmr.msra.gmra.mrb[0].mxu1 %v10931_v7  ;;  %v10989_v7 = vand.u32 4294901760, %v10946_v31 }
 0x381   :  { %6872 = vmatprep.mubr.f32.mxu1 %v10932_v3  ;;  %7304 = vmatpush3.bf16.msra.mxu1 %v9115_v4 }
 0x382   :  { %7306 = vmatprep.subr.bf16.mxu1 %v10933_v46 }
 0x384   :  { %6873 = vmatmul.mubr.f32.gmra.mrb[2].mxu1 %v10934_v52 }
 0x385   :  { %6875 = vmatprep.mubr.f32.mxu1 %v10935_v47  ;;  %7308 = vmatpush3.bf16.msra.mxu1 %v10933_v46  ;;  %v11007_v47 = vand.u32 4294901760, %v9697_v56 }
 0x386   :  { %7310 = vmatprep.subr.bf16.mxu1 %v10936_v37 }
 0x388   :  { %6876 = vmatmul.mubr.f32.gmra.mrb[4].mxu1 %v10937_v33 }
 0x389   :  { %6878 = vmatprep.mubr.f32.mxu1 %v10938_v0  ;;  %7312 = vmatpush3.bf16.msra.mxu1 %v10936_v37  ;;  %v11020_v0 = vld [vmem:[#allocation19_spill] sm:$0xff] }
 0x38a   :  { %7314 = vmatprep.subr.bf16.mxu1 %v10939_v10 }
 0x38c   :  { %6879 = vmatmul.mubr.f32.gmra.mrb[6].mxu1 %v10940_v12 }
 0x38d   :  { %6881 = vmatprep.mubr.f32.mxu1 %v10941_v8  ;;  %7316 = vmatpush3.bf16.msra.mxu1 %v10939_v10  ;;  %v7337_v10 = vpack.c.bf16 %v10972_v41, %v10971_v49  ;;  %v10980_v41 = vand.u32 4294901760, %v9272_v54  ;;  %v10987_v54 = vand.u32 4294901760, %v9278_v55  ;;  %v10993_v55 = vand.u32 4294901760, %v10955_v58 }
 0x38e   :  { %7318 = vmatprep.subr.bf16.mxu1 %v10942_v23 }
 0x38f   :  { %v7345_v49 = vpack.c.bf16 %v10980_v41, %v10979_v45  ;;  %v11033_v45 = vld [vmem:[#allocation58_spill] sm:$0xff]  ;;  %v11034_v41 = vld [vmem:[#allocation57_spill] sm:$0xff] }
 0x390   :  { %6882 = vmatmul.mubr.f32.gmra.mrb[8].mxu1 %v10943_v51  ;;  %v10992_v51 = vand.u32 4294901760, %v10954_v34 }
 0x391   :  { %6884 = vmatprep.mubr.f32.mxu1 %v10944_v40  ;;  %7320 = vmatpush3.bf16.msra.mxu1 %v10942_v23  ;;  %v10970_v23 = vand.u32 4294901760, %v10932_v3  ;;  %v10999_v40 = vand.u32 4294901760, %v10961_v50 }
 0x392   :  { %7322 = vmatprep.subr.bf16.mxu1 %v10945_v21 }
 0x394   :  { %6885 = vmatmul.mubr.f32.gmra.mrb[10].mxu1 %v10946_v31  ;;  %v10996_v31 = vand.u32 4294901760, %v10958_v62 }
 0x395   :  { %6887 = vmatprep.mubr.f32.mxu1 %v10947_v36  ;;  %7324 = vmatpush3.bf16.msra.mxu1 %v10945_v21  ;;  %v10968_v21 = vand.u32 4294901760, %v9294_v24  ;;  %v10975_v24 = vand.u32 4294901760, %v9266_v32  ;;  %v10982_v32 = vand.u32 4294901760, %v10941_v8 }
 0x396   :  { %7326 = vmatprep.subr.bf16.mxu1 %v10948_v59 }
 0x397   :  { %v7333_v13 = vpack.c.bf16 %v10968_v21, %v10967_v6  ;;  %v10984_v21 = vand.u32 4294901760, %v9276_v60  ;;  %v10991_v60 = vand.u32 4294901760, %v10953_v5 }
 0x398   :  { %6888 = vmatmul.mubr.f32.gmra.mrb[12].mxu1 %v10953_v5  ;;  %v10997_v5 = vand.u32 4294901760, %v10959_v63 }
 0x399   :  { %6890 = vmatprep.mubr.f32.mxu1 %v10954_v34  ;;  %7328 = vmatpush3.bf16.msra.mxu1 %v10948_v59  ;;  %v10965_v59 = vld [vmem:[#allocation59_spill] sm:$0xff]  ;;  %v10998_v34 = vand.u32 4294901760, %v10960_v42 }
 0x39a   :  { %7330 = vmatprep.subr.bf16.mxu1 %v7329_v2  ;;  %v11005_v3 = vand.u32 4294901760, %v10965_v59 }
 0x39c   :  { %6891 = vmatmul.mubr.f32.gmra.mrb[14].mxu1 %v10955_v58  ;;  %v11000_v58 = vand.u32 4294901760, %v10962_v29 }
 0x39d   :  { %6893 = vmatprep.mubr.f32.mxu1 %v10956_v48 }
 0x3a0   :  { %6894 = vmatmul.mubr.f32.gmra.mrb[16].mxu1 %v10957_v16 }
 0x3a1   :  { %6896 = vmatprep.mubr.f32.mxu1 %v10958_v62  ;;  %v11003_v62 = vand.u32 4294901760, %v9653_v39 }
 0x3a4   :  { %6897 = vmatmul.mubr.f32.gmra.mrb[18].mxu1 %v10959_v63  ;;  %v11004_v63 = vand.u32 4294901760, %v9679_v30 }
 0x3a5   :  { %6899 = vmatprep.mubr.f32.mxu1 %v10960_v42  ;;  %v11022_v42 = vld [vmem:[#allocation27_spill] sm:$0xff] }
 0x3a8   :  { %6900 = vmatmul.mubr.f32.gmra.mrb[20].mxu1 %v10961_v50  ;;  %v11023_v50 = vld [vmem:[#allocation40_spill] sm:$0xff] }
 0x3a9   :  { %6902 = vmatprep.mubr.f32.mxu1 %v10962_v29  ;;  %v11024_v29 = vld [vmem:[#allocation35_spill] sm:$0xff] }
 0x3ac   :  { %6903 = vmatmul.mubr.f32.gmra.mrb[22].mxu1 %v10963_v38 }
 0x3ad   :  { %6905 = vmatprep.mubr.f32.mxu1 %v10964_v22 }
 0x3b0   :  { %6906 = vmatmul.mubr.f32.gmra.mrb[24].mxu1 %v9653_v39  ;;  %v11011_v39 = vld [vmem:[#allocation25_spill] sm:$0xff] }
 0x3b1   :  { %6908 = vmatprep.mubr.f32.mxu1 %v9679_v30  ;;  %v11014_v30 = vld [vmem:[#allocation34_spill] sm:$0xff] }
 0x3b4   :  { %6909 = vmatmul.mubr.f32.gmra.mrb[26].mxu1 %v10965_v59  ;;  %v11013_v59 = vld [vmem:[#allocation9_spill] sm:$0xff] }
 0x3b5   :  { %6911 = vmatprep.mubr.f32.mxu1 %v9701_v25 }
 0x3b8   :  { %6912 = vmatmul.mubr.f32.gmra.mrb[28].mxu1 %v9697_v56  ;;  %v11010_v56 = vld [vmem:[#allocation6_spill] sm:$0xff] }
 0x3b9   :  { %6914 = vmatprep.mubr.f32.mxu1 %v9724_v26 }
 0x3bc   :  { %6915 = vmatmul.mubr.f32.gmra.mrb[30].mxu1 %v9718_v15 }
 0x3bd   :  { %6945 = vmatprep.mubr.f32.mxu1 %v10966_v19  ;;  %v10973_v19 = vand.u32 4294901760, %v10934_v52  ;;  %v11006_v52 = vand.u32 4294901760, %v9701_v25  ;;  %v11015_v25 = vld [vmem:[#allocation16_spill] sm:$0xff] }
 0x3c0   :  { %6946 = vmatmul.mubr.f32.vlgmr.msra.gmra.mrb[0].mxu1 %v10969_v14  ;;  %v10976_v14 = vand.u32 4294901760, %v9268_v43  ;;  %v10983_v43 = vand.u32 4294901760, %v9274_v53  ;;  %v10990_v53 = vand.u32 4294901760, %v10947_v36  ;;  %v10995_v36 = vand.u32 4294901760, %v10957_v16 }
 0x3c1   :  { %6948 = vmatprep.mubr.f32.mxu1 %v10970_v23  ;;  %7332 = vmatpush3.bf16.msra.mxu1 %v7329_v2  ;;  %v10977_v2 = vand.u32 4294901760, %v10937_v33  ;;  %v11002_v16 = vand.u32 4294901760, %v10964_v22  ;;  %v11008_v33 = vand.u32 4294901760, %v9724_v26  ;;  %v11009_v22 = vand.u32 4294901760, %v9718_v15  ;;  %v11016_v15 = vld [vmem:[#allocation8_spill] sm:$0xff] }
 0x3c2   :  { %7334 = vmatprep.subr.bf16.mxu1 %v7333_v13  ;;  %v7341_v6 = vpack.c.bf16 %v10976_v14, %v10975_v24  ;;  %v7349_v23 = vpack.c.bf16 %v10984_v21, %v10983_v43  ;;  %v11017_v26 = vld [vmem:[#allocation12_spill] sm:$0xff]  ;;  %v11028_v24 = vld [vmem:[#allocation46_spill] sm:$0xff]  ;;  %v11029_v14 = vld [vmem:[#allocation51_spill] sm:$0xff] }
 0x3c3   :  { %v11038_v43 = vld [vmem:[#allocation62_spill] sm:$0xff] }
 0x3c4   :  { %6949 = vmatmul.mubr.f32.gmra.mrb[2].mxu1 %v10973_v19  ;;  %v11026_v19 = vld [vmem:[#allocation41_spill] sm:$0xff] }
 0x3c5   :  { %6951 = vmatprep.mubr.f32.mxu1 %v10974_v35  ;;  %7336 = vmatpush3.bf16.msra.mxu1 %v7333_v13  ;;  %v10981_v13 = vand.u32 4294901760, %v10940_v12  ;;  %v10988_v12 = vand.u32 4294901760, %v9280_v17  ;;  %v10994_v17 = vand.u32 4294901760, %v10956_v48  ;;  %v11001_v48 = vand.u32 4294901760, %v10963_v38  ;;  %v11025_v38 = vld [vmem:[#allocation43_spill] sm:$0xff] }
 0x3c6   :  { %7338 = vmatprep.subr.bf16.mxu1 %v7337_v10  ;;  %v11027_v35 = vld [vmem:[#allocation47_spill] sm:$0xff] }
 0x3c7   :  { %v7353_v8 = vpack.c.bf16 %v10988_v12, %v10987_v54 }
 0x3c8   :  { %6952 = vmatmul.mubr.f32.gmra.mrb[4].mxu1 %v10977_v2  ;;  %v11031_v2 = vld [vmem:[#allocation55_spill] sm:$0xff] }
 0x3c9   :  { %6954 = vmatprep.mubr.f32.mxu1 %v10978_v1  ;;  %7340 = vmatpush3.bf16.msra.mxu1 %v7337_v10  ;;  %v11021_v10 = vld [vmem:[#allocation32_spill] sm:$0xff]  ;;  %v11032_v1 = vld [vmem:[#allocation54_spill] sm:$0xff] }
 0x3ca   :  { %7342 = vmatprep.subr.bf16.mxu1 %v7341_v6 }
 0x3cc   :  { %6955 = vmatmul.mubr.f32.gmra.mrb[6].mxu1 %v10981_v13  ;;  %v11036_v13 = vld [vmem:[#allocation60_spill] sm:$0xff] }
 0x3cd   :  { %6957 = vmatprep.mubr.f32.mxu1 %v10982_v32  ;;  %7344 = vmatpush3.bf16.msra.mxu1 %v7341_v6  ;;  %v11030_v6 = vld [vmem:[#allocation50_spill] sm:$0xff]  ;;  %v11037_v32 = vld [vmem:[#allocation63_spill] sm:$0xff] }
 0x3ce   :  { %7346 = vmatprep.subr.bf16.mxu1 %v7345_v49 }
 0x3d0   :  { %6958 = vmatmul.mubr.f32.gmra.mrb[8].mxu1 %v10985_v27 }
 0x3d1   :  { %6960 = vmatprep.mubr.f32.mxu1 %v10986_v20  ;;  %7348 = vmatpush3.bf16.msra.mxu1 %v7345_v49  ;;  %v11035_v49 = vld [vmem:[#allocation61_spill] sm:$0xff] }
 0x3d2   :  { %7350 = vmatprep.subr.bf16.mxu1 %v7349_v23 }
 0x3d4   :  { %6961 = vmatmul.mubr.f32.gmra.mrb[10].mxu1 %v10989_v7 }
 0x3d5   :  { %6963 = vmatprep.mubr.f32.mxu1 %v10990_v53  ;;  %7352 = vmatpush3.bf16.msra.mxu1 %v7349_v23 }
 0x3d6   :  { %7354 = vmatprep.subr.bf16.mxu1 %v7353_v8 }
 0x3d8   :  { %6964 = vmatmul.mubr.f32.gmra.mrb[12].mxu1 %v10991_v60 }
 0x3d9   :  { %6966 = vmatprep.mubr.f32.mxu1 %v10992_v51  ;;  %7356 = vmatpush3.bf16.msra.mxu1 %v7353_v8 }
 0x3da   :  { %7358 = vmatprep.subr.bf16.mxu1 %v9115_v4 }
 0x3dc   :  { %6967 = vmatmul.mubr.f32.gmra.mrb[14].mxu1 %v10993_v55 }
 0x3dd   :  { %6969 = vmatprep.mubr.f32.mxu1 %v10994_v17 }
 0x3e0   :  { %6970 = vmatmul.mubr.f32.gmra.mrb[16].mxu1 %v10995_v36 }
 0x3e1   :  { %6972 = vmatprep.mubr.f32.mxu1 %v10996_v31 }
 0x3e4   :  { %6973 = vmatmul.mubr.f32.gmra.mrb[18].mxu1 %v10997_v5 }
 0x3e5   :  { %6975 = vmatprep.mubr.f32.mxu1 %v10998_v34 }
 0x3e8   :  { %6976 = vmatmul.mubr.f32.gmra.mrb[20].mxu1 %v10999_v40 }
 0x3e9   :  { %6978 = vmatprep.mubr.f32.mxu1 %v11000_v58 }
 0x3ec   :  { %6979 = vmatmul.mubr.f32.gmra.mrb[22].mxu1 %v11001_v48 }
 0x3ed   :  { %6981 = vmatprep.mubr.f32.mxu1 %v11002_v16 }
 0x3f0   :  { %6982 = vmatmul.mubr.f32.gmra.mrb[24].mxu1 %v11003_v62 }
 0x3f1   :  { %6984 = vmatprep.mubr.f32.mxu1 %v11004_v63 }
 0x3f4   :  { %6985 = vmatmul.mubr.f32.gmra.mrb[26].mxu1 %v11005_v3 }
 0x3f5   :  { %6987 = vmatprep.mubr.f32.mxu1 %v11006_v52 }
 0x3f8   :  { %6988 = vmatmul.mubr.f32.gmra.mrb[28].mxu1 %v11007_v47 }
 0x3f9   :  { %6990 = vmatprep.mubr.f32.mxu1 %v11008_v33 }
 0x3fc   :  { %6991 = vmatmul.mubr.f32.gmra.mrb[30].mxu1 %v11009_v22 }
 0x3fd   :  { %7021 = vmatprep.mubr.f32.mxu1 %v9373_v18 }
 0x400   :  { %7022 = vmatmul.mubr.f32.vlgmr.msra.gmra.mrb[0].mxu1 %v9369_v11 }
 0x401   :  { %7024 = vmatprep.mubr.f32.mxu1 %v9388_v44  ;;  %7360 = vmatpush3.bf16.msra.mxu1 %v9115_v4  ;;  %v11012_v4 = vld [vmem:[#allocation33_spill] sm:$0xff] }
 0x402   :  { %7362 = vmatprep.subr.bf16.mxu1 %v10933_v46 }
 0x404   :  { %7025 = vmatmul.mubr.f32.gmra.mrb[2].mxu1 %v9383_v57 }
 0x405   :  { %7027 = vmatprep.mubr.f32.mxu1 %v9415_v61  ;;  %7364 = vmatpush3.bf16.msra.mxu1 %v10933_v46  ;;  %v11018_v46 = vld [vmem:[#allocation24_spill] sm:$0xff] }
 0x406   :  { %7366 = vmatprep.subr.bf16.mxu1 %v10936_v37 }
 0x408   :  { %7028 = vmatmul.mubr.f32.gmra.mrb[4].mxu1 %v9409_v9 }
 0x409   :  { %7030 = vmatprep.mubr.f32.mxu1 %v9437_v28  ;;  %7368 = vmatpush3.bf16.msra.mxu1 %v10936_v37  ;;  %v11019_v37 = vld [vmem:[#allocation11_spill] sm:$0xff] }
 0x40a   :  { %7370 = vmatprep.subr.bf16.mxu1 %v11010_v56 }
 0x40c   :  { %7031 = vmatmul.mubr.f32.gmra.mrb[6].mxu1 %v11011_v39 }
 0x40d   :  { %7033 = vmatprep.mubr.f32.mxu1 %v11012_v4  ;;  %7372 = vmatpush3.bf16.msra.mxu1 %v11010_v56 }
 0x40e   :  { %7374 = vmatprep.subr.bf16.mxu1 %v11013_v59 }
 0x410   :  { %7034 = vmatmul.mubr.f32.gmra.mrb[8].mxu1 %v11014_v30 }
 0x411   :  { %7036 = vmatprep.mubr.f32.mxu1 %v11015_v25  ;;  %7376 = vmatpush3.bf16.msra.mxu1 %v11013_v59 }
 0x412   :  { %7378 = vmatprep.subr.bf16.mxu1 %v11016_v15 }
 0x414   :  { %7037 = vmatmul.mubr.f32.gmra.mrb[10].mxu1 %v11017_v26 }
 0x415   :  { %7039 = vmatprep.mubr.f32.mxu1 %v11018_v46  ;;  %7380 = vmatpush3.bf16.msra.mxu1 %v11016_v15 }
 0x416   :  { %7382 = vmatprep.subr.bf16.mxu1 %v11019_v37 }
 0x418   :  { %7040 = vmatmul.mubr.f32.gmra.mrb[12].mxu1 %v11020_v0 }
 0x419   :  { %7042 = vmatprep.mubr.f32.mxu1 %v11021_v10  ;;  %7384 = vmatpush3.bf16.msra.mxu1 %v11019_v37 }
 0x41c   :  { %7043 = vmatmul.mubr.f32.gmra.mrb[14].mxu1 %v11022_v42 }
 0x41d   :  { %7045 = vmatprep.mubr.f32.mxu1 %v11023_v50 }
 0x420   :  { %7046 = vmatmul.mubr.f32.gmra.mrb[16].mxu1 %v11024_v29 }
 0x421   :  { %7048 = vmatprep.mubr.f32.mxu1 %v11025_v38 }
 0x424   :  { %7049 = vmatmul.mubr.f32.gmra.mrb[18].mxu1 %v11026_v19 }
 0x425   :  { %7051 = vmatprep.mubr.f32.mxu1 %v11027_v35 }
 0x428   :  { %7052 = vmatmul.mubr.f32.gmra.mrb[20].mxu1 %v11028_v24 }
 0x429   :  { %7054 = vmatprep.mubr.f32.mxu1 %v11029_v14 }
 0x42c   :  { %7055 = vmatmul.mubr.f32.gmra.mrb[22].mxu1 %v11030_v6 }
 0x42d   :  { %7057 = vmatprep.mubr.f32.mxu1 %v11031_v2 }
 0x430   :  { %7058 = vmatmul.mubr.f32.gmra.mrb[24].mxu1 %v11032_v1 }
 0x431   :  { %7060 = vmatprep.mubr.f32.mxu1 %v11033_v45 }
 0x434   :  { %7061 = vmatmul.mubr.f32.gmra.mrb[26].mxu1 %v11034_v41 }
 0x435   :  { %7063 = vmatprep.mubr.f32.mxu1 %v11035_v49 }
 0x438   :  { %7064 = vmatmul.mubr.f32.gmra.mrb[28].mxu1 %v11036_v13 }
 0x439   :  { %7066 = vmatprep.mubr.f32.mxu1 %v11037_v32 }
 0x43c   :  { %7067 = vmatmul.mubr.f32.gmra.mrb[30].mxu1 %v11038_v43 }
 0x43d   :  { %7097 = vmatprep.mubr.f32.mxu1 %v9373_v18 }
 0x440   :  { %7098 = vmatmul.mubr.f32.vlgmr.msra.gmra.mrb[0].mxu1 %v9369_v11 }
 0x441   :  { %7100 = vmatprep.mubr.f32.mxu1 %v9388_v44 }
 0x444   :  { %7101 = vmatmul.mubr.f32.gmra.mrb[2].mxu1 %v9383_v57  ;;  %v4625_v57 = vld [vmem:[%s10447_s6 + $0x8] sm:$0xff] }
 0x445   :  { %7103 = vmatprep.mubr.f32.mxu1 %v9415_v61  ;;  %v10001_v11 = vand.u32 4294901760, %v4625_v57 }
 0x447   :  { %11039 = vst [vmem:[#allocation18_spill] sm:$0xff] %v10001_v11  ;;  %v10004_v18 = vsub.f32 %v4625_v57, %v10001_v11 }
 0x448   :  { %7104 = vmatmul.mubr.f32.gmra.mrb[4].mxu1 %v9409_v9 }
 0x449   :  { %7106 = vmatprep.mubr.f32.mxu1 %v9437_v28  ;;  %v10732_v44 = vand.u32 4294901760, %v10004_v18 }
 0x44b   :  { %v4734_v9 = vsub.f32 %v10004_v18, %v10732_v44 }
 0x44c   :  { %7107 = vmatmul.mubr.f32.gmra.mrb[6].mxu1 %v11011_v39 }
 0x44d   :  { %7109 = vmatprep.mubr.f32.mxu1 %v11012_v4  ;;  %v4735_v61 = vand.u32 4294901760, %v4734_v9 }
 0x44f   :  { %4736 = vmatprep.mubr.f32.mxu0 %v4735_v61 }
 0x450   :  { %7110 = vmatmul.mubr.f32.gmra.mrb[8].mxu1 %v11014_v30 }
 0x451   :  { %7112 = vmatprep.mubr.f32.mxu1 %v11015_v25 }
 0x454   :  { %7113 = vmatmul.mubr.f32.gmra.mrb[10].mxu1 %v11017_v26 }
 0x455   :  { %7115 = vmatprep.mubr.f32.mxu1 %v11018_v46 }
 0x458   :  { %7116 = vmatmul.mubr.f32.gmra.mrb[12].mxu1 %v11020_v0 }
 0x459   :  { %7118 = vmatprep.mubr.f32.mxu1 %v11021_v10 }
 0x45c   :  { %7119 = vmatmul.mubr.f32.gmra.mrb[14].mxu1 %v11022_v42 }
 0x45d   :  { %7121 = vmatprep.mubr.f32.mxu1 %v11023_v50 }
 0x460   :  { %7122 = vmatmul.mubr.f32.gmra.mrb[16].mxu1 %v11024_v29 }
 0x461   :  { %7124 = vmatprep.mubr.f32.mxu1 %v11025_v38 }
 0x464   :  { %7125 = vmatmul.mubr.f32.gmra.mrb[18].mxu1 %v11026_v19 }
 0x465   :  { %7127 = vmatprep.mubr.f32.mxu1 %v11027_v35 }
 0x468   :  { %7128 = vmatmul.mubr.f32.gmra.mrb[20].mxu1 %v11028_v24 }
 0x469   :  { %7130 = vmatprep.mubr.f32.mxu1 %v11029_v14 }
 0x46c   :  { %7131 = vmatmul.mubr.f32.gmra.mrb[22].mxu1 %v11030_v6 }
 0x46d   :  { %7133 = vmatprep.mubr.f32.mxu1 %v11031_v2 }
 0x470   :  { %7134 = vmatmul.mubr.f32.gmra.mrb[24].mxu1 %v11032_v1 }
 0x471   :  { %7136 = vmatprep.mubr.f32.mxu1 %v11033_v45 }
 0x474   :  { %7137 = vmatmul.mubr.f32.gmra.mrb[26].mxu1 %v11034_v41 }
 0x475   :  { %7139 = vmatprep.mubr.f32.mxu1 %v11035_v49 }
 0x478   :  { %7140 = vmatmul.mubr.f32.gmra.mrb[28].mxu1 %v11036_v13 }
 0x479   :  { %7142 = vmatprep.mubr.f32.mxu1 %v11037_v32 }
 0x47c   :  { %7143 = vmatmul.mubr.f32.gmra.mrb[30].mxu1 %v11038_v43 }
 0x47d   :  { %4987 = vmatprep.mubr.f32.mxu1 %v10001_v11 }
 0x513   :  { %v7099_v28 = vpop.f32.mrb[0].mxu1 }
 0x514   :  { %v4639_v21 = vand.u32 4294901760, %v7099_v28  ;;  %v4434_v23 = vpop.f32.mrb[1].mxu1 }
 0x515   :  { %v4636_v27 = vand.u32 4294901760, %v4434_v23 }
 0x516   :  { %v10011_v20 = vsub.f32 %v7099_v28, %v4639_v21 }
 0x517   :  { %v10013_v54 = vpack.c.bf16 %v4639_v21, %v4636_v27  ;;  %v10015_v12 = vsub.f32 %v4434_v23, %v4636_v27  ;;  %v7102_v8 = vpop.f32.mrb[2].mxu1 }
 0x518   :  { %v4772_v7 = vand.u32 4294901760, %v10011_v20  ;;  %v4645_v53 = vand.u32 4294901760, %v7102_v8  ;;  %v4446_v60 = vpop.f32.mrb[3].mxu1 }
 0x519   :  { %v4765_v51 = vand.u32 4294901760, %v10015_v12  ;;  %v4642_v17 = vand.u32 4294901760, %v4446_v60 }
 0x51a   :  { %v4773_v36 = vsub.f32 %v10011_v20, %v4772_v7  ;;  %v10022_v31 = vsub.f32 %v7102_v8, %v4645_v53 }
 0x51b   :  { %v4766_v5 = vsub.f32 %v10015_v12, %v4765_v51  ;;  %v10025_v34 = vpack.c.bf16 %v4645_v53, %v4642_v17  ;;  %v10027_v40 = vsub.f32 %v4446_v60, %v4642_v17  ;;  %v7105_v58 = vpop.f32.mrb[4].mxu1  ;;  %v10029_v48 = vpack.c.bf16 %v4772_v7, %v4765_v51 }
 0x51c   :  { %v4774_v16 = vand.u32 4294901760, %v4773_v36  ;;  %v4786_v62 = vand.u32 4294901760, %v10022_v31  ;;  %v4651_v63 = vand.u32 4294901760, %v7105_v58  ;;  %v4458_v3 = vpop.f32.mrb[5].mxu1 }
 0x51d   :  { %11040 = vst [vmem:[#allocation13_spill] sm:$0xff] %v10029_v48  ;;  %v4767_v52 = vand.u32 4294901760, %v4766_v5  ;;  %v4779_v47 = vand.u32 4294901760, %v10027_v40  ;;  %v4648_v22 = vand.u32 4294901760, %v4458_v3 }
 0x51e   :  { %v4787_v56 = vsub.f32 %v10022_v31, %v4786_v62  ;;  %v10036_v39 = vsub.f32 %v7105_v58, %v4651_v63 }
 0x51f   :  { %v4780_v4 = vsub.f32 %v10027_v40, %v4779_v47  ;;  %v10039_v59 = vpack.c.bf16 %v4651_v63, %v4648_v22  ;;  %v10041_v30 = vsub.f32 %v4458_v3, %v4648_v22  ;;  %v7108_v25 = vpop.f32.mrb[6].mxu1  ;;  %v10043_v15 = vpack.c.bf16 %v4774_v16, %v4767_v52 }
 0x520   :  { %v4788_v26 = vand.u32 4294901760, %v4787_v56  ;;  %v4800_v46 = vand.u32 4294901760, %v10036_v39  ;;  %v4657_v37 = vand.u32 4294901760, %v7108_v25  ;;  %v4470_v0 = vpop.f32.mrb[7].mxu1  ;;  %v10046_v10 = vpack.c.bf16 %v4786_v62, %v4779_v47 }
 0x521   :  { %v4781_v42 = vand.u32 4294901760, %v4780_v4  ;;  %v4793_v50 = vand.u32 4294901760, %v10041_v30  ;;  %v4654_v38 = vand.u32 4294901760, %v4470_v0 }
 0x522   :  { %11041 = vst [vmem:[#allocation22_spill] sm:$0xff] %v10046_v10  ;;  %v4801_v19 = vsub.f32 %v10036_v39, %v4800_v46  ;;  %v10052_v35 = vsub.f32 %v7108_v25, %v4657_v37 }
 0x523   :  { %v4794_v24 = vsub.f32 %v10041_v30, %v4793_v50  ;;  %v10055_v14 = vpack.c.bf16 %v4657_v37, %v4654_v38  ;;  %v10057_v6 = vsub.f32 %v4470_v0, %v4654_v38  ;;  %v7111_v2 = vpop.f32.mrb[8].mxu1  ;;  %v10059_v1 = vpack.c.bf16 %v4788_v26, %v4781_v42 }
 0x524   :  { %v4802_v45 = vand.u32 4294901760, %v4801_v19  ;;  %v4814_v41 = vand.u32 4294901760, %v10052_v35  ;;  %v4663_v49 = vand.u32 4294901760, %v7111_v2  ;;  %v4482_v13 = vpop.f32.mrb[9].mxu1  ;;  %v10062_v32 = vpack.c.bf16 %v4800_v46, %v4793_v50 }
 0x525   :  { %11042 = vst [vmem:[#allocation5_spill] sm:$0xff] %v10055_v14  ;;  %v4795_v43 = vand.u32 4294901760, %v4794_v24  ;;  %v4807_v57 = vand.u32 4294901760, %v10057_v6  ;;  %v4660_v61 = vand.u32 4294901760, %v4482_v13 }
 0x526   :  { %11043 = vst [vmem:[#allocation17_spill] sm:$0xff] %v10062_v32  ;;  %v4815_v28 = vsub.f32 %v10052_v35, %v4814_v41  ;;  %v10068_v21 = vsub.f32 %v7111_v2, %v4663_v49 }
 0x527   :  { %v4808_v23 = vsub.f32 %v10057_v6, %v4807_v57  ;;  %v10071_v27 = vpack.c.bf16 %v4663_v49, %v4660_v61  ;;  %v10073_v8 = vsub.f32 %v4482_v13, %v4660_v61  ;;  %v7114_v7 = vpop.f32.mrb[10].mxu1  ;;  %v10075_v53 = vpack.c.bf16 %v4802_v45, %v4795_v43 }
 0x528   :  { %v4816_v60 = vand.u32 4294901760, %v4815_v28  ;;  %v4828_v51 = vand.u32 4294901760, %v10068_v21  ;;  %v4669_v17 = vand.u32 4294901760, %v7114_v7  ;;  %v4494_v36 = vpop.f32.mrb[11].mxu1  ;;  %v10078_v5 = vpack.c.bf16 %v4814_v41, %v4807_v57 }
 0x529   :  { %11044 = vst [vmem:[#allocation26_spill] sm:$0xff] %v10071_v27  ;;  %v4809_v58 = vand.u32 4294901760, %v4808_v23  ;;  %v4821_v16 = vand.u32 4294901760, %v10073_v8  ;;  %v4666_v63 = vand.u32 4294901760, %v4494_v36 }
 0x52a   :  { %11045 = vst [vmem:[#allocation7_spill] sm:$0xff] %v10078_v5  ;;  %v4829_v3 = vsub.f32 %v10068_v21, %v4828_v51  ;;  %v10084_v52 = vsub.f32 %v7114_v7, %v4669_v17 }
 0x52b   :  { %v4822_v47 = vsub.f32 %v10073_v8, %v4821_v16  ;;  %v10087_v22 = vpack.c.bf16 %v4669_v17, %v4666_v63  ;;  %v10089_v56 = vsub.f32 %v4494_v36, %v4666_v63  ;;  %v7117_v4 = vpop.f32.mrb[12].mxu1  ;;  %v10091_v25 = vpack.c.bf16 %v4816_v60, %v4809_v58 }
 0x52c   :  { %11046 = vst [vmem:[#allocation21_spill] sm:$0xff] %v10084_v52  ;;  %v4830_v26 = vand.u32 4294901760, %v4829_v3  ;;  %v4842_v46 = vand.u32 4294901760, %v10084_v52  ;;  %v4675_v37 = vand.u32 4294901760, %v7117_v4  ;;  %v4506_v0 = vpop.f32.mrb[13].mxu1  ;;  %v10094_v42 = vpack.c.bf16 %v4828_v51, %v4821_v16 }
 0x52d   :  { %11047 = vst [vmem:[#allocation29_spill] sm:$0xff] %v10087_v22  ;;  %11048 = vst [vmem:[#allocation30_spill] sm:$0xff] %v10089_v56  ;;  %v4823_v50 = vand.u32 4294901760, %v4822_v47  ;;  %v4835_v38 = vand.u32 4294901760, %v10089_v56  ;;  %v4672_v24 = vand.u32 4294901760, %v4506_v0 }
 0x52e   :  { %11049 = vst [vmem:[#allocation37_spill] sm:$0xff] %v10094_v42  ;;  %v4843_v2 = vsub.f32 %v10084_v52, %v4842_v46  ;;  %v10100_v45 = vsub.f32 %v7117_v4, %v4675_v37 }
 0x52f   :  { %v4836_v41 = vsub.f32 %v10089_v56, %v4835_v38  ;;  %v10103_v49 = vpack.c.bf16 %v4675_v37, %v4672_v24  ;;  %v10105_v13 = vsub.f32 %v4506_v0, %v4672_v24  ;;  %v7120_v43 = vpop.f32.mrb[14].mxu1  ;;  %v10107_v57 = vpack.c.bf16 %v4830_v26, %v4823_v50  ;;  %v4624_v37 = vld [vmem:[%s10447_s6] sm:$0xff] }
 0x530   :  { %11050 = vst [vmem:[#allocation38_spill] sm:$0xff] %v10100_v45  ;;  %v4844_v61 = vand.u32 4294901760, %v4843_v2  ;;  %v4856_v28 = vand.u32 4294901760, %v10100_v45  ;;  %v4681_v23 = vand.u32 4294901760, %v7120_v43  ;;  %v4518_v7 = vpop.f32.mrb[15].mxu1  ;;  %v10110_v60 = vpack.c.bf16 %v4842_v46, %v4835_v38 }
 0x531   :  { %11051 = vst [vmem:[#allocation20_spill] sm:$0xff] %v10103_v49  ;;  %11052 = vst [vmem:[#allocation15_spill] sm:$0xff] %v10105_v13  ;;  %v4837_v51 = vand.u32 4294901760, %v4836_v41  ;;  %v4849_v17 = vand.u32 4294901760, %v10105_v13  ;;  %v4678_v58 = vand.u32 4294901760, %v4518_v7 }
 0x532   :  { %11053 = vst [vmem:[#allocation28_spill] sm:$0xff] %v10110_v60  ;;  %v4857_v16 = vsub.f32 %v10100_v45, %v4856_v28  ;;  %v10116_v63 = vsub.f32 %v7120_v43, %v4681_v23 }
 0x533   :  { %v4850_v3 = vsub.f32 %v10105_v13, %v4849_v17  ;;  %v10119_v47 = vpack.c.bf16 %v4681_v23, %v4678_v58  ;;  %v10121_v4 = vsub.f32 %v4518_v7, %v4678_v58  ;;  %v7123_v26 = vpop.f32.mrb[16].mxu1  ;;  %v10123_v46 = vpack.c.bf16 %v4844_v61, %v4837_v51 }
 0x534   :  { %11054 = vst [vmem:[#allocation10_spill] sm:$0xff] %v10116_v63  ;;  %v4858_v0 = vand.u32 4294901760, %v4857_v16  ;;  %v4870_v50 = vand.u32 4294901760, %v10116_v63  ;;  %v4687_v38 = vand.u32 4294901760, %v7123_v26  ;;  %v4530_v24 = vpop.f32.mrb[17].mxu1  ;;  %v10129_v2 = vpack.c.bf16 %v4856_v28, %v4849_v17 }
 0x535   :  { %11055 = vst [vmem:[#allocation14_spill] sm:$0xff] %v10121_v4  ;;  %v4851_v41 = vand.u32 4294901760, %v4850_v3  ;;  %v4863_v43 = vand.u32 4294901760, %v10121_v4  ;;  %v4684_v7 = vand.u32 4294901760, %v4530_v24  ;;  %v10137_v58 = vand.u32 4294901760, %v4624_v37 }
 0x536   :  { %11056 = vst [vmem:[#allocation23_spill] sm:$0xff] %v10129_v2  ;;  %v4871_v61 = vsub.f32 %v10116_v63, %v4870_v50  ;;  %v10135_v51 = vsub.f32 %v7123_v26, %v4687_v38 }
 0x537   :  { %v4864_v16 = vsub.f32 %v10121_v4, %v4863_v43  ;;  %v10140_v36 = vpack.c.bf16 %v4687_v38, %v4684_v7  ;;  %v10142_v19 = vsub.f32 %v4530_v24, %v4684_v7  ;;  %v7126_v28 = vpop.f32.mrb[18].mxu1  ;;  %v10144_v17 = vpack.c.bf16 %v4858_v0, %v4851_v41 }
 0x538   :  { %v4872_v3 = vand.u32 4294901760, %v4871_v61  ;;  %v4884_v62 = vand.u32 4294901760, %v10135_v51  ;;  %v4693_v23 = vand.u32 4294901760, %v7126_v28  ;;  %v4542_v44 = vpop.f32.mrb[19].mxu1  ;;  %v10147_v9 = vpack.c.bf16 %v4870_v50, %v4863_v43 }
 0x539   :  { %v4865_v26 = vand.u32 4294901760, %v4864_v16  ;;  %v4877_v29 = vand.u32 4294901760, %v10142_v19  ;;  %v4690_v33 = vand.u32 4294901760, %v4542_v44  ;;  %7386 = vmatprep.subr.bf16.mxu0 %v10140_v36  ;;  %v10158_v41 = vsub.f32 %v4624_v37, %v10137_v58 }
 0x53a   :  { %11057 = vst [vmem:[#allocation36_spill] sm:$0xff] %v10147_v9  ;;  %v4885_v24 = vsub.f32 %v10135_v51, %v4884_v62  ;;  %v10154_v0 = vsub.f32 %v7126_v28, %v4693_v23  ;;  %7388 = vmatpush3.bf16.msra.mxu0 %v10013_v54 }
 0x53b   :  { %11058 = vst [vmem:[#allocation31_spill] sm:$0xff] %v10158_v41  ;;  %v4878_v50 = vsub.f32 %v10142_v19, %v4877_v29  ;;  %v10161_v43 = vpack.c.bf16 %v4693_v23, %v4690_v33  ;;  %v10163_v7 = vsub.f32 %v4542_v44, %v4690_v33  ;;  %v7129_v61 = vpop.f32.mrb[20].mxu1  ;;  %v10165_v16 = vpack.c.bf16 %v4872_v3, %v4865_v26 }
 0x53c   :  { %v4898_v55 = vand.u32 4294901760, %v10154_v0  ;;  %v4699_v38 = vand.u32 4294901760, %v7129_v61  ;;  %v4554_v9 = vpop.f32.mrb[21].mxu1  ;;  %v4886_v28 = vand.u32 4294901760, %v4885_v24  ;;  %v10168_v2 = vpack.c.bf16 %v4884_v62, %v4877_v29 }
 0x53d   :  { %v4891_v60 = vand.u32 4294901760, %v10163_v7  ;;  %v4696_v37 = vand.u32 4294901760, %v4554_v9  ;;  %7390 = vmatprep.subr.bf16.mxu0 %v10161_v43  ;;  %v4879_v42 = vand.u32 4294901760, %v4878_v50  ;;  %v4627_v50 = vld [vmem:[%s10447_s6 + $0x18] sm:$0xff] }
 0x53e   :  { %11059 = vst [vmem:[#allocation42_spill] sm:$0xff] %v10168_v2  ;;  %v4899_v33 = vsub.f32 %v10154_v0, %v4898_v55  ;;  %v10175_v23 = vsub.f32 %v7129_v61, %v4699_v38  ;;  %7392 = vmatpush3.bf16.msra.mxu0 %v10025_v34 }
 0x53f   :  { %v4892_v29 = vsub.f32 %v10163_v7, %v4891_v60  ;;  %v10180_v62 = vpack.c.bf16 %v4699_v38, %v4696_v37  ;;  %v10182_v26 = vsub.f32 %v4554_v9, %v4696_v37  ;;  %v7132_v24 = vpop.f32.mrb[22].mxu1  ;;  %v7417_v5 = vpack.c.bf16 %v4886_v28, %v4879_v42 }
 0x540   :  { %v4912_v44 = vand.u32 4294901760, %v10175_v23  ;;  %v4705_v61 = vand.u32 4294901760, %v7132_v24  ;;  %v4566_v32 = vpop.f32.mrb[23].mxu1  ;;  %v4900_v11 = vand.u32 4294901760, %v4899_v33  ;;  %v10188_v10 = vpack.c.bf16 %v4898_v55, %v4891_v60 }
 0x541   :  { %v4905_v3 = vand.u32 4294901760, %v10182_v26  ;;  %v4702_v48 = vand.u32 4294901760, %v4566_v32  ;;  %7394 = vmatprep.subr.bf16.mxu0 %v10180_v62  ;;  %7418 = vmatprep.subr.bf16.mxu1 %v7417_v5  ;;  %v4893_v9 = vand.u32 4294901760, %v4892_v29  ;;  %v11061_v55 = vand.u32 4294901760, %v10158_v41 }
 0x542   :  { %11060 = vst [vmem:[#allocation39_spill] sm:$0xff] %v10188_v10  ;;  %v4913_v38 = vsub.f32 %v10175_v23, %v4912_v44  ;;  %v10195_v28 = vsub.f32 %v7132_v24, %v4705_v61  ;;  %7396 = vmatpush3.bf16.msra.mxu0 %v10039_v59  ;;  %7420 = vmatpush3.bf16.msra.mxu1 %v10043_v15  ;;  %v10204_v37 = vand.u32 4294901760, %v4627_v50  ;;  %v4626_v10 = vld [vmem:[%s10447_s6 + $0x10] sm:$0xff] }
 0x543   :  { %v10202_v60 = vsub.f32 %v10158_v41, %v11061_v55  ;;  %v4906_v5 = vsub.f32 %v10182_v26, %v4905_v3  ;;  %v10207_v33 = vpack.c.bf16 %v4705_v61, %v4702_v48  ;;  %v10209_v29 = vsub.f32 %v4566_v32, %v4702_v48  ;;  %v7135_v42 = vpop.f32.mrb[24].mxu1 }
 0x544   :  { %v7421_v24 = vpack.c.bf16 %v4900_v11, %v4893_v9  ;;  %v4926_v15 = vand.u32 4294901760, %v10195_v28  ;;  %v4711_v2 = vand.u32 4294901760, %v7135_v42  ;;  %v4578_v4 = vpop.f32.mrb[25].mxu1  ;;  %v4914_v55 = vand.u32 4294901760, %v4913_v38 }
 0x545   :  { %v10215_v41 = vpack.c.bf16 %v4912_v44, %v4905_v3  ;;  %v4919_v63 = vand.u32 4294901760, %v10209_v29  ;;  %v4708_v13 = vand.u32 4294901760, %v4578_v4  ;;  %7398 = vmatprep.subr.bf16.mxu0 %v10207_v33  ;;  %v4907_v48 = vand.u32 4294901760, %v4906_v5 }
 0x546   :  { %7422 = vmatprep.subr.bf16.mxu1 %v7421_v24  ;;  %v4927_v32 = vsub.f32 %v10195_v28, %v4926_v15  ;;  %v10222_v61 = vsub.f32 %v7135_v42, %v4711_v2  ;;  %7400 = vmatpush3.bf16.msra.mxu0 %v10055_v14  ;;  %v10227_v44 = vsub.f32 %v4627_v50, %v10204_v37  ;;  %v10229_v3 = vand.u32 4294901760, %v4626_v10 }
 0x547   :  { %11062 = vst [vmem:[#allocation45_spill] sm:$0xff] %v10215_v41  ;;  %7424 = vmatpush3.bf16.msra.mxu1 %v10059_v1  ;;  %v4920_v9 = vsub.f32 %v10209_v29, %v4919_v63  ;;  %v10232_v38 = vpack.c.bf16 %v4711_v2, %v4708_v13  ;;  %v10234_v5 = vsub.f32 %v4578_v4, %v4708_v13  ;;  %v7138_v24 = vpop.f32.mrb[26].mxu1 }
 0x548   :  { %v7425_v11 = vpack.c.bf16 %v4914_v55, %v4907_v48  ;;  %v4940_v42 = vand.u32 4294901760, %v10222_v61  ;;  %v4717_v41 = vand.u32 4294901760, %v7138_v24  ;;  %v4590_v45 = vpop.f32.mrb[27].mxu1  ;;  %v4928_v14 = vand.u32 4294901760, %v4927_v32 }
 0x549   :  { %11063 = vst [vmem:[#allocation44_spill] sm:$0xff] %v10232_v38  ;;  %v10237_v56 = vpack.c.bf16 %v4926_v15, %v4919_v63  ;;  %v4933_v1 = vand.u32 4294901760, %v10234_v5  ;;  %v4714_v50 = vand.u32 4294901760, %v4590_v45  ;;  %7402 = vmatprep.subr.bf16.mxu0 %v10232_v38  ;;  %v4921_v52 = vand.u32 4294901760, %v4920_v9 }
 0x54a   :  { %7426 = vmatprep.subr.bf16.mxu1 %v7425_v11  ;;  %v4941_v4 = vsub.f32 %v10222_v61, %v4940_v42  ;;  %v10244_v2 = vsub.f32 %v7138_v24, %v4717_v41  ;;  %7404 = vmatpush3.bf16.msra.mxu0 %v10071_v27  ;;  %v10249_v63 = vsub.f32 %v4626_v10, %v10229_v3 }
 0x54b   :  { %11064 = vst [vmem:[#allocation49_spill] sm:$0xff] %v10237_v56  ;;  %7428 = vmatpush3.bf16.msra.mxu1 %v10075_v53  ;;  %v4934_v15 = vsub.f32 %v10234_v5, %v4933_v1  ;;  %v10252_v55 = vpack.c.bf16 %v4717_v41, %v4714_v50  ;;  %v10254_v48 = vsub.f32 %v4590_v45, %v4714_v50  ;;  %v7141_v11 = vpop.f32.mrb[28].mxu1 }
 0x54c   :  { %v7429_v32 = vpack.c.bf16 %v4928_v14, %v4921_v52  ;;  %v4954_v9 = vand.u32 4294901760, %v10244_v2  ;;  %v4723_v13 = vand.u32 4294901760, %v7141_v11  ;;  %v4602_v24 = vpop.f32.mrb[29].mxu1  ;;  %v4942_v56 = vand.u32 4294901760, %v4941_v4 }
 0x54d   :  { %11065 = vst [vmem:[#allocation48_spill] sm:$0xff] %v10252_v55  ;;  %v10257_v38 = vpack.c.bf16 %v4940_v42, %v4933_v1  ;;  %v4947_v53 = vand.u32 4294901760, %v10254_v48  ;;  %v4720_v27 = vand.u32 4294901760, %v4602_v24  ;;  %7406 = vmatprep.subr.bf16.mxu0 %v10252_v55  ;;  %v4935_v10 = vand.u32 4294901760, %v4934_v15 }
 0x54e   :  { %7430 = vmatprep.subr.bf16.mxu1 %v7429_v32  ;;  %v4955_v41 = vsub.f32 %v10244_v2, %v4954_v9  ;;  %v10264_v14 = vsub.f32 %v7141_v11, %v4723_v13  ;;  %7408 = vmatpush3.bf16.msra.mxu0 %v10087_v22 }
 0x54f   :  { %11066 = vst [vmem:[#allocation53_spill] sm:$0xff] %v10257_v38  ;;  %7432 = vmatpush3.bf16.msra.mxu1 %v10091_v25  ;;  %v4948_v1 = vsub.f32 %v10254_v48, %v4947_v53  ;;  %v10271_v50 = vpack.c.bf16 %v4723_v13, %v4720_v27  ;;  %v10273_v4 = vsub.f32 %v4602_v24, %v4720_v27  ;;  %v7144_v15 = vpop.f32.mrb[30].mxu1 }
 0x550   :  { %v7433_v32 = vpack.c.bf16 %v4942_v56, %v4935_v10  ;;  %v4968_v45 = vand.u32 4294901760, %v10264_v14  ;;  %v4729_v11 = vand.u32 4294901760, %v7144_v15  ;;  %v4614_v38 = vpop.f32.mrb[31].mxu1  ;;  %v4956_v55 = vand.u32 4294901760, %v4955_v41 }
 0x551   :  { %v10276_v22 = vpack.c.bf16 %v4954_v9, %v4947_v53  ;;  %v4961_v25 = vand.u32 4294901760, %v10273_v4  ;;  %v4726_v52 = vand.u32 4294901760, %v4614_v38  ;;  %7410 = vmatprep.subr.bf16.mxu0 %v10271_v50  ;;  %v4949_v42 = vand.u32 4294901760, %v4948_v1 }
 0x552   :  { %7434 = vmatprep.subr.bf16.mxu1 %v7433_v32  ;;  %v7473_v27 = vpack.c.bf16 %v10264_v14, %v10273_v4  ;;  %v4969_v13 = vsub.f32 %v10264_v14, %v4968_v45  ;;  %v10283_v56 = vsub.f32 %v7144_v15, %v4729_v11  ;;  %7412 = vmatpush3.bf16.msra.mxu0 %v10103_v49  ;;  %v11068_v9 = vand.u32 4294901760, %v10227_v44 }
 0x553   :  { %11067 = vst [vmem:[#allocation52_spill] sm:$0xff] %v10276_v22  ;;  %7436 = vmatpush3.bf16.msra.mxu1 %v10107_v57  ;;  %v4962_v53 = vsub.f32 %v10273_v4, %v4961_v25  ;;  %v10291_v10 = vpack.c.bf16 %v4729_v11, %v4726_v52  ;;  %v4974_v41 = vsub.f32 %v4614_v38, %v4726_v52  ;;  %v4741_v14 = vand.u32 4294901760, %v10202_v60 }
 0x554   :  { %v4749_v24 = vsub.f32 %v10227_v44, %v11068_v9  ;;  %v7437_v1 = vpack.c.bf16 %v4956_v55, %v4949_v42  ;;  %v4982_v32 = vand.u32 4294901760, %v10283_v56  ;;  %v4970_v22 = vand.u32 4294901760, %v4969_v13 }
 0x555   :  { %v10295_v15 = vpack.c.bf16 %v4968_v45, %v4961_v25  ;;  %v4975_v49 = vand.u32 4294901760, %v4974_v41  ;;  %7414 = vmatprep.subr.bf16.mxu0 %v10291_v10  ;;  %v4963_v57 = vand.u32 4294901760, %v4962_v53  ;;  %v7477_v9 = vpack.c.bf16 %v10283_v56, %v4974_v41 }
 0x556   :  { %7438 = vmatprep.subr.bf16.mxu1 %v7437_v1  ;;  %v11069_v4 = vand.u32 4294901760, %v10249_v63  ;;  %v4983_v38 = vsub.f32 %v10283_v56, %v4982_v32  ;;  %7416 = vmatpush3.bf16.msra.mxu0 %v10119_v47  ;;  %v11070_v55 = vpack.c.bf16 %v10135_v51, %v10142_v19  ;;  %v4750_v52 = vand.u32 4294901760, %v4749_v24  ;;  %v11083_v51 = vld [vmem:[#allocation30_spill] sm:$0xff]  ;;  %v11100_v24 = vld [vmem:[#allocation39_spill] sm:$0xff]  ;;  %v11102_v1 = vld [vmem:[#allocation45_spill] sm:$0xff] }
 0x557   :  { %7440 = vmatpush3.bf16.msra.mxu1 %v10123_v46  ;;  %v4976_v60 = vsub.f32 %v4974_v41, %v4975_v49  ;;  %v7441_v45 = vpack.c.bf16 %v4970_v22, %v4963_v57  ;;  %v10308_v42 = vpack.c.bf16 %v4982_v32, %v4975_v49  ;;  %v11071_v56 = vpack.c.bf16 %v10011_v20, %v10015_v12  ;;  %v11101_v41 = vld [vmem:[#allocation22_spill] sm:$0xff]  ;;  %v11105_v57 = vld [vmem:[#allocation17_spill] sm:$0xff] }
 0x558   :  { %v4755_v11 = vsub.f32 %v10249_v63, %v11069_v4  ;;  %7450 = vmatprep.subr.bf16.mxu0 %v11070_v55  ;;  %v4984_v25 = vand.u32 4294901760, %v4983_v38  ;;  %v11072_v46 = vpack.c.bf16 %v10154_v0, %v10163_v7  ;;  %v11073_v22 = vpack.c.bf16 %v10022_v31, %v10027_v40  ;;  %v11085_v0 = vld [vmem:[#allocation5_spill] sm:$0xff]  ;;  %v11087_v7 = vld [vmem:[#allocation38_spill] sm:$0xff] }
 0x559   :  { %7442 = vmatprep.subr.bf16.mxu1 %v7441_v45  ;;  %4742 = vmatmul.mubr.f32.vlgmr.msra.gmra.mrb[32].mxu0 %v4741_v14  ;;  %v4977_v13 = vand.u32 4294901760, %v4976_v60  ;;  %v11074_v49 = vpack.c.bf16 %v10175_v23, %v10182_v26  ;;  %v11075_v20 = vpack.c.bf16 %v10036_v39, %v10041_v30  ;;  %v11076_v12 = vpack.c.bf16 %v10195_v28, %v10209_v29  ;;  %v11091_v23 = vld [vmem:[#allocation48_spill] sm:$0xff]  ;;  %v11092_v26 = vld [vmem:[#allocation10_spill] sm:$0xff]  ;;  %v11110_v38 = vld [vmem:[#allocation53_spill] sm:$0xff] }
 0x55a   :  { %v4756_v53 = vand.u32 4294901760, %v4755_v11  ;;  %7452 = vmatpush3.bf16.msra.mxu0 %v11071_v56  ;;  %4751 = vmatprep.mubr.f32.mxu0 %v4750_v52  ;;  %v11077_v31 = vpack.c.bf16 %v10052_v35, %v10057_v6  ;;  %v11078_v40 = vpack.c.bf16 %v10222_v61, %v10234_v5  ;;  %v11079_v39 = vand.u32 4294901760, %v10004_v18  ;;  %v11082_v6 = vld [vmem:[#allocation21_spill] sm:$0xff]  ;;  %v11093_v28 = vld [vmem:[#allocation14_spill] sm:$0xff] }
 0x55b   :  { %7444 = vmatpush3.bf16.msra.mxu1 %v10144_v17  ;;  %7454 = vmatprep.subr.bf16.mxu0 %v11072_v46  ;;  %v7445_v19 = vpack.c.bf16 %v4984_v25, %v4977_v13  ;;  %v11080_v30 = vpack.c.bf16 %v10068_v21, %v10073_v8  ;;  %v11081_v35 = vpack.c.bf16 %v10244_v2, %v10254_v48  ;;  %v11088_v21 = vld [vmem:[#allocation15_spill] sm:$0xff]  ;;  %v11095_v61 = vld [vmem:[#allocation29_spill] sm:$0xff]  ;;  %v11096_v5 = vld [vmem:[#allocation42_spill] sm:$0xff]  ;;  %v11107_v4 = vand.u32 4294901760, %v10227_v44 }
 0x55c   :  { %v11084_v17 = vpack.c.bf16 %v11082_v6, %v11083_v51  ;;  %v11089_v8 = vpack.c.bf16 %v11087_v7, %v11088_v21  ;;  %v11094_v29 = vpack.c.bf16 %v11092_v26, %v11093_v28  ;;  %v11097_v2 = vld [vmem:[#allocation31_spill] sm:$0xff]  ;;  %v11098_v48 = vld [vmem:[#allocation20_spill] sm:$0xff]  ;;  %v11103_v32 = vld [vmem:[#allocation18_spill] sm:$0xff]  ;;  %v11108_v11 = vand.u32 4294901760, %v10249_v63 }
 0x55d   :  { %7446 = vmatprep.subr.bf16.mxu1 %v7445_v19  ;;  %4757 = vmatmul.mubr.f32.gmra.mrb[34].mxu0 %v4756_v53  ;;  %v11104_v14 = vand.u32 4294901760, %v11097_v2 }
 0x55e   :  { %7456 = vmatpush3.bf16.msra.mxu0 %v11073_v22  ;;  %5131 = vmatprep.mubr.f32.mxu0 %v10004_v18  ;;  %v11086_v18 = vld [vmem:[#allocation44_spill] sm:$0xff] }
 0x55f   :  { %7448 = vmatpush3.bf16.msra.mxu1 %v10165_v16  ;;  %7458 = vmatprep.subr.bf16.mxu0 %v11074_v49  ;;  %v11090_v16 = vld [vmem:[#allocation26_spill] sm:$0xff] }
 0x560   :  { %7482 = vmatprep.subr.bf16.mxu1 %v10140_v36 }
 0x562   :  { %4989 = vmatmul.mubr.f32.vlgmr.msra.gmra.mrb[32].mxu1 %v10137_v58  ;;  %7460 = vmatpush3.bf16.msra.mxu0 %v11075_v20 }
 0x563   :  { %7484 = vmatpush3.bf16.msra.mxu1 %v10013_v54  ;;  %7462 = vmatprep.subr.bf16.mxu0 %v11076_v12 }
 0x564   :  { %7486 = vmatprep.subr.bf16.mxu1 %v10161_v43  ;;  %4994 = vmatprep.mubr.f32.mxu1 %v10204_v37 }
 0x566   :  { %4996 = vmatmul.mubr.f32.gmra.mrb[34].mxu1 %v10229_v3  ;;  %7464 = vmatpush3.bf16.msra.mxu0 %v11077_v31 }
 0x567   :  { %7488 = vmatpush3.bf16.msra.mxu1 %v10025_v34  ;;  %7466 = vmatprep.subr.bf16.mxu0 %v11078_v40 }
 0x568   :  { %7490 = vmatprep.subr.bf16.mxu1 %v10180_v62  ;;  %5247 = vmatprep.mubr.f32.mxu1 %v11079_v39 }
 0x56a   :  { %7468 = vmatpush3.bf16.msra.mxu0 %v11080_v30 }
 0x56b   :  { %7492 = vmatpush3.bf16.msra.mxu1 %v10039_v59  ;;  %7470 = vmatprep.subr.bf16.mxu0 %v11081_v35 }
 0x56c   :  { %7494 = vmatprep.subr.bf16.mxu1 %v10207_v33 }
 0x56e   :  { %7472 = vmatpush3.bf16.msra.mxu0 %v11084_v17 }
 0x56f   :  { %7496 = vmatpush3.bf16.msra.mxu1 %v11085_v0  ;;  %7474 = vmatprep.subr.bf16.mxu0 %v7473_v27  ;;  %v11099_v27 = vld [vmem:[#allocation13_spill] sm:$0xff] }
 0x570   :  { %7498 = vmatprep.subr.bf16.mxu1 %v11086_v18 }
 0x572   :  { %7476 = vmatpush3.bf16.msra.mxu0 %v11089_v8 }
 0x573   :  { %7500 = vmatpush3.bf16.msra.mxu1 %v11090_v16  ;;  %7478 = vmatprep.subr.bf16.mxu0 %v7477_v9  ;;  %v11106_v9 = vld [vmem:[#allocation49_spill] sm:$0xff] }
 0x574   :  { %7502 = vmatprep.subr.bf16.mxu1 %v11091_v23 }
 0x576   :  { %7480 = vmatpush3.bf16.msra.mxu0 %v11094_v29 }
 0x577   :  { %7504 = vmatpush3.bf16.msra.mxu1 %v11095_v61  ;;  %7514 = vmatprep.subr.bf16.mxu0 %v11096_v5 }
 0x578   :  { %7506 = vmatprep.subr.bf16.mxu1 %v10271_v50 }
 0x579   :  { %5134 = vmatmul.mubr.f32.vlgmr.msra.gmra.mrb[36].mxu0 %v11097_v2 }
 0x57a   :  { %7516 = vmatpush3.bf16.msra.mxu0 %v11099_v27  ;;  %5140 = vmatprep.mubr.f32.mxu0 %v10227_v44  ;;  %v11113_v44 = vld [vmem:[#allocation28_spill] sm:$0xff] }
 0x57b   :  { %7508 = vmatpush3.bf16.msra.mxu1 %v11098_v48  ;;  %7518 = vmatprep.subr.bf16.mxu0 %v11100_v24 }
 0x57c   :  { %7510 = vmatprep.subr.bf16.mxu1 %v10291_v10 }
 0x57d   :  { %5143 = vmatmul.mubr.f32.gmra.mrb[38].mxu0 %v10249_v63 }
 0x57e   :  { %7520 = vmatpush3.bf16.msra.mxu0 %v11101_v41  ;;  %5428 = vmatprep.mubr.f32.mxu0 %v11103_v32 }
 0x57f   :  { %7512 = vmatpush3.bf16.msra.mxu1 %v10119_v47  ;;  %7522 = vmatprep.subr.bf16.mxu0 %v11102_v1 }
 0x580   :  { %7546 = vmatprep.subr.bf16.mxu1 %v10140_v36  ;;  %v11109_v36 = vld [vmem:[#allocation7_spill] sm:$0xff] }
 0x582   :  { %5251 = vmatmul.mubr.f32.vlgmr.msra.gmra.mrb[36].mxu1 %v11104_v14  ;;  %7524 = vmatpush3.bf16.msra.mxu0 %v11105_v57 }
 0x583   :  { %7548 = vmatpush3.bf16.msra.mxu1 %v10013_v54  ;;  %7526 = vmatprep.subr.bf16.mxu0 %v11106_v9  ;;  %v11111_v54 = vld [vmem:[#allocation37_spill] sm:$0xff] }
 0x584   :  { %7550 = vmatprep.subr.bf16.mxu1 %v10161_v43  ;;  %5258 = vmatprep.mubr.f32.mxu1 %v11107_v4  ;;  %v11112_v43 = vld [vmem:[#allocation52_spill] sm:$0xff] }
 0x586   :  { %5262 = vmatmul.mubr.f32.gmra.mrb[38].mxu1 %v11108_v11  ;;  %7528 = vmatpush3.bf16.msra.mxu0 %v11109_v36 }
 0x587   :  { %7552 = vmatpush3.bf16.msra.mxu1 %v10025_v34  ;;  %7530 = vmatprep.subr.bf16.mxu0 %v11110_v38  ;;  %v11114_v34 = vld [vmem:[#allocation23_spill] sm:$0xff] }
 0x588   :  { %7554 = vmatprep.subr.bf16.mxu1 %v10180_v62  ;;  %5539 = vmatprep.mubr.f32.mxu1 %v11103_v32 }
 0x58a   :  { %7532 = vmatpush3.bf16.msra.mxu0 %v11111_v54 }
 0x58b   :  { %7556 = vmatpush3.bf16.msra.mxu1 %v10039_v59  ;;  %7534 = vmatprep.subr.bf16.mxu0 %v11112_v43  ;;  %v11115_v59 = vld [vmem:[#allocation36_spill] sm:$0xff] }
 0x58c   :  { %7558 = vmatprep.subr.bf16.mxu1 %v10207_v33 }
 0x58e   :  { %7536 = vmatpush3.bf16.msra.mxu0 %v11113_v44 }
 0x58f   :  { %7560 = vmatpush3.bf16.msra.mxu1 %v11085_v0  ;;  %7538 = vmatprep.subr.bf16.mxu0 %v10295_v15  ;;  %v5596_v15 = vld [vmem:[%s10448_s7] ss:$0 sm:$0xff] }
 0x590   :  { %7562 = vmatprep.subr.bf16.mxu1 %v11086_v18 }
 0x592   :  { %7540 = vmatpush3.bf16.msra.mxu0 %v11114_v34 }
 0x593   :  { %7564 = vmatpush3.bf16.msra.mxu1 %v11090_v16  ;;  %7542 = vmatprep.subr.bf16.mxu0 %v10308_v42 }
 0x594   :  { %7566 = vmatprep.subr.bf16.mxu1 %v11091_v23 }
 0x596   :  { %7544 = vmatpush3.bf16.msra.mxu0 %v11115_v59 }
 0x597   :  { %7568 = vmatpush3.bf16.msra.mxu1 %v11095_v61 }
 0x598   :  { %7570 = vmatprep.subr.bf16.mxu1 %v10271_v50 }
 0x599   :  { %5430 = vmatmul.mubr.f32.vlgmr.msra.gmra.mrb[40].mxu0 %v10137_v58 }
 0x59a   :  { %5435 = vmatprep.mubr.f32.mxu0 %v10204_v37 }
 0x59b   :  { %7572 = vmatpush3.bf16.msra.mxu1 %v11098_v48 }
 0x59c   :  { %7574 = vmatprep.subr.bf16.mxu1 %v10291_v10 }
 0x59d   :  { %5437 = vmatmul.mubr.f32.gmra.mrb[42].mxu0 %v10229_v3 }
 0x59f   :  { %7576 = vmatpush3.bf16.msra.mxu1 %v10119_v47 }
 0x5a2   :  { %5541 = vmatmul.mubr.f32.vlgmr.msra.gmra.mrb[40].mxu1 %v10137_v58 }
 0x5a3   :  { %5546 = vmatprep.mubr.f32.mxu1 %v10204_v37 }
 0x5a6   :  { %5548 = vmatmul.mubr.f32.gmra.mrb[42].mxu1 %v10229_v3 }
 0x62c   :  { %v6133_v62 = vpop.f32.mrb[32].mxu0 }
 0x62d   :  { %v6134_v33 = vpop.f32.mrb[33].mxu0 }
 0x62e   :  { %v6135_v63 = vadd.f32 %v6134_v33, %v6133_v62 }
 0x630   :  { %v6136_v50 = vpop.f32.mrb[34].mxu0  ;;  %v4744_v55 = vadd.f32 %v6135_v63, %v5596_v15 }
 0x631   :  { %v6137_v60 = vpop.f32.mrb[35].mxu0 }
 0x632   :  { %v6138_v10 = vadd.f32 %v6137_v60, %v6136_v50 }
 0x634   :  { %v4759_v42 = vadd.f32 %v6138_v10, %v5596_v15 }
 0x635   :  { %v6171_v45 = vpop.f32.mrb[32].mxu1 }
 0x636   :  { %v6172_v52 = vpop.f32.mrb[33].mxu1 }
 0x637   :  { %v6173_v47 = vadd.f32 %v6172_v52, %v6171_v45 }
 0x639   :  { %v4991_v58 = vadd.f32 %v6173_v47, %v4744_v55  ;;  %v6174_v25 = vpop.f32.mrb[34].mxu1 }
 0x63a   :  { %v6175_v37 = vpop.f32.mrb[35].mxu1 }
 0x63b   :  { %v6176_v13 = vadd.f32 %v6175_v37, %v6174_v25 }
 0x63d   :  { %v4998_v3 = vadd.f32 %v6176_v13, %v4759_v42 }
 0x64c   :  { %v6209_v53 = vpop.f32.mrb[36].mxu0 }
 0x64d   :  { %v6210_v56 = vpop.f32.mrb[37].mxu0 }
 0x64e   :  { %v6211_v46 = vadd.f32 %v6210_v56, %v6209_v53 }
 0x650   :  { %v5136_v19 = vadd.f32 %v6211_v46, %v4991_v58  ;;  %v6212_v22 = vpop.f32.mrb[38].mxu0 }
 0x651   :  { %v6213_v49 = vpop.f32.mrb[39].mxu0 }
 0x652   :  { %v6214_v20 = vadd.f32 %v6213_v49, %v6212_v22 }
 0x654   :  { %v5145_v31 = vadd.f32 %v6214_v20, %v4998_v3 }
 0x655   :  { %v6247_v12 = vpop.f32.mrb[36].mxu1 }
 0x656   :  { %v6248_v40 = vpop.f32.mrb[37].mxu1 }
 0x657   :  { %v6249_v39 = vadd.f32 %v6248_v40, %v6247_v12 }
 0x659   :  { %v5253_v30 = vadd.f32 %v6249_v39, %v5136_v19  ;;  %v6250_v35 = vpop.f32.mrb[38].mxu1 }
 0x65a   :  { %v6251_v6 = vpop.f32.mrb[39].mxu1 }
 0x65b   :  { %v6252_v51 = vadd.f32 %v6251_v6, %v6250_v35 }
 0x65d   :  { %v5264_v17 = vadd.f32 %v6252_v51, %v5145_v31 }
 0x66c   :  { %v6285_v0 = vpop.f32.mrb[40].mxu0 }
 0x66d   :  { %v6286_v18 = vpop.f32.mrb[41].mxu0 }
 0x66e   :  { %v6287_v7 = vadd.f32 %v6286_v18, %v6285_v0 }
 0x670   :  { %v5432_v21 = vadd.f32 %v6287_v7, %v5253_v30  ;;  %v6288_v8 = vpop.f32.mrb[42].mxu0 }
 0x671   :  { %v6289_v16 = vpop.f32.mrb[43].mxu0 }
 0x672   :  { %v6290_v23 = vadd.f32 %v6289_v16, %v6288_v8 }
 0x674   :  { %v5439_v28 = vadd.f32 %v6290_v23, %v5264_v17 }
 0x675   :  { %v6323_v26 = vpop.f32.mrb[40].mxu1 }
 0x676   :  { %v6324_v29 = vpop.f32.mrb[41].mxu1 }
 0x677   :  { %v6325_v61 = vadd.f32 %v6324_v29, %v6323_v26 }
 0x679   :  { %v5543_v5 = vadd.f32 %v6325_v61, %v5432_v21  ;;  %v6326_v2 = vpop.f32.mrb[42].mxu1 }
 0x67a   :  { %v6327_v48 = vpop.f32.mrb[43].mxu1 }
 0x67b   :  { %v6328_v27 = vadd.f32 %v6327_v48, %v6326_v2  ;;  %v5554_v24 = vsel %vm5553_vm6, %v5543_v5, -inf }
 0x67c   :  { %5555 = vmax.xlane.f32.xlu0 %v5554_v24 }
 0x67d   :  { %v5550_v41 = vadd.f32 %v6328_v27, %v5439_v28 }
 0x67f   :  { %v5557_v1 = vsel %vm5553_vm6, %v5550_v41, -inf }
 0x680   :  { %5558 = vmax.xlane.f32.xlu1 %v5557_v1 }
 0x691   :  { %5578 = vrot.lane.b32.xlu1 %v5543_v5, %s7968_s16 }
 0x709   :  { %v5556_v32 = vpop.xlane.xlu0 %5555 }
 0x70a   :  { %v5560_v14 = vsub.f32 %v5543_v5, %v5556_v32 }
 0x70c   :  { %v5562_v57 = vmul.f32 1.442695, %v5560_v14 }
 0x70d   :  { %v5559_v9 = vpop.xlane.xlu1 %5558 }
 0x70e   :  { %7934 = vpow2.f32 %v5562_v57  ;;  %v5561_v4 = vsub.f32 %v5550_v41, %v5559_v9 }
 0x710   :  { %v5564_v11 = vmul.f32 1.442695, %v5561_v4 }
 0x711   :  { %v5579_v33 = vpop.permute.xlu1 %5578 }
 0x712   :  { %7936 = vpow2.f32 %v5564_v11 }
 0x718   :  { %v7935_v36 = vpop.eup %7934 }
 0x719   :  { %v5566_v38 = vsel %vm5553_vm6, %v7935_v36, 0.0 }
 0x71a   :  { %5567 = vadd.xlane.f32.xlu0 %v5566_v38 }
 0x71c   :  { %v7937_v54 = vpop.eup %7936 }
 0x71d   :  { %v5569_v43 = vsel %vm5553_vm6, %v7937_v54, 0.0 }
 0x71e   :  { %5570 = vadd.xlane.f32.xlu0 %v5569_v43 }
 0x734   :  { %5580 = vrot.lane.b32.xlu0 %v5550_v41, %s7968_s16 }
 0x7a7   :  { %v5568_v44 = vpop.xlane.xlu0 %5567 }
 0x7a8   :  { %7938 = vrcp.f32 %v5568_v44 }
 0x7ab   :  { %v5571_v34 = vpop.xlane.xlu0 %5570 }
 0x7ac   :  { %7940 = vrcp.f32 %v5571_v34 }
 0x7af   :  { %v5581_v60 = vpop.permute.xlu0 %5580 }
 0x7b2   :  { %v7939_v59 = vpop.eup %7938 }
 0x7b3   :  { %v5573_v62 = vmul.f32 %v7939_v59, %v7935_v36 }
 0x7b5   :  { %v5584_v63 = vsel %vm5553_vm6, %v5573_v62, %v5579_v33 }
 0x7b6   :  { %v7941_v50 = vpop.eup %7940  ;;  %5586 = vst.msk [vmem:[%s10449_s8] sm:$0xff] %vm513_vm2, %v5584_v63 }
 0x7b7   :  { %v5575_v15 = vmul.f32 %v7941_v50, %v7937_v54 }
 0x7b9   :  { %v5585_v10 = vsel %vm5553_vm6, %v5575_v15, %v5581_v60 }
 0x7ba   :  { %5587 = vst.msk [vmem:[%s10449_s8 + $0x8] sm:$0xff] %vm513_vm2, %v5585_v10 }
 0x7bb   :  { %5592 = vsyncpa [#allocation3], 1 }

</bundles_post_ra>
